<compile_context>
chip_gen: v7x
topology: tpu7x:2x2x1
jax: 0.10.0
libtpu: 0.0.40
codegen_flags: <defaults>
</compile_context>

<pallas_src>
import functools
import math

import jax
import jax.numpy as jnp
from jax import lax
from jax.experimental import pallas as pl
from jax.experimental.pallas import tpu as pltpu

_LANE = 128


def _round_up(v, m):
    return ((v + m - 1) // m) * m


def _pick_tile(n, cap):
    """Largest MXU-friendly tile <= cap dividing n (n is a multiple of 128)."""
    for t in (512, 256, 128):
        if t <= cap and n % t == 0:
            return t
    return min(n, cap)


def _vmem_limit_bytes(tq, tk, cp):
    est = (
        2 * tq * cp * 4          # raw q/residual tile, double-buffered f32
        + 2 * 2 * tk * cp * 2    # k and v tiles, double-buffered bf16
        + 2 * cp * cp * 2        # wq + wp, single-buffered bf16
        + 2 * cp * 4             # biases (f32)
        + 2 * tq * cp * 4        # output tile, double-buffered f32
        + tq * cp * 2            # q scratch (bf16)
        + tq * cp * 4            # accumulator (f32)
        + 2 * tq * 4             # running max / denom
        + 4 * tq * tk * 4        # s/p intermediates headroom
    )
    return int(min(max(32 * 1024 * 1024, int(est * 1.5)), 64 * 1024 * 1024))


# ----------------------------------------------------------------------------
# Prologue: project k and v once per token (fused kv weight, bf16 MXU, f32 acc).
# ----------------------------------------------------------------------------
def _kv_projection_kernel(x_ref, wkv_ref, bkv_ref, k_ref, v_ref, *, cp):
    x = x_ref[0].astype(jnp.bfloat16)                               # (TKV, Cp)
    kv = jnp.dot(x, wkv_ref[...],
                 preferred_element_type=jnp.float32) + bkv_ref[...]  # (TKV, 2Cp) f32
    k_ref[0] = kv[:, :cp].astype(k_ref.dtype)
    v_ref[0] = kv[:, cp:].astype(v_ref.dtype)


# ----------------------------------------------------------------------------
# Main flash-attention kernel: q projection (once per q tile), online softmax
# over pre-projected k/v tiles, output projection + residual in the finalize.
# ----------------------------------------------------------------------------
def _flash_self_attention_kernel(xq_ref, k_ref, v_ref, wq_ref, bq_ref,
                                 wp_ref, bp_ref, o_ref,
                                 q_scr, m_scr, l_scr, acc_scr,
                                 *, n_valid, tk, mask_kv):
    ki = pl.program_id(2)

    # --- init: project this q tile once (1/sqrt(C) is folded into wq/bq) ---
    @pl.when(ki == 0)
    def _():
        xq = xq_ref[0].astype(jnp.bfloat16)                          # (TQ, Cp)
        q = jnp.dot(xq, wq_ref[...],
                    preferred_element_type=jnp.float32) + bq_ref[...]
        q_scr[...] = q.astype(q_scr.dtype)                           # bf16 MXU lhs
        m_scr[...] = jnp.full(m_scr.shape, -jnp.inf, jnp.float32)
        l_scr[...] = jnp.zeros(l_scr.shape, jnp.float32)
        acc_scr[...] = jnp.zeros(acc_scr.shape, jnp.float32)

    k = k_ref[0]                                                     # (TK, Cp) bf16
    v = v_ref[0]                                                     # (TK, Cp) bf16

    # q @ k^T via transposed-RHS contraction (no in-kernel transpose).
    s = lax.dot_general(q_scr[...], k,
                        dimension_numbers=(((1,), (1,)), ((), ())),
                        preferred_element_type=jnp.float32)          # (TQ, TK)

    if mask_kv:  # only traced when N was padded up to a multiple of 128
        col = ki * tk + lax.broadcasted_iota(jnp.int32, s.shape, 1)
        s = jnp.where(col < n_valid, s, -jnp.inf)

    m_prev = m_scr[...]
    m_new = jnp.maximum(m_prev, jnp.max(s, axis=-1, keepdims=True))
    alpha = jnp.exp(m_prev - m_new)
    p = jnp.exp(s - m_new)
    l_scr[...] = alpha * l_scr[...] + jnp.sum(p, axis=-1, keepdims=True)
    acc_scr[...] = alpha * acc_scr[...] + jnp.dot(p.astype(jnp.bfloat16), v,
                                                  preferred_element_type=jnp.float32)
    m_scr[...] = m_new

    # --- finalize: single normalization, output projection, residual add ---
    @pl.when(ki == pl.num_programs(2) - 1)
    def _():
        a = (acc_scr[...] * pl.reciprocal(l_scr[...], approx=True)).astype(jnp.bfloat16)
        out = jnp.dot(a, wp_ref[...],
                      preferred_element_type=jnp.float32) + bp_ref[...]
        o_ref[0] = (out + xq_ref[0]).astype(o_ref.dtype)


def self_attention_forward(x, params, *, eps=1e-5):
    B, C, H, W = x.shape
    N = H * W
    Cp = _round_up(C, _LANE)          # lane-dense channel dim
    Np = _round_up(N, _LANE)          # lane/sublane-friendly sequence dim
    x = x.astype(jnp.float32)

    # ---- BatchNorm2d (training-mode batch stats), folded into the qkv Linear ----
    mean = jnp.mean(x, axis=(0, 2, 3))                     # (C,)
    var = jnp.var(x, axis=(0, 2, 3))                       # biased, as PyTorch BN
    bn_scale = params["bn_weight"].astype(jnp.float32) / jnp.sqrt(var + eps)
    bn_shift = params["bn_bias"].astype(jnp.float32) - mean * bn_scale

    wkqv = params["kqv_w"].astype(jnp.float32)             # (3C, C)
    bkqv = params["kqv_b"].astype(jnp.float32)             # (3C,)
    w_eff = wkqv * bn_scale[None, :]                       # fold per-channel scale
    b_eff = bkqv + wkqv @ bn_shift                         # fold per-channel shift

    inv_scale = 1.0 / math.sqrt(C)                         # true channel count
    wq_t = w_eff[:C].T * inv_scale                         # fold 1/sqrt(C) into q
    bq = b_eff[:C] * inv_scale
    wk_t = w_eff[C:2 * C].T
    wv_t = w_eff[2 * C:].T
    bk, bv = b_eff[C:2 * C], b_eff[2 * C:]
    wp_t = params["proj_w"].astype(jnp.float32).T
    bp = params["proj_b"].astype(jnp.float32)

    def pad_w(w):                                          # (C, C) -> (Cp, Cp)
        return jnp.zeros((Cp, Cp), jnp.float32).at[:C, :C].set(w)

    def pad_b(b):                                          # (C,) -> (1, Cp)
        return jnp.zeros((1, Cp), jnp.float32).at[0, :C].set(b)

    w_q = pad_w(wq_t).astype(jnp.bfloat16)
    w_kv = jnp.concatenate([pad_w(wk_t), pad_w(wv_t)], axis=1).astype(jnp.bfloat16)
    w_p = pad_w(wp_t).astype(jnp.bfloat16)
    b_q = pad_b(bq)
    b_kv = jnp.concatenate([pad_b(bk), pad_b(bv)], axis=1)          # (1, 2Cp) f32
    b_p = pad_b(bp)

    # ---- tokens: NCHW -> (B, Np, Cp), zero-padded channels and sequence ----
    tok = jnp.transpose(x.reshape(B, C, N), (0, 2, 1))              # (B, N, C)
    tok = jnp.pad(tok, ((0, 0), (0, Np - N), (0, Cp - C)))

    # ---- tile selection (VMEM-budget aware) ----
    tq = _pick_tile(Np, 256 if Cp >= 512 else 512)
    tk = _pick_tile(Np, 256)
    mask_kv = Np != N

    # ---- prologue: project k/v once per token ----
    tkv = _pick_tile(Np, 512)
    k_proj, v_proj = pl.pallas_call(
        functools.partial(_kv_projection_kernel, cp=Cp),
        out_shape=(jax.ShapeDtypeStruct((B, Np, Cp), jnp.bfloat16),
                   jax.ShapeDtypeStruct((B, Np, Cp), jnp.bfloat16)),
        grid=(B, Np // tkv),
        in_specs=[pl.BlockSpec((1, tkv, Cp), lambda b, i: (b, i, 0)),
                  pl.BlockSpec((Cp, 2 * Cp), lambda b, i: (0, 0),
                               pipeline_mode=pl.Buffered(1)),
                  pl.BlockSpec((1, 2 * Cp), lambda b, i: (0, 0),
                               pipeline_mode=pl.Buffered(1))],
        out_specs=(pl.BlockSpec((1, tkv, Cp), lambda b, i: (b, i, 0)),
                   pl.BlockSpec((1, tkv, Cp), lambda b, i: (b, i, 0))),
        compiler_params=pltpu.CompilerParams(
            dimension_semantics=("parallel", "parallel"),
            vmem_limit_bytes=32 * 1024 * 1024),
    )(tok, w_kv, b_kv)

    # ---- main flash-attention kernel ----
    kernel = functools.partial(_flash_self_attention_kernel,
                               n_valid=N, tk=tk, mask_kv=mask_kv)
    grid = (B, Np // tq, Np // tk)

    def const_spec(shape):
        return pl.BlockSpec(shape, lambda b, qi, ki: (0, 0),
                            pipeline_mode=pl.Buffered(1))

    out_tok = pl.pallas_call(
        kernel,
        out_shape=jax.ShapeDtypeStruct((B, Np, Cp), jnp.float32),
        grid=grid,
        in_specs=[pl.BlockSpec((1, tq, Cp), lambda b, qi, ki: (b, qi, 0)),
                  pl.BlockSpec((1, tk, Cp), lambda b, qi, ki: (b, ki, 0)),
                  pl.BlockSpec((1, tk, Cp), lambda b, qi, ki: (b, ki, 0)),
                  const_spec((Cp, Cp)), const_spec((1, Cp)),
                  const_spec((Cp, Cp)), const_spec((1, Cp))],
        out_specs=pl.BlockSpec((1, tq, Cp), lambda b, qi, ki: (b, qi, 0)),
        scratch_shapes=[
            pltpu.VMEM((tq, Cp), jnp.bfloat16),  # projected q tile (MXU lhs)
            pltpu.VMEM((tq, 1), jnp.float32),    # running max
            pltpu.VMEM((tq, 1), jnp.float32),    # running denominator
            pltpu.VMEM((tq, Cp), jnp.float32),   # un-normalized output accumulator
        ],
        compiler_params=pltpu.CompilerParams(
            dimension_semantics=("parallel", "parallel", "arbitrary"),
            vmem_limit_bytes=_vmem_limit_bytes(tq, tk, Cp)),
    )(tok, k_proj, v_proj, w_q, b_q, w_p, b_p)

    # (B, Np, Cp) -> drop sequence/channel padding -> NCHW
    out = out_tok[:, :N, :C]
    return jnp.transpose(out, (0, 2, 1)).reshape(B, C, H, W)


def _reference_forward(x, params):
    """Pure-JAX f32 reference matching the PyTorch module semantics."""
    B, C, H, W = x.shape
    N = H * W
    eps = 1e-5
    mean = jnp.mean(x, axis=(0, 2, 3), keepdims=True)
    var = jnp.var(x, axis=(0, 2, 3), keepdims=True)
    xn = ((x - mean) / jnp.sqrt(var + eps)
          * params["bn_weight"].reshape(1, C, 1, 1)
          + params["bn_bias"].reshape(1, C, 1, 1))
    t = jnp.transpose(xn.reshape(B, C, N), (0, 2, 1))
    kqv = t @ params["kqv_w"].T + params["kqv_b"]
    q, k, v = kqv[..., :C], kqv[..., C:2 * C], kqv[..., 2 * C:]
    s = jnp.einsum("bnc,bmc->bnm", q, k) / math.sqrt(C)
    p = jax.nn.softmax(s, axis=-1)
    a = jnp.einsum("bnm,bmc->bnc", p, v)
    out = a @ params["proj_w"].T + params["proj_b"]
    return jnp.transpose(out, (0, 2, 1)).reshape(B, C, H, W) + x


def init_params(key, n_features):
    """Deterministic synthetic parameters (shapes match the PyTorch module)."""
    C = n_features
    k1, k2, k3, k4, k5, k6 = jax.random.split(key, 6)
    return {
        # nn.BatchNorm2d(C)
        "bn_weight": 1.0 + 0.1 * jax.random.normal(k5, (C,), jnp.float32),
        "bn_bias": 0.1 * jax.random.normal(k6, (C,), jnp.float32),
        # nn.Linear(C, 3C)
        "kqv_w": jax.random.normal(k1, (3 * C, C), jnp.float32) * 0.1,
        "kqv_b": jax.random.normal(k2, (3 * C,), jnp.float32) * 0.1,
        # nn.Linear(C, C)
        "proj_w": jax.random.normal(k3, (C, C), jnp.float32) * 0.1,
        "proj_b": jax.random.normal(k4, (C,), jnp.float32) * 0.1,
    }


if __name__ == "__main__":
    key = jax.random.PRNGKey(0)
    kx, kp, kx2 = jax.random.split(key, 3)

    fwd = jax.jit(self_attention_forward)

    # Primary check: N a multiple of 128 (no sequence padding path).
    B, C, H, W = 2, 4, 16, 16
    x = jax.random.normal(kx, (B, C, H, W), jnp.float32)
    params = init_params(kp, C)
    out = jax.block_until_ready(fwd(x, params))
    ref = _reference_forward(x, params)
    assert out.shape == (B, C, H, W)
    assert jnp.allclose(out, ref, atol=2e-2, rtol=2e-2), "mismatch vs reference (N%128==0)"

    # Secondary check: N not a multiple of 128 exercises the padded/masked kv path.
    H2, W2 = 12, 12
    x2 = jax.random.normal(kx2, (B, C, H2, W2), jnp.float32)
    out2 = jax.block_until_ready(fwd(x2, params))
    ref2 = _reference_forward(x2, params)
    assert out2.shape == (B, C, H2, W2)
    assert jnp.allclose(out2, ref2, atol=2e-2, rtol=2e-2), "mismatch vs reference (padded N)"

    print("KERNEL_OK")
</pallas_src>

<mosaic_0001>
module attributes {stable_mosaic.version = 11 : i64} {
  func.func @_kv_projection_kernel(%arg0: i32, %arg1: i32, %arg2: memref<1x256x128xf32, #tpu.memory_space<vmem>>, %arg3: memref<128x256xbf16, #tpu.memory_space<vmem>>, %arg4: memref<1x256xf32, #tpu.memory_space<vmem>>, %arg5: memref<1x256x128xbf16, #tpu.memory_space<vmem>>, %arg6: memref<1x256x128xbf16, #tpu.memory_space<vmem>>) attributes {dimension_semantics = [#tpu.dimension_semantics<parallel>, #tpu.dimension_semantics<parallel>], iteration_bounds = array<i64: 2, 1>, scalar_prefetch = 0 : i64, scratch_operands = 0 : i64, tpu.core_type = #tpu.core_type<tc>, window_params = [{transform_indices = @transform_0, window_bounds = array<i64: 1, 256, 128>}, {pipeline_mode = #tpu.pipeline_mode<synchronous>, transform_indices = @transform_1, window_bounds = array<i64: 128, 256>}, {pipeline_mode = #tpu.pipeline_mode<synchronous>, transform_indices = @transform_2, window_bounds = array<i64: 1, 256>}, {transform_indices = @transform_3, window_bounds = array<i64: 1, 256, 128>}, {transform_indices = @transform_4, window_bounds = array<i64: 1, 256, 128>}]} {
    %c0 = arith.constant 0 : index
    %c0_0 = arith.constant 0 : index
    %c0_1 = arith.constant 0 : index
    %0 = vector.load %arg2[%c0, %c0_0, %c0_1] : memref<1x256x128xf32, #tpu.memory_space<vmem>>, vector<1x256x128xf32>
    %1 = vector.shape_cast %0 : vector<1x256x128xf32> to vector<256x128xf32>
    %2 = arith.truncf %1 : vector<256x128xf32> to vector<256x128xbf16>
    %c0_2 = arith.constant 0 : index
    %c0_3 = arith.constant 0 : index
    %3 = vector.load %arg3[%c0_2, %c0_3] : memref<128x256xbf16, #tpu.memory_space<vmem>>, vector<128x256xbf16>
    %cst = arith.constant dense<0.000000e+00> : vector<256x256xf32>
    %4 = tpu.matmul %2, %3, %cst {dimension_numbers = #tpu.dot_dimension_numbers<[1], [0], [0], [1], [0, 0, 1, 1], [], []>} : vector<256x128xbf16>, vector<128x256xbf16>, vector<256x256xf32> -> vector<256x256xf32>
    %c0_4 = arith.constant 0 : index
    %c0_5 = arith.constant 0 : index
    %5 = vector.load %arg4[%c0_4, %c0_5] : memref<1x256xf32, #tpu.memory_space<vmem>>, vector<1x256xf32>
    %6 = vector.broadcast %5 : vector<1x256xf32> to vector<256x256xf32>
    %7 = arith.addf %4, %6 : vector<256x256xf32>
    %8 = vector.extract_strided_slice %7 {offsets = [0, 0], sizes = [256, 128], strides = [1, 1]} : vector<256x256xf32> to vector<256x128xf32>
    %9 = arith.truncf %8 : vector<256x128xf32> to vector<256x128xbf16>
    %c0_6 = arith.constant 0 : index
    %c0_7 = arith.constant 0 : index
    %c0_8 = arith.constant 0 : index
    %10 = vector.load %arg5[%c0_6, %c0_7, %c0_8] : memref<1x256x128xbf16, #tpu.memory_space<vmem>>, vector<1x256x128xbf16>
    %11 = vector.shape_cast %10 : vector<1x256x128xbf16> to vector<256x128xbf16>
    %12 = vector.shape_cast %9 : vector<256x128xbf16> to vector<1x256x128xbf16>
    tpu.vector_store %arg5[%c0_6, %c0_7, %c0_8], %12 {strides = array<i32>} : memref<1x256x128xbf16, #tpu.memory_space<vmem>>, vector<1x256x128xbf16>,
    %13 = vector.extract_strided_slice %7 {offsets = [0, 128], sizes = [256, 128], strides = [1, 1]} : vector<256x256xf32> to vector<256x128xf32>
    %14 = arith.truncf %13 : vector<256x128xf32> to vector<256x128xbf16>
    %c0_9 = arith.constant 0 : index
    %c0_10 = arith.constant 0 : index
    %c0_11 = arith.constant 0 : index
    %15 = vector.load %arg6[%c0_9, %c0_10, %c0_11] : memref<1x256x128xbf16, #tpu.memory_space<vmem>>, vector<1x256x128xbf16>
    %16 = vector.shape_cast %15 : vector<1x256x128xbf16> to vector<256x128xbf16>
    %17 = vector.shape_cast %14 : vector<256x128xbf16> to vector<1x256x128xbf16>
    tpu.vector_store %arg6[%c0_9, %c0_10, %c0_11], %17 {strides = array<i32>} : memref<1x256x128xbf16, #tpu.memory_space<vmem>>, vector<1x256x128xbf16>,
    return
  }
  func.func @transform_0(%arg0: i32, %arg1: i32) -> (i32, i32, i32) {
    %c0_i32 = arith.constant 0 : i32
    %c0_i32_0 = arith.constant 0 : i32
    return %arg0, %arg1, %c0_i32 : i32, i32, i32
  }
  func.func @transform_1(%arg0: i32, %arg1: i32) -> (i32, i32) {
    %c0_i32 = arith.constant 0 : i32
    %c0_i32_0 = arith.constant 0 : i32
    %c0_i32_1 = arith.constant 0 : i32
    return %c0_i32, %c0_i32_0 : i32, i32
  }
  func.func @transform_2(%arg0: i32, %arg1: i32) -> (i32, i32) {
    %c0_i32 = arith.constant 0 : i32
    %c0_i32_0 = arith.constant 0 : i32
    %c0_i32_1 = arith.constant 0 : i32
    return %c0_i32, %c0_i32_0 : i32, i32
  }
  func.func @transform_3(%arg0: i32, %arg1: i32) -> (i32, i32, i32) {
    %c0_i32 = arith.constant 0 : i32
    %c0_i32_0 = arith.constant 0 : i32
    return %arg0, %arg1, %c0_i32 : i32, i32, i32
  }
  func.func @transform_4(%arg0: i32, %arg1: i32) -> (i32, i32, i32) {
    %c0_i32 = arith.constant 0 : i32
    %c0_i32_0 = arith.constant 0 : i32
    return %arg0, %arg1, %c0_i32 : i32, i32, i32
  }
}

module attributes {stable_mosaic.version = 11 : i64} {
  func.func @_flash_self_attention_kernel(%arg0: i32, %arg1: i32, %arg2: i32, %arg3: memref<1x256x128xf32, #tpu.memory_space<vmem>>, %arg4: memref<1x256x128xbf16, #tpu.memory_space<vmem>>, %arg5: memref<1x256x128xbf16, #tpu.memory_space<vmem>>, %arg6: memref<128x128xbf16, #tpu.memory_space<vmem>>, %arg7: memref<1x128xf32, #tpu.memory_space<vmem>>, %arg8: memref<128x128xbf16, #tpu.memory_space<vmem>>, %arg9: memref<1x128xf32, #tpu.memory_space<vmem>>, %arg10: memref<1x256x128xf32, #tpu.memory_space<vmem>>, %arg11: memref<256x128xbf16, #tpu.memory_space<vmem>>, %arg12: memref<256x1xf32, #tpu.memory_space<vmem>>, %arg13: memref<256x1xf32, #tpu.memory_space<vmem>>, %arg14: memref<256x128xf32, #tpu.memory_space<vmem>>) attributes {dimension_semantics = [#tpu.dimension_semantics<parallel>, #tpu.dimension_semantics<parallel>, #tpu.dimension_semantics<arbitrary>], iteration_bounds = array<i64: 2, 1, 1>, scalar_prefetch = 0 : i64, scratch_operands = 4 : i64, tpu.core_type = #tpu.core_type<tc>, window_params = [{transform_indices = @transform_0, window_bounds = array<i64: 1, 256, 128>}, {transform_indices = @transform_1, window_bounds = array<i64: 1, 256, 128>}, {transform_indices = @transform_2, window_bounds = array<i64: 1, 256, 128>}, {pipeline_mode = #tpu.pipeline_mode<synchronous>, transform_indices = @transform_3, window_bounds = array<i64: 128, 128>}, {pipeline_mode = #tpu.pipeline_mode<synchronous>, transform_indices = @transform_4, window_bounds = array<i64: 1, 128>}, {pipeline_mode = #tpu.pipeline_mode<synchronous>, transform_indices = @transform_5, window_bounds = array<i64: 128, 128>}, {pipeline_mode = #tpu.pipeline_mode<synchronous>, transform_indices = @transform_6, window_bounds = array<i64: 1, 128>}, {transform_indices = @transform_7, window_bounds = array<i64: 1, 256, 128>}]} {
    %c0_i32 = arith.constant 0 : i32
    %0 = arith.cmpi eq, %arg2, %c0_i32 : i32
    %1 = arith.extui %0 : i1 to i32
    %c0_i32_0 = arith.constant 0 : i32
    %2 = arith.cmpi ne, %1, %c0_i32_0 : i32
    scf.if %2 {
      %c0_25 = arith.constant 0 : index
      %c0_26 = arith.constant 0 : index
      %c0_27 = arith.constant 0 : index
      %35 = vector.load %arg3[%c0_25, %c0_26, %c0_27] : memref<1x256x128xf32, #tpu.memory_space<vmem>>, vector<1x256x128xf32>
      %36 = vector.shape_cast %35 : vector<1x256x128xf32> to vector<256x128xf32>
      %37 = arith.truncf %36 : vector<256x128xf32> to vector<256x128xbf16>
      %c0_28 = arith.constant 0 : index
      %c0_29 = arith.constant 0 : index
      %38 = vector.load %arg6[%c0_28, %c0_29] : memref<128x128xbf16, #tpu.memory_space<vmem>>, vector<128x128xbf16>
      %cst_30 = arith.constant dense<0.000000e+00> : vector<256x128xf32>
      %39 = tpu.matmul %37, %38, %cst_30 {dimension_numbers = #tpu.dot_dimension_numbers<[1], [0], [0], [1], [0, 0, 1, 1], [], []>} : vector<256x128xbf16>, vector<128x128xbf16>, vector<256x128xf32> -> vector<256x128xf32>
      %c0_31 = arith.constant 0 : index
      %c0_32 = arith.constant 0 : index
      %40 = vector.load %arg7[%c0_31, %c0_32] : memref<1x128xf32, #tpu.memory_space<vmem>>, vector<1x128xf32>
      %41 = vector.broadcast %40 : vector<1x128xf32> to vector<256x128xf32>
      %42 = arith.addf %39, %41 : vector<256x128xf32>
      %43 = arith.truncf %42 : vector<256x128xf32> to vector<256x128xbf16>
      %c0_33 = arith.constant 0 : index
      %c0_34 = arith.constant 0 : index
      %44 = vector.load %arg11[%c0_33, %c0_34] : memref<256x128xbf16, #tpu.memory_space<vmem>>, vector<256x128xbf16>
      tpu.vector_store %arg11[%c0_33, %c0_34], %43 {strides = array<i32>} : memref<256x128xbf16, #tpu.memory_space<vmem>>, vector<256x128xbf16>,
      %cst_35 = arith.constant 0xFF800000 : f32
      %45 = vector.broadcast %cst_35 : f32 to vector<256x1xf32>
      %c0_36 = arith.constant 0 : index
      %c0_37 = arith.constant 0 : index
      %46 = vector.load %arg12[%c0_36, %c0_37] : memref<256x1xf32, #tpu.memory_space<vmem>>, vector<256x1xf32>
      tpu.vector_store %arg12[%c0_36, %c0_37], %45 {strides = array<i32>} : memref<256x1xf32, #tpu.memory_space<vmem>>, vector<256x1xf32>,
      %cst_38 = arith.constant 0.000000e+00 : f32
      %47 = vector.broadcast %cst_38 : f32 to vector<256x1xf32>
      %c0_39 = arith.constant 0 : index
      %c0_40 = arith.constant 0 : index
      %48 = vector.load %arg13[%c0_39, %c0_40] : memref<256x1xf32, #tpu.memory_space<vmem>>, vector<256x1xf32>
      tpu.vector_store %arg13[%c0_39, %c0_40], %47 {strides = array<i32>} : memref<256x1xf32, #tpu.memory_space<vmem>>, vector<256x1xf32>,
      %cst_41 = arith.constant 0.000000e+00 : f32
      %49 = vector.broadcast %cst_41 : f32 to vector<256x128xf32>
      %c0_42 = arith.constant 0 : index
      %c0_43 = arith.constant 0 : index
      %50 = vector.load %arg14[%c0_42, %c0_43] : memref<256x128xf32, #tpu.memory_space<vmem>>, vector<256x128xf32>
      tpu.vector_store %arg14[%c0_42, %c0_43], %49 {strides = array<i32>} : memref<256x128xf32, #tpu.memory_space<vmem>>, vector<256x128xf32>,
    } else {
    }
    %c0 = arith.constant 0 : index
    %c0_1 = arith.constant 0 : index
    %c0_2 = arith.constant 0 : index
    %3 = vector.load %arg4[%c0, %c0_1, %c0_2] : memref<1x256x128xbf16, #tpu.memory_space<vmem>>, vector<1x256x128xbf16>
    %4 = vector.shape_cast %3 : vector<1x256x128xbf16> to vector<256x128xbf16>
    %c0_3 = arith.constant 0 : index
    %c0_4 = arith.constant 0 : index
    %c0_5 = arith.constant 0 : index
    %5 = vector.load %arg5[%c0_3, %c0_4, %c0_5] : memref<1x256x128xbf16, #tpu.memory_space<vmem>>, vector<1x256x128xbf16>
    %6 = vector.shape_cast %5 : vector<1x256x128xbf16> to vector<256x128xbf16>
    %c0_6 = arith.constant 0 : index
    %c0_7 = arith.constant 0 : index
    %7 = vector.load %arg11[%c0_6, %c0_7] : memref<256x128xbf16, #tpu.memory_space<vmem>>, vector<256x128xbf16>
    %cst = arith.constant dense<0.000000e+00> : vector<256x256xf32>
    %8 = tpu.matmul %7, %4, %cst {dimension_numbers = #tpu.dot_dimension_numbers<[1], [1], [0], [0], [0, 0, 1, 0], [], []>} : vector<256x128xbf16>, vector<256x128xbf16>, vector<256x256xf32> -> vector<256x256xf32>
    %c0_8 = arith.constant 0 : index
    %c0_9 = arith.constant 0 : index
    %9 = vector.load %arg12[%c0_8, %c0_9] : memref<256x1xf32, #tpu.memory_space<vmem>>, vector<256x1xf32>
    %cst_10 = arith.constant dense<0xFF800000> : vector<256xf32>
    %10 = vector.multi_reduction <maximumf>, %8, %cst_10 [1] : vector<256x256xf32> to vector<256xf32>
    %11 = vector.shape_cast %10 : vector<256xf32> to vector<256x1xf32>
    %12 = arith.maximumf %9, %11 : vector<256x1xf32>
    %13 = arith.subf %9, %12 : vector<256x1xf32>
    %14 = math.exp %13 : vector<256x1xf32>
    %15 = vector.broadcast %12 : vector<256x1xf32> to vector<256x256xf32>
    %16 = arith.subf %8, %15 : vector<256x256xf32>
    %17 = math.exp %16 : vector<256x256xf32>
    %c0_11 = arith.constant 0 : index
    %c0_12 = arith.constant 0 : index
    %18 = vector.load %arg13[%c0_11, %c0_12] : memref<256x1xf32, #tpu.memory_space<vmem>>, vector<256x1xf32>
    %19 = arith.mulf %14, %18 : vector<256x1xf32>
    %cst_13 = arith.constant dense<0.000000e+00> : vector<256xf32>
    %20 = vector.multi_reduction <add>, %17, %cst_13 [1] : vector<256x256xf32> to vector<256xf32>
    %21 = vector.shape_cast %20 : vector<256xf32> to vector<256x1xf32>
    %22 = arith.addf %19, %21 : vector<256x1xf32>
    %c0_14 = arith.constant 0 : index
    %c0_15 = arith.constant 0 : index
    %23 = vector.load %arg13[%c0_14, %c0_15] : memref<256x1xf32, #tpu.memory_space<vmem>>, vector<256x1xf32>
    tpu.vector_store %arg13[%c0_14, %c0_15], %22 {strides = array<i32>} : memref<256x1xf32, #tpu.memory_space<vmem>>, vector<256x1xf32>,
    %c0_16 = arith.constant 0 : index
    %c0_17 = arith.constant 0 : index
    %24 = vector.load %arg14[%c0_16, %c0_17] : memref<256x128xf32, #tpu.memory_space<vmem>>, vector<256x128xf32>
    %25 = vector.broadcast %14 : vector<256x1xf32> to vector<256x128xf32>
    %26 = arith.mulf %25, %24 : vector<256x128xf32>
    %27 = arith.truncf %17 : vector<256x256xf32> to vector<256x256xbf16>
    %cst_18 = arith.constant dense<0.000000e+00> : vector<256x128xf32>
    %28 = tpu.matmul %27, %6, %cst_18 {dimension_numbers = #tpu.dot_dimension_numbers<[1], [0], [0], [1], [0, 0, 1, 1], [], []>} : vector<256x256xbf16>, vector<256x128xbf16>, vector<256x128xf32> -> vector<256x128xf32>
    %29 = arith.addf %26, %28 : vector<256x128xf32>
    %c0_19 = arith.constant 0 : index
    %c0_20 = arith.constant 0 : index
    %30 = vector.load %arg14[%c0_19, %c0_20] : memref<256x128xf32, #tpu.memory_space<vmem>>, vector<256x128xf32>
    tpu.vector_store %arg14[%c0_19, %c0_20], %29 {strides = array<i32>} : memref<256x128xf32, #tpu.memory_space<vmem>>, vector<256x128xf32>,
    %c0_21 = arith.constant 0 : index
    %c0_22 = arith.constant 0 : index
    %31 = vector.load %arg12[%c0_21, %c0_22] : memref<256x1xf32, #tpu.memory_space<vmem>>, vector<256x1xf32>
    tpu.vector_store %arg12[%c0_21, %c0_22], %12 {strides = array<i32>} : memref<256x1xf32, #tpu.memory_space<vmem>>, vector<256x1xf32>,
    %c0_i32_23 = arith.constant 0 : i32
    %32 = arith.cmpi eq, %arg2, %c0_i32_23 : i32
    %33 = arith.extui %32 : i1 to i32
    %c0_i32_24 = arith.constant 0 : i32
    %34 = arith.cmpi ne, %33, %c0_i32_24 : i32
    scf.if %34 {
      %c0_25 = arith.constant 0 : index
      %c0_26 = arith.constant 0 : index
      %35 = vector.load %arg14[%c0_25, %c0_26] : memref<256x128xf32, #tpu.memory_space<vmem>>, vector<256x128xf32>
      %c0_27 = arith.constant 0 : index
      %c0_28 = arith.constant 0 : index
      %36 = vector.load %arg13[%c0_27, %c0_28] : memref<256x1xf32, #tpu.memory_space<vmem>>, vector<256x1xf32>
      %37 = tpu.reciprocal %36 {approx = true} : vector<256x1xf32> -> vector<256x1xf32>
      %38 = vector.broadcast %37 : vector<256x1xf32> to vector<256x128xf32>
      %39 = arith.mulf %35, %38 : vector<256x128xf32>
      %40 = arith.truncf %39 : vector<256x128xf32> to vector<256x128xbf16>
      %c0_29 = arith.constant 0 : index
      %c0_30 = arith.constant 0 : index
      %41 = vector.load %arg8[%c0_29, %c0_30] : memref<128x128xbf16, #tpu.memory_space<vmem>>, vector<128x128xbf16>
      %cst_31 = arith.constant dense<0.000000e+00> : vector<256x128xf32>
      %42 = tpu.matmul %40, %41, %cst_31 {dimension_numbers = #tpu.dot_dimension_numbers<[1], [0], [0], [1], [0, 0, 1, 1], [], []>} : vector<256x128xbf16>, vector<128x128xbf16>, vector<256x128xf32> -> vector<256x128xf32>
      %c0_32 = arith.constant 0 : index
      %c0_33 = arith.constant 0 : index
      %43 = vector.load %arg9[%c0_32, %c0_33] : memref<1x128xf32, #tpu.memory_space<vmem>>, vector<1x128xf32>
      %44 = vector.broadcast %43 : vector<1x128xf32> to vector<256x128xf32>
      %45 = arith.addf %42, %44 : vector<256x128xf32>
      %c0_34 = arith.constant 0 : index
      %c0_35 = arith.constant 0 : index
      %c0_36 = arith.constant 0 : index
      %46 = vector.load %arg3[%c0_34, %c0_35, %c0_36] : memref<1x256x128xf32, #tpu.memory_space<vmem>>, vector<1x256x128xf32>
      %47 = vector.shape_cast %46 : vector<1x256x128xf32> to vector<256x128xf32>
      %48 = arith.addf %45, %47 : vector<256x128xf32>
      %c0_37 = arith.constant 0 : index
      %c0_38 = arith.constant 0 : index
      %c0_39 = arith.constant 0 : index
      %49 = vector.load %arg10[%c0_37, %c0_38, %c0_39] : memref<1x256x128xf32, #tpu.memory_space<vmem>>, vector<1x256x128xf32>
      %50 = vector.shape_cast %49 : vector<1x256x128xf32> to vector<256x128xf32>
      %51 = vector.shape_cast %48 : vector<256x128xf32> to vector<1x256x128xf32>
      tpu.vector_store %arg10[%c0_37, %c0_38, %c0_39], %51 {strides = array<i32>} : memref<1x256x128xf32, #tpu.memory_space<vmem>>, vector<1x256x128xf32>,
    } else {
    }
    return
  }
  func.func @transform_0(%arg0: i32, %arg1: i32, %arg2: i32) -> (i32, i32, i32) {
    %c0_i32 = arith.constant 0 : i32
    %c0_i32_0 = arith.constant 0 : i32
    return %arg0, %arg1, %c0_i32 : i32, i32, i32
  }
  func.func @transform_1(%arg0: i32, %arg1: i32, %arg2: i32) -> (i32, i32, i32) {
    %c0_i32 = arith.constant 0 : i32
    %c0_i32_0 = arith.constant 0 : i32
    return %arg0, %arg2, %c0_i32 : i32, i32, i32
  }
  func.func @transform_2(%arg0: i32, %arg1: i32, %arg2: i32) -> (i32, i32, i32) {
    %c0_i32 = arith.constant 0 : i32
    %c0_i32_0 = arith.constant 0 : i32
    return %arg0, %arg2, %c0_i32 : i32, i32, i32
  }
  func.func @transform_3(%arg0: i32, %arg1: i32, %arg2: i32) -> (i32, i32) {
    %c0_i32 = arith.constant 0 : i32
    %c0_i32_0 = arith.constant 0 : i32
    %c0_i32_1 = arith.constant 0 : i32
    return %c0_i32, %c0_i32_0 : i32, i32
  }
  func.func @transform_4(%arg0: i32, %arg1: i32, %arg2: i32) -> (i32, i32) {
    %c0_i32 = arith.constant 0 : i32
    %c0_i32_0 = arith.constant 0 : i32
    %c0_i32_1 = arith.constant 0 : i32
    return %c0_i32, %c0_i32_0 : i32, i32
  }
  func.func @transform_5(%arg0: i32, %arg1: i32, %arg2: i32) -> (i32, i32) {
    %c0_i32 = arith.constant 0 : i32
    %c0_i32_0 = arith.constant 0 : i32
    %c0_i32_1 = arith.constant 0 : i32
    return %c0_i32, %c0_i32_0 : i32, i32
  }
  func.func @transform_6(%arg0: i32, %arg1: i32, %arg2: i32) -> (i32, i32) {
    %c0_i32 = arith.constant 0 : i32
    %c0_i32_0 = arith.constant 0 : i32
    %c0_i32_1 = arith.constant 0 : i32
    return %c0_i32, %c0_i32_0 : i32, i32
  }
  func.func @transform_7(%arg0: i32, %arg1: i32, %arg2: i32) -> (i32, i32, i32) {
    %c0_i32 = arith.constant 0 : i32
    %c0_i32_0 = arith.constant 0 : i32
    return %arg0, %arg1, %c0_i32 : i32, i32, i32
  }
}

</mosaic_0001>

<bundles_post_ra>
// kernel: self_attention_forward.2
= control target key start
LH: loop header
LB: loop body
LE: loop exit
PB: predicated region body
PF: predicated region fallthrough
CT: control target
= control target key end

     0   :  { %s1533_s15 = smov 0   ;;  %s1535_s16 = smov 0   ;;  %s1782_s0 = inlined_call_operand.vmem [shape: f32[2,256,128], index: 0, kind: input, shape index: {}]   ;;  %s1783_s1 = inlined_call_operand.vmem [shape: bf16[128,256], index: 1, kind: input, shape index: {}]   ;;  %s1784_s2 = inlined_call_operand.vmem [shape: f32[1,256], index: 2, kind: input, shape index: {}]   ;;  %s1785_s3 = inlined_call_operand.vmem [shape: bf16[2,256,128], index: 3, kind: output, shape index: {0}]   ;;  %s1786_s4 = inlined_call_operand.vmem [shape: bf16[2,256,128], index: 4, kind: output, shape index: {1}]  }
   0x1   :  { %s1537_s17 = smov 0  }
   0x2 LB: > { %s27_s18 = sadd.s32 1, %s1501_s16  ;;  %p1072_p0 = scmp.ge.s32.totalorder %s1505_s17, 1  ;;  %s1505_s17 = sphi %s1537_s17, %s15_s17   ;;  %s1501_s16 = sphi %s1535_s16, %s1788_s16   ;;  %s1497_s15 = sphi %s1533_s15, %s1787_s15  }
   0x3   : > { %p29_p1 = scmp.ge.s32.totalorder %s27_s18, 2  ;;  %p188_p2 = scmp.lt.s32.totalorder %s1505_s17, 3 }
   0x5   : > { %s1790_s18 = smov (%p29_p1, %s27_s18), 0  ;;  %p189_p3 = pnand %p1072_p0, %p188_p2 }
   0x6   : > { %v1459_v0 = vld [vmem:[%s1783_s1 + $0x4] ss:$8 sps:$4 sm:$0xff] (!%p189_p3)   ;;  %v1461_v1 = vld [vmem:[%s1783_s1] ss:$8 sps:$4 sm:$0xff] (!%p189_p3)   ;;  %v1507_v2 = vmov (!%p189_p3), 0   ;;  %p232_p4 = scmp.lt.s32.totalorder (!%p189_p3), %s1497_s15, 1 }
   0x7   : > { %192 = sbr.rel (%p189_p3) target bundleno = 316 (0x13c), region = 32  ;;  %450 = vmatprep.mubr.bf16.mxu0 (!%p189_p3), %v1507_v2  ;;  %530 = vmatprep.mubr.bf16.mxu1 (!%p189_p3), %v1507_v2  ;;  %v1462_v3 = vld [vmem:[%s1783_s1 + $0x14] ss:$8 sps:$4 sm:$0xff] (!%p189_p3)   ;;  %v1464_v4 = vld [vmem:[%s1783_s1 + $0x10] ss:$8 sps:$4 sm:$0xff] (!%p189_p3)  }
   0x8   : > { %418 = vmatprep.subr.bf16.mxu0 (!%p189_p3), %v1459_v0  ;;  %1418 = vmatprep.subr.bf16.mxu1 (!%p189_p3), %v1459_v0  ;;  %v1465_v5 = vld [vmem:[%s1783_s1 + $0x24] ss:$8 sps:$4 sm:$0xff] (!%p189_p3)   ;;  %v1467_v6 = vld [vmem:[%s1783_s1 + $0x20] ss:$8 sps:$4 sm:$0xff] (!%p189_p3)   ;;  %v1468_v7 = vld [vmem:[%s1783_s1 + $0x34] ss:$8 sps:$4 sm:$0xff] (!%p189_p3)  }
   0x9   : > { %419 = vmatpush1.bf16.msra.mxu0 (!%p189_p3), %v1461_v1  ;;  %1426 = vmatpush1.bf16.msra.mxu1 (!%p189_p3), %v1461_v1  ;;  %v1470_v8 = vld [vmem:[%s1783_s1 + $0x30] ss:$8 sps:$4 sm:$0xff] (!%p189_p3)   ;;  %v1471_v9 = vld [vmem:[%s1783_s1 + $0x44] ss:$8 sps:$4 sm:$0xff] (!%p189_p3)   ;;  %v1473_v10 = vld [vmem:[%s1783_s1 + $0x40] ss:$8 sps:$4 sm:$0xff] (!%p189_p3)   ;;  %v328_v1 = vlaneseq (!%p189_p3) }
   0xa   : > { %420 = vmatprep.subr.bf16.mxu0 (!%p189_p3), %v1462_v3  ;;  %1419 = vmatprep.subr.bf16.mxu1 (!%p189_p3), %v1462_v3  ;;  %v1474_v11 = vld [vmem:[%s1783_s1 + $0x54] ss:$8 sps:$4 sm:$0xff] (!%p189_p3)   ;;  %v1476_v12 = vld [vmem:[%s1783_s1 + $0x50] ss:$8 sps:$4 sm:$0xff] (!%p189_p3)   ;;  %v1477_v13 = vld [vmem:[%s1783_s1 + $0x64] ss:$8 sps:$4 sm:$0xff] (!%p189_p3)  }
   0xb   : > { %v1479_v14 = vld [vmem:[%s1783_s1 + $0x60] ss:$8 sps:$4 sm:$0xff] (!%p189_p3)   ;;  %v1480_v15 = vld [vmem:[%s1783_s1 + $0x74] ss:$8 sps:$4 sm:$0xff] (!%p189_p3)   ;;  %v1482_v16 = vld [vmem:[%s1783_s1 + $0x70] ss:$8 sps:$4 sm:$0xff] (!%p189_p3)  }
   0xc   : > { %v329_v3 = vshrl.u32 (!%p189_p3), %v328_v1, 7 }
   0xd   : > { %421 = vmatpush1.bf16.msra.mxu0 (!%p189_p3), %v1464_v4  ;;  %1427 = vmatpush1.bf16.msra.mxu1 (!%p189_p3), %v1464_v4 }
   0xe   : > { %422 = vmatprep.subr.bf16.mxu0 %v1465_v5  ;;  %1420 = vmatprep.subr.bf16.mxu1 %v1465_v5  ;;  %s1792_s15 = smov (!%p232_p4, %s1497_s15), 1  ;;  %v330_v4 = vsub.s32 0, %v329_v3  ;;  %v326_v5 = vld [vmem:[%s1784_s2] sm:$0x3] }
   0xf   : > { %s1161_s23 = sshll.u32 %s1792_s15, 8  ;;  %s1162_s9 = sshll.u32 %s1792_s15, 7 }
  0x10   : > { %s1605_s28 = scalar_lea.vmem %s1782_s0, %s1161_s23  ;;  %s1676_s15 = scalar_lea.vmem %s1785_s3, %s1162_s9 }
  0x11   : > { %423 = vmatpush1.bf16.msra.mxu0 %v1467_v6  ;;  %1428 = vmatpush1.bf16.msra.mxu1 %v1467_v6  ;;  %v262_v17 = vld [vmem:[%s1605_s28] sm:$0xff]  ;;  %v263_v18 = vld [vmem:[%s1605_s28 + $0x8] sm:$0xff]  ;;  %v264_v23 = vld [vmem:[%s1605_s28 + $0x10] sm:$0xff]  ;;  %v334_v6 = vsub.s32 1, %v329_v3  ;;  %s1683_s14 = scalar_lea.vmem %s1786_s4, %s1162_s9 }
  0x12   : > { %424 = vmatprep.subr.bf16.mxu0 %v1468_v7  ;;  %1421 = vmatprep.subr.bf16.mxu1 %v1468_v7  ;;  %v278_v19 = vld [vmem:[%s1605_s28 + $0x80] sm:$0xff]  ;;  %v279_v20 = vld [vmem:[%s1605_s28 + $0x88] sm:$0xff]  ;;  %v294_v21 = vpack.c.bf16 %v263_v18, %v262_v17  ;;  %v265_v24 = vld [vmem:[%s1605_s28 + $0x18] sm:$0xff]  ;;  %v1662_v7 = vrot.slane %v326_v5, %v330_v4 }
  0x13   : > { %v302_v22 = vpack.c.bf16 %v279_v20, %v278_v19  ;;  %v280_v25 = vld [vmem:[%s1605_s28 + $0x90] sm:$0xff]  ;;  %v281_v26 = vld [vmem:[%s1605_s28 + $0x98] sm:$0xff]  ;;  %v295_v27 = vpack.c.bf16 %v265_v24, %v264_v23  ;;  %v266_v29 = vld [vmem:[%s1605_s28 + $0x20] sm:$0xff] }
  0x14   : > { %v303_v28 = vpack.c.bf16 %v281_v26, %v280_v25  ;;  %v267_v30 = vld [vmem:[%s1605_s28 + $0x28] sm:$0xff]  ;;  %v282_v31 = vld [vmem:[%s1605_s28 + $0xa0] sm:$0xff]  ;;  %v268_v35 = vld [vmem:[%s1605_s28 + $0x30] sm:$0xff] }
  0x15   : > { %425 = vmatpush1.bf16.msra.mxu0 %v1470_v8  ;;  %1429 = vmatpush1.bf16.msra.mxu1 %v1470_v8  ;;  %v283_v32 = vld [vmem:[%s1605_s28 + $0xa8] sm:$0xff]  ;;  %v296_v33 = vpack.c.bf16 %v267_v30, %v266_v29  ;;  %v269_v36 = vld [vmem:[%s1605_s28 + $0x38] sm:$0xff]  ;;  %v284_v37 = vld [vmem:[%s1605_s28 + $0xb0] sm:$0xff] }
  0x16   : > { %426 = vmatprep.subr.bf16.mxu0 %v1471_v9  ;;  %1422 = vmatprep.subr.bf16.mxu1 %v1471_v9  ;;  %v304_v34 = vpack.c.bf16 %v283_v32, %v282_v31  ;;  %v285_v38 = vld [vmem:[%s1605_s28 + $0xb8] sm:$0xff]  ;;  %v297_v39 = vpack.c.bf16 %v269_v36, %v268_v35  ;;  %v270_v41 = vld [vmem:[%s1605_s28 + $0x40] sm:$0xff]  ;;  %v271_v42 = vld [vmem:[%s1605_s28 + $0x48] sm:$0xff]  ;;  %v1664_v9 = vrot.slane %v326_v5, %v334_v6 }
  0x17   : > { %v305_v40 = vpack.c.bf16 %v285_v38, %v284_v37  ;;  %v286_v43 = vld [vmem:[%s1605_s28 + $0xc0] sm:$0xff]  ;;  %v287_v44 = vld [vmem:[%s1605_s28 + $0xc8] sm:$0xff]  ;;  %v298_v45 = vpack.c.bf16 %v271_v42, %v270_v41  ;;  %v272_v47 = vld [vmem:[%s1605_s28 + $0x50] sm:$0xff] }
  0x18   : > { %v306_v46 = vpack.c.bf16 %v287_v44, %v286_v43  ;;  %v273_v48 = vld [vmem:[%s1605_s28 + $0x58] sm:$0xff]  ;;  %v288_v49 = vld [vmem:[%s1605_s28 + $0xd0] sm:$0xff]  ;;  %v274_v53 = vld [vmem:[%s1605_s28 + $0x60] sm:$0xff] }
  0x19   : > { %427 = vmatpush1.bf16.msra.mxu0 %v1473_v10  ;;  %1430 = vmatpush1.bf16.msra.mxu1 %v1473_v10  ;;  %v289_v50 = vld [vmem:[%s1605_s28 + $0xd8] sm:$0xff]  ;;  %v299_v51 = vpack.c.bf16 %v273_v48, %v272_v47  ;;  %v275_v54 = vld [vmem:[%s1605_s28 + $0x68] sm:$0xff]  ;;  %v290_v55 = vld [vmem:[%s1605_s28 + $0xe0] sm:$0xff] }
  0x1a   : > { %428 = vmatprep.subr.bf16.mxu0 %v1474_v11  ;;  %1423 = vmatprep.subr.bf16.mxu1 %v1474_v11  ;;  %v307_v52 = vpack.c.bf16 %v289_v50, %v288_v49  ;;  %v291_v56 = vld [vmem:[%s1605_s28 + $0xe8] sm:$0xff]  ;;  %v300_v57 = vpack.c.bf16 %v275_v54, %v274_v53  ;;  %v276_v59 = vld [vmem:[%s1605_s28 + $0x70] sm:$0xff]  ;;  %v277_v60 = vld [vmem:[%s1605_s28 + $0x78] sm:$0xff] }
  0x1b   : > { %v308_v58 = vpack.c.bf16 %v291_v56, %v290_v55  ;;  %v292_v61 = vld [vmem:[%s1605_s28 + $0xf0] sm:$0xff]  ;;  %v293_v62 = vld [vmem:[%s1605_s28 + $0xf8] sm:$0xff]  ;;  %v301_v63 = vpack.c.bf16 %v277_v60, %v276_v59 }
  0x1c   : > { %v309_v0 = vpack.c.bf16 %v293_v62, %v292_v61 }
  0x1d   : > { %429 = vmatpush1.bf16.msra.mxu0 %v1476_v12  ;;  %1431 = vmatpush1.bf16.msra.mxu1 %v1476_v12 }
  0x1e   : > { %430 = vmatprep.subr.bf16.mxu0 %v1477_v13  ;;  %1424 = vmatprep.subr.bf16.mxu1 %v1477_v13 }
  0x21   : > { %431 = vmatpush1.bf16.msra.mxu0 %v1479_v14  ;;  %1432 = vmatpush1.bf16.msra.mxu1 %v1479_v14 }
  0x22   : > { %432 = vmatprep.subr.bf16.mxu0 %v1480_v15  ;;  %1425 = vmatprep.subr.bf16.mxu1 %v1480_v15 }
  0x25   : > { %433 = vmatpush1.bf16.msra.mxu0 %v1482_v16  ;;  %1433 = vmatpush1.bf16.msra.mxu1 %v1482_v16 }
  0x28   : > { %451 = vmatmul.mubr.bf16.vlgmr.msra.gmra.mrb[0].mxu0 %v294_v21  ;;  %531 = vmatmul.mubr.bf16.vlgmr.msra.gmra.mrb[0].mxu1 %v302_v22 }
  0x29   : > { %460 = vmatprep.mubr.bf16.mxu0 %v1507_v2  ;;  %540 = vmatprep.mubr.bf16.mxu1 %v1507_v2 }
  0x30   : > { %461 = vmatmul.mubr.bf16.gmra.mrb[4].mxu0 %v295_v27  ;;  %541 = vmatmul.mubr.bf16.gmra.mrb[4].mxu1 %v303_v28 }
  0x31   : > { %470 = vmatprep.mubr.bf16.mxu0 %v1507_v2  ;;  %550 = vmatprep.mubr.bf16.mxu1 %v1507_v2 }
  0x38   : > { %471 = vmatmul.mubr.bf16.gmra.mrb[8].mxu0 %v296_v33  ;;  %551 = vmatmul.mubr.bf16.gmra.mrb[8].mxu1 %v304_v34 }
  0x39   : > { %480 = vmatprep.mubr.bf16.mxu0 %v1507_v2  ;;  %560 = vmatprep.mubr.bf16.mxu1 %v1507_v2 }
  0x40   : > { %481 = vmatmul.mubr.bf16.gmra.mrb[12].mxu0 %v297_v39  ;;  %561 = vmatmul.mubr.bf16.gmra.mrb[12].mxu1 %v305_v40 }
  0x41   : > { %490 = vmatprep.mubr.bf16.mxu0 %v1507_v2  ;;  %570 = vmatprep.mubr.bf16.mxu1 %v1507_v2 }
  0x48   : > { %491 = vmatmul.mubr.bf16.gmra.mrb[16].mxu0 %v298_v45  ;;  %571 = vmatmul.mubr.bf16.gmra.mrb[16].mxu1 %v306_v46 }
  0x49   : > { %500 = vmatprep.mubr.bf16.mxu0 %v1507_v2  ;;  %580 = vmatprep.mubr.bf16.mxu1 %v1507_v2 }
  0x50   : > { %501 = vmatmul.mubr.bf16.gmra.mrb[20].mxu0 %v299_v51  ;;  %581 = vmatmul.mubr.bf16.gmra.mrb[20].mxu1 %v307_v52 }
  0x51   : > { %510 = vmatprep.mubr.bf16.mxu0 %v1507_v2  ;;  %590 = vmatprep.mubr.bf16.mxu1 %v1507_v2 }
  0x58   : > { %511 = vmatmul.mubr.bf16.gmra.mrb[24].mxu0 %v300_v57  ;;  %591 = vmatmul.mubr.bf16.gmra.mrb[24].mxu1 %v308_v58 }
  0x59   : > { %520 = vmatprep.mubr.bf16.mxu0 %v1507_v2  ;;  %600 = vmatprep.mubr.bf16.mxu1 %v1507_v2 }
  0x60   : > { %521 = vmatmul.mubr.bf16.gmra.mrb[28].mxu0 %v301_v63  ;;  %601 = vmatmul.mubr.bf16.gmra.mrb[28].mxu1 %v309_v0 }
  0xfb   : > { %v452_v8 = vpop.f32.mrb[0].mxu0  ;;  %v532_v2 = vpop.f32.mrb[0].mxu1 }
  0xfc   : > { %v454_v10 = vpop.f32.mrb[1].mxu0  ;;  %v534_v11 = vpop.f32.mrb[1].mxu1  ;;  %v453_v14 = vadd.f32 %v452_v8, %v1662_v7  ;;  %v533_v15 = vadd.f32 %v532_v2, %v1662_v7 }
  0xfd   : > { %v456_v12 = vpop.f32.mrb[2].mxu0  ;;  %v536_v13 = vpop.f32.mrb[2].mxu1  ;;  %v455_v20 = vadd.f32 %v454_v10, %v1664_v9  ;;  %v535_v21 = vadd.f32 %v534_v11, %v1664_v9 }
  0xfe   : > { %v457_v16 = vadd.f32 %v456_v12, %v1662_v7  ;;  %v537_v17 = vadd.f32 %v536_v13, %v1662_v7  ;;  %v458_v18 = vpop.f32.mrb[3].mxu0  ;;  %v538_v19 = vpop.f32.mrb[3].mxu1 }
  0xff   : > { %v459_v22 = vadd.f32 %v458_v18, %v1664_v9  ;;  %v539_v23 = vadd.f32 %v538_v19, %v1664_v9 }
 0x100   : > { %v1231_v24 = vpack.c.bf16 %v457_v16, %v453_v14  ;;  %v1271_v25 = vpack.c.bf16 %v537_v17, %v533_v15 }
 0x101   : > { %v1311_v26 = vpack.c.bf16 %v459_v22, %v455_v20  ;;  %v1351_v27 = vpack.c.bf16 %v539_v23, %v535_v21 }
 0x102   : > { %1232 = vst [vmem:[%s1676_s15] sm:$0xff] %v1231_v24   ;;  %1395 = vst [vmem:[%s1676_s15 + $0x40] sm:$0xff] %v1271_v25  }
 0x103   : > { %1312 = vst [vmem:[%s1683_s14] sm:$0xff] %v1311_v26   ;;  %1410 = vst [vmem:[%s1683_s14 + $0x40] sm:$0xff] %v1351_v27   ;;  %v462_v28 = vpop.f32.mrb[4].mxu0  ;;  %v542_v29 = vpop.f32.mrb[4].mxu1 }
 0x104   : > { %v464_v30 = vpop.f32.mrb[5].mxu0  ;;  %v544_v31 = vpop.f32.mrb[5].mxu1  ;;  %v463_v34 = vadd.f32 %v462_v28, %v1662_v7  ;;  %v543_v35 = vadd.f32 %v542_v29, %v1662_v7 }
 0x105   : > { %v466_v32 = vpop.f32.mrb[6].mxu0  ;;  %v546_v33 = vpop.f32.mrb[6].mxu1  ;;  %v465_v40 = vadd.f32 %v464_v30, %v1664_v9  ;;  %v545_v41 = vadd.f32 %v544_v31, %v1664_v9 }
 0x106   : > { %v467_v36 = vadd.f32 %v466_v32, %v1662_v7  ;;  %v547_v37 = vadd.f32 %v546_v33, %v1662_v7  ;;  %v468_v38 = vpop.f32.mrb[7].mxu0  ;;  %v548_v39 = vpop.f32.mrb[7].mxu1 }
 0x107   : > { %v469_v42 = vadd.f32 %v468_v38, %v1664_v9  ;;  %v549_v43 = vadd.f32 %v548_v39, %v1664_v9 }
 0x108   : > { %v1236_v44 = vpack.c.bf16 %v467_v36, %v463_v34  ;;  %v1276_v45 = vpack.c.bf16 %v547_v37, %v543_v35 }
 0x109   : > { %v1316_v46 = vpack.c.bf16 %v469_v42, %v465_v40  ;;  %v1356_v47 = vpack.c.bf16 %v549_v43, %v545_v41 }
 0x10a   : > { %1388 = vst [vmem:[%s1676_s15 + $0x8] sm:$0xff] %v1236_v44   ;;  %1396 = vst [vmem:[%s1676_s15 + $0x48] sm:$0xff] %v1276_v45  }
 0x10b   : > { %1403 = vst [vmem:[%s1683_s14 + $0x8] sm:$0xff] %v1316_v46   ;;  %1411 = vst [vmem:[%s1683_s14 + $0x48] sm:$0xff] %v1356_v47   ;;  %v472_v48 = vpop.f32.mrb[8].mxu0  ;;  %v552_v49 = vpop.f32.mrb[8].mxu1 }
 0x10c   : > { %v474_v50 = vpop.f32.mrb[9].mxu0  ;;  %v554_v51 = vpop.f32.mrb[9].mxu1  ;;  %v473_v54 = vadd.f32 %v472_v48, %v1662_v7  ;;  %v553_v55 = vadd.f32 %v552_v49, %v1662_v7 }
 0x10d   : > { %v476_v52 = vpop.f32.mrb[10].mxu0  ;;  %v556_v53 = vpop.f32.mrb[10].mxu1  ;;  %v475_v60 = vadd.f32 %v474_v50, %v1664_v9  ;;  %v555_v61 = vadd.f32 %v554_v51, %v1664_v9 }
 0x10e   : > { %v477_v56 = vadd.f32 %v476_v52, %v1662_v7  ;;  %v557_v57 = vadd.f32 %v556_v53, %v1662_v7  ;;  %v478_v58 = vpop.f32.mrb[11].mxu0  ;;  %v558_v59 = vpop.f32.mrb[11].mxu1 }
 0x10f   : > { %v479_v62 = vadd.f32 %v478_v58, %v1664_v9  ;;  %v559_v63 = vadd.f32 %v558_v59, %v1664_v9 }
 0x110   : > { %v1241_v0 = vpack.c.bf16 %v477_v56, %v473_v54  ;;  %v1281_v1 = vpack.c.bf16 %v557_v57, %v553_v55 }
 0x111   : > { %v1321_v3 = vpack.c.bf16 %v479_v62, %v475_v60  ;;  %v1361_v4 = vpack.c.bf16 %v559_v63, %v555_v61 }
 0x112   : > { %1389 = vst [vmem:[%s1676_s15 + $0x10] sm:$0xff] %v1241_v0   ;;  %1397 = vst [vmem:[%s1676_s15 + $0x50] sm:$0xff] %v1281_v1  }
 0x113   : > { %1404 = vst [vmem:[%s1683_s14 + $0x10] sm:$0xff] %v1321_v3   ;;  %1412 = vst [vmem:[%s1683_s14 + $0x50] sm:$0xff] %v1361_v4   ;;  %v482_v5 = vpop.f32.mrb[12].mxu0  ;;  %v562_v6 = vpop.f32.mrb[12].mxu1 }
 0x114   : > { %v484_v8 = vpop.f32.mrb[13].mxu0  ;;  %v564_v2 = vpop.f32.mrb[13].mxu1  ;;  %v483_v12 = vadd.f32 %v482_v5, %v1662_v7  ;;  %v563_v13 = vadd.f32 %v562_v6, %v1662_v7 }
 0x115   : > { %v486_v10 = vpop.f32.mrb[14].mxu0  ;;  %v566_v11 = vpop.f32.mrb[14].mxu1  ;;  %v485_v18 = vadd.f32 %v484_v8, %v1664_v9  ;;  %v565_v19 = vadd.f32 %v564_v2, %v1664_v9 }
 0x116   : > { %v487_v14 = vadd.f32 %v486_v10, %v1662_v7  ;;  %v567_v15 = vadd.f32 %v566_v11, %v1662_v7  ;;  %v488_v16 = vpop.f32.mrb[15].mxu0  ;;  %v568_v17 = vpop.f32.mrb[15].mxu1 }
 0x117   : > { %v489_v20 = vadd.f32 %v488_v16, %v1664_v9  ;;  %v569_v21 = vadd.f32 %v568_v17, %v1664_v9 }
 0x118   : > { %v1246_v22 = vpack.c.bf16 %v487_v14, %v483_v12  ;;  %v1286_v23 = vpack.c.bf16 %v567_v15, %v563_v13 }
 0x119   : > { %v1326_v24 = vpack.c.bf16 %v489_v20, %v485_v18  ;;  %v1366_v25 = vpack.c.bf16 %v569_v21, %v565_v19 }
 0x11a   : > { %1390 = vst [vmem:[%s1676_s15 + $0x18] sm:$0xff] %v1246_v22   ;;  %1398 = vst [vmem:[%s1676_s15 + $0x58] sm:$0xff] %v1286_v23  }
 0x11b   : > { %1405 = vst [vmem:[%s1683_s14 + $0x18] sm:$0xff] %v1326_v24   ;;  %1413 = vst [vmem:[%s1683_s14 + $0x58] sm:$0xff] %v1366_v25   ;;  %v492_v26 = vpop.f32.mrb[16].mxu0  ;;  %v572_v27 = vpop.f32.mrb[16].mxu1 }
 0x11c   : > { %v494_v28 = vpop.f32.mrb[17].mxu0  ;;  %v574_v29 = vpop.f32.mrb[17].mxu1  ;;  %v493_v32 = vadd.f32 %v492_v26, %v1662_v7  ;;  %v573_v33 = vadd.f32 %v572_v27, %v1662_v7 }
 0x11d   : > { %v496_v30 = vpop.f32.mrb[18].mxu0  ;;  %v576_v31 = vpop.f32.mrb[18].mxu1  ;;  %v495_v38 = vadd.f32 %v494_v28, %v1664_v9  ;;  %v575_v39 = vadd.f32 %v574_v29, %v1664_v9 }
 0x11e   : > { %v497_v34 = vadd.f32 %v496_v30, %v1662_v7  ;;  %v577_v35 = vadd.f32 %v576_v31, %v1662_v7  ;;  %v498_v36 = vpop.f32.mrb[19].mxu0  ;;  %v578_v37 = vpop.f32.mrb[19].mxu1 }
 0x11f   : > { %v499_v40 = vadd.f32 %v498_v36, %v1664_v9  ;;  %v579_v41 = vadd.f32 %v578_v37, %v1664_v9 }
 0x120   : > { %v1251_v42 = vpack.c.bf16 %v497_v34, %v493_v32  ;;  %v1291_v43 = vpack.c.bf16 %v577_v35, %v573_v33 }
 0x121   : > { %v1331_v44 = vpack.c.bf16 %v499_v40, %v495_v38  ;;  %v1371_v45 = vpack.c.bf16 %v579_v41, %v575_v39 }
 0x122   : > { %1391 = vst [vmem:[%s1676_s15 + $0x20] sm:$0xff] %v1251_v42   ;;  %1399 = vst [vmem:[%s1676_s15 + $0x60] sm:$0xff] %v1291_v43  }
 0x123   : > { %1406 = vst [vmem:[%s1683_s14 + $0x20] sm:$0xff] %v1331_v44   ;;  %1414 = vst [vmem:[%s1683_s14 + $0x60] sm:$0xff] %v1371_v45   ;;  %v502_v46 = vpop.f32.mrb[20].mxu0  ;;  %v582_v47 = vpop.f32.mrb[20].mxu1 }
 0x124   : > { %v504_v48 = vpop.f32.mrb[21].mxu0  ;;  %v584_v49 = vpop.f32.mrb[21].mxu1  ;;  %v503_v52 = vadd.f32 %v502_v46, %v1662_v7  ;;  %v583_v53 = vadd.f32 %v582_v47, %v1662_v7 }
 0x125   : > { %v506_v50 = vpop.f32.mrb[22].mxu0  ;;  %v586_v51 = vpop.f32.mrb[22].mxu1  ;;  %v505_v58 = vadd.f32 %v504_v48, %v1664_v9  ;;  %v585_v59 = vadd.f32 %v584_v49, %v1664_v9 }
 0x126   : > { %v507_v54 = vadd.f32 %v506_v50, %v1662_v7  ;;  %v587_v55 = vadd.f32 %v586_v51, %v1662_v7  ;;  %v508_v56 = vpop.f32.mrb[23].mxu0  ;;  %v588_v57 = vpop.f32.mrb[23].mxu1 }
 0x127   : > { %v509_v60 = vadd.f32 %v508_v56, %v1664_v9  ;;  %v589_v61 = vadd.f32 %v588_v57, %v1664_v9 }
 0x128   : > { %v1256_v62 = vpack.c.bf16 %v507_v54, %v503_v52  ;;  %v1296_v63 = vpack.c.bf16 %v587_v55, %v583_v53 }
 0x129   : > { %v1336_v0 = vpack.c.bf16 %v509_v60, %v505_v58  ;;  %v1376_v1 = vpack.c.bf16 %v589_v61, %v585_v59 }
 0x12a   : > { %1392 = vst [vmem:[%s1676_s15 + $0x28] sm:$0xff] %v1256_v62   ;;  %1400 = vst [vmem:[%s1676_s15 + $0x68] sm:$0xff] %v1296_v63  }
 0x12b   : > { %1407 = vst [vmem:[%s1683_s14 + $0x28] sm:$0xff] %v1336_v0   ;;  %1415 = vst [vmem:[%s1683_s14 + $0x68] sm:$0xff] %v1376_v1   ;;  %v512_v3 = vpop.f32.mrb[24].mxu0  ;;  %v592_v4 = vpop.f32.mrb[24].mxu1 }
 0x12c   : > { %v514_v5 = vpop.f32.mrb[25].mxu0  ;;  %v594_v6 = vpop.f32.mrb[25].mxu1  ;;  %v513_v10 = vadd.f32 %v512_v3, %v1662_v7  ;;  %v593_v11 = vadd.f32 %v592_v4, %v1662_v7 }
 0x12d   : > { %v516_v8 = vpop.f32.mrb[26].mxu0  ;;  %v596_v2 = vpop.f32.mrb[26].mxu1  ;;  %v515_v16 = vadd.f32 %v514_v5, %v1664_v9  ;;  %v595_v17 = vadd.f32 %v594_v6, %v1664_v9 }
 0x12e   : > { %v517_v12 = vadd.f32 %v516_v8, %v1662_v7  ;;  %v597_v13 = vadd.f32 %v596_v2, %v1662_v7  ;;  %v518_v14 = vpop.f32.mrb[27].mxu0  ;;  %v598_v15 = vpop.f32.mrb[27].mxu1 }
 0x12f   : > { %v519_v18 = vadd.f32 %v518_v14, %v1664_v9  ;;  %v599_v19 = vadd.f32 %v598_v15, %v1664_v9 }
 0x130   : > { %v1261_v20 = vpack.c.bf16 %v517_v12, %v513_v10  ;;  %v1301_v21 = vpack.c.bf16 %v597_v13, %v593_v11 }
 0x131   : > { %v1341_v22 = vpack.c.bf16 %v519_v18, %v515_v16  ;;  %v1381_v23 = vpack.c.bf16 %v599_v19, %v595_v17 }
 0x132   : > { %1393 = vst [vmem:[%s1676_s15 + $0x30] sm:$0xff] %v1261_v20   ;;  %1401 = vst [vmem:[%s1676_s15 + $0x70] sm:$0xff] %v1301_v21  }
 0x133   : > { %1408 = vst [vmem:[%s1683_s14 + $0x30] sm:$0xff] %v1341_v22   ;;  %1416 = vst [vmem:[%s1683_s14 + $0x70] sm:$0xff] %v1381_v23   ;;  %v522_v24 = vpop.f32.mrb[28].mxu0  ;;  %v602_v25 = vpop.f32.mrb[28].mxu1 }
 0x134   : > { %v524_v26 = vpop.f32.mrb[29].mxu0  ;;  %v604_v27 = vpop.f32.mrb[29].mxu1  ;;  %v523_v30 = vadd.f32 %v522_v24, %v1662_v7  ;;  %v603_v31 = vadd.f32 %v602_v25, %v1662_v7 }
 0x135   : > { %v526_v28 = vpop.f32.mrb[30].mxu0  ;;  %v606_v29 = vpop.f32.mrb[30].mxu1  ;;  %v525_v36 = vadd.f32 %v524_v26, %v1664_v9  ;;  %v605_v37 = vadd.f32 %v604_v27, %v1664_v9 }
 0x136   : > { %v527_v32 = vadd.f32 %v526_v28, %v1662_v7  ;;  %v607_v33 = vadd.f32 %v606_v29, %v1662_v7  ;;  %v528_v34 = vpop.f32.mrb[31].mxu0  ;;  %v608_v35 = vpop.f32.mrb[31].mxu1 }
 0x137   : > { %v529_v38 = vadd.f32 %v528_v34, %v1664_v9  ;;  %v609_v39 = vadd.f32 %v608_v35, %v1664_v9 }
 0x138   : > { %v1266_v40 = vpack.c.bf16 %v527_v32, %v523_v30  ;;  %v1306_v41 = vpack.c.bf16 %v607_v33, %v603_v31 }
 0x139   : > { %v1346_v42 = vpack.c.bf16 %v529_v38, %v525_v36  ;;  %v1386_v43 = vpack.c.bf16 %v609_v39, %v605_v37 }
 0x13a   : > { %1394 = vst [vmem:[%s1676_s15 + $0x38] sm:$0xff] %v1266_v40   ;;  %1402 = vst [vmem:[%s1676_s15 + $0x78] sm:$0xff] %v1306_v41  }
 0x13b   : > { %1409 = vst [vmem:[%s1683_s14 + $0x38] sm:$0xff] %v1346_v42   ;;  %1417 = vst [vmem:[%s1683_s14 + $0x78] sm:$0xff] %v1386_v43  }
 0x13c PF: > { %s15_s17 = sadd.s32 1, %s1505_s17   ;;  %s1787_s15 = smov %s1501_s16 }
 0x13d   : > { %p12_p5 = scmp.ge.s32.totalorder %s15_s17, 4   ;;  %s1788_s16 = smov %s1790_s18 }
 0x13f   :  { %14 = sbr.rel (!%p12_p5) target bundleno = 2 (0x2), region = 74 }

// kernel: self_attention_forward.3
= control target key start
LH: loop header
LB: loop body
LE: loop exit
PB: predicated region body
PF: predicated region fallthrough
CT: control target
= control target key end

     0   :  { %s4172_s24 = smov 0   ;;  %s4174_s25 = smov 0   ;;  %s5675_s0 = inlined_call_operand.vmem [shape: f32[2,256,128], index: 0, kind: input, shape index: {}]   ;;  %s5676_s1 = inlined_call_operand.vmem [shape: bf16[2,256,128], index: 1, kind: input, shape index: {}]   ;;  %s5677_s2 = inlined_call_operand.vmem [shape: bf16[2,256,128], index: 2, kind: input, shape index: {}]   ;;  %s5678_s3 = inlined_call_operand.vmem [shape: bf16[128,128], index: 3, kind: input, shape index: {}]   ;;  %s5679_s4 = inlined_call_operand.vmem [shape: f32[1,128], index: 4, kind: input, shape index: {}]   ;;  %s5680_s5 = inlined_call_operand.vmem [shape: bf16[128,128], index: 5, kind: input, shape index: {}]   ;;  %s5681_s6 = inlined_call_operand.vmem [shape: f32[1,128], index: 6, kind: input, shape index: {}]   ;;  %s5682_s7 = inlined_call_operand.vmem [shape: f32[2,256,128], index: 7, kind: output, shape index: {}]  }
   0x1   :  { %s4176_s26 = smov 0  }
   0x2 LB: > { %s36_s27 = sadd.s32 1, %s4123_s25  ;;  %p3387_p0 = scmp.ge.s32.totalorder %s4127_s26, 1  ;;  %s4127_s26 = sphi %s4176_s26, %s17_s26   ;;  %s4123_s25 = sphi %s4174_s25, %s5985_s25   ;;  %s4119_s24 = sphi %s4172_s24, %s5984_s24  }
   0x3   : > { %p38_p1 = scmp.ge.s32.totalorder %s36_s27, 2  ;;  %p299_p2 = scmp.lt.s32.totalorder %s4127_s26, 3 }
   0x5   : > { %s5987_s27 = smov (%p38_p1, %s36_s27), 0  ;;  %p300_p3 = pnand %p3387_p0, %p299_p2 }
   0x7   : > { %303 = sbr.rel (%p300_p3) target bundleno = 1518 (0x5ee), region = 48 }
   0xe   : > { %v3801_v0 = vld [vmem:[%s5678_s3] sm:$0xff]   ;;  %p358_p4 = scmp.lt.s32.totalorder %s4119_s24, 1  ;;  %v3802_v1 = vld [vmem:[%s5678_s3 + $0x8] sm:$0xff]   ;;  %v3803_v2 = vld [vmem:[%s5678_s3 + $0x10] sm:$0xff]   ;;  %vm714_vm0 = vcmask 7168  }
   0xf   : > { %3660 = vmatprep.subr.bf16.mxu0 %v3801_v0  ;;  %v3804_v3 = vld [vmem:[%s5678_s3 + $0x18] sm:$0xff]   ;;  %v3805_v7 = vld [vmem:[%s5678_s3 + $0x20] sm:$0xff]   ;;  %v3806_v8 = vld [vmem:[%s5678_s3 + $0x28] sm:$0xff]  }
  0x10   : > { %s5989_s24 = smov (!%p358_p4, %s4119_s24), 1  ;;  %3661 = vmatpush3.bf16.msra.mxu0 %v3801_v0  ;;  %v3807_v9 = vld [vmem:[%s5678_s3 + $0x30] sm:$0xff]   ;;  %v3808_v13 = vld [vmem:[%s5678_s3 + $0x38] sm:$0xff]  }
  0x11   : > { %3662 = vmatprep.subr.bf16.mxu0 %v3802_v1  ;;  %s3448_s11 = sshll.u32 %s5989_s24, 8  ;;  %s3449_s19 = sshll.u32 %s5989_s24, 7 }
  0x12   : > { %s4207_s14 = scalar_lea.vmem %s5675_s0, %s3448_s11  ;;  %s4226_s28 = scalar_lea.vmem %s5676_s1, %s3449_s19 }
  0x13   : > { %v402_v4 = vld [vmem:[%s4207_s14] sm:$0xff]  ;;  %v403_v5 = vld [vmem:[%s4207_s14 + $0x8] sm:$0xff]  ;;  %v404_v14 = vld [vmem:[%s4207_s14 + $0x10] sm:$0xff]  ;;  %s4251_s13 = scalar_lea.vmem %s5677_s2, %s3449_s19  ;;  %s5571_s20 = scalar_lea.vmem %s5682_s7, %s3448_s11 }
  0x14   : > { %3663 = vmatpush3.bf16.msra.mxu0 %v3802_v1  ;;  %v434_v6 = vpack.c.bf16 %v403_v5, %v402_v4  ;;  %v3809_v10 = vld [vmem:[%s4226_s28 + $0x40] sm:$0xff]   ;;  %v3811_v12 = vld [vmem:[%s4226_s28 + $0x48] sm:$0xff]   ;;  %v405_v15 = vld [vmem:[%s4207_s14 + $0x18] sm:$0xff] }
  0x15   : > { %3664 = vmatprep.subr.bf16.mxu0 %v3803_v2  ;;  %v3810_v11 = vld [vmem:[%s4226_s28] sm:$0xff]   ;;  %3476 = vmatprep.subr.bf16.mxu1 %v3809_v10  ;;  %v3812_v17 = vld [vmem:[%s4226_s28 + $0x8] sm:$0xff]   ;;  %v3813_v18 = vld [vmem:[%s4226_s28 + $0x50] sm:$0xff]   ;;  %v435_v20 = vpack.c.bf16 %v405_v15, %v404_v14 }
  0x16   : > { %3676 = vmatprep.mubr.bf16.mxu0 %v434_v6  ;;  %3477 = vmatpush3.bf16.xpose.msra.mxu1 %v3810_v11  ;;  %v406_v16 = vld [vmem:[%s4207_s14 + $0x20] sm:$0xff]  ;;  %v407_v19 = vld [vmem:[%s4207_s14 + $0x28] sm:$0xff]  ;;  %v3814_v22 = vld [vmem:[%s4226_s28 + $0x10] sm:$0xff]  }
  0x17   : > { %3478 = vmatprep.subr.bf16.mxu1 %v3811_v12  ;;  %v436_v21 = vpack.c.bf16 %v407_v19, %v406_v16  ;;  %v408_v23 = vld [vmem:[%s4207_s14 + $0x30] sm:$0xff]  ;;  %v409_v24 = vld [vmem:[%s4207_s14 + $0x38] sm:$0xff]  ;;  %v410_v26 = vld [vmem:[%s4207_s14 + $0x40] sm:$0xff] }
  0x18   : > { %3665 = vmatpush3.bf16.msra.mxu0 %v3803_v2  ;;  %v3815_v25 = vld [vmem:[%s4226_s28 + $0x58] sm:$0xff]   ;;  %v411_v27 = vld [vmem:[%s4207_s14 + $0x48] sm:$0xff]  ;;  %v437_v28 = vpack.c.bf16 %v409_v24, %v408_v23  ;;  %v412_v31 = vld [vmem:[%s4207_s14 + $0x50] sm:$0xff] }
  0x19   : > { %3666 = vmatprep.subr.bf16.mxu0 %v3804_v3  ;;  %v438_v29 = vpack.c.bf16 %v411_v27, %v410_v26  ;;  %v3816_v30 = vld [vmem:[%s4226_s28 + $0x18] sm:$0xff]   ;;  %v3817_v33 = vld [vmem:[%s4226_s28 + $0x60] sm:$0xff]   ;;  %v415_v35 = vld [vmem:[%s4207_s14 + $0x68] sm:$0xff] }
  0x1a   : > { %v413_v32 = vld [vmem:[%s4207_s14 + $0x58] sm:$0xff]  ;;  %v414_v34 = vld [vmem:[%s4207_s14 + $0x60] sm:$0xff]  ;;  %v416_v39 = vld [vmem:[%s4207_s14 + $0x70] sm:$0xff] }
  0x1b   : > { %v439_v36 = vpack.c.bf16 %v413_v32, %v412_v31  ;;  %v440_v37 = vpack.c.bf16 %v415_v35, %v414_v34  ;;  %v3818_v38 = vld [vmem:[%s4226_s28 + $0x20] sm:$0xff]   ;;  %v417_v40 = vld [vmem:[%s4207_s14 + $0x78] sm:$0xff]  ;;  %v3819_v41 = vld [vmem:[%s4226_s28 + $0x68] sm:$0xff]  }
  0x1c   : > { %3667 = vmatpush3.bf16.msra.mxu0 %v3804_v3  ;;  %v418_v42 = vld [vmem:[%s4207_s14 + $0x80] sm:$0xff]  ;;  %v419_v43 = vld [vmem:[%s4207_s14 + $0x88] sm:$0xff]  ;;  %v441_v44 = vpack.c.bf16 %v417_v40, %v416_v39  ;;  %v420_v47 = vld [vmem:[%s4207_s14 + $0x90] sm:$0xff] }
  0x1d   : > { %3668 = vmatprep.subr.bf16.mxu0 %v3805_v7  ;;  %v442_v45 = vpack.c.bf16 %v419_v43, %v418_v42  ;;  %v3820_v46 = vld [vmem:[%s4226_s28 + $0x28] sm:$0xff]   ;;  %v421_v48 = vld [vmem:[%s4207_s14 + $0x98] sm:$0xff]  ;;  %v3821_v49 = vld [vmem:[%s4226_s28 + $0x70] sm:$0xff]  }
  0x1e   : > { %3479 = vmatpush3.bf16.xpose.msra.mxu1 %v3812_v17  ;;  %v422_v50 = vld [vmem:[%s4207_s14 + $0xa0] sm:$0xff]  ;;  %v423_v51 = vld [vmem:[%s4207_s14 + $0xa8] sm:$0xff]  ;;  %v443_v52 = vpack.c.bf16 %v421_v48, %v420_v47  ;;  %v3822_v54 = vld [vmem:[%s4226_s28 + $0x30] sm:$0xff]  }
  0x1f   : > { %3480 = vmatprep.subr.bf16.mxu1 %v3813_v18  ;;  %v444_v53 = vpack.c.bf16 %v423_v51, %v422_v50  ;;  %v424_v55 = vld [vmem:[%s4207_s14 + $0xb0] sm:$0xff]  ;;  %v425_v56 = vld [vmem:[%s4207_s14 + $0xb8] sm:$0xff]  ;;  %v426_v57 = vld [vmem:[%s4207_s14 + $0xc0] sm:$0xff] }
  0x20   : > { %3669 = vmatpush3.bf16.msra.mxu0 %v3805_v7  ;;  %v427_v58 = vld [vmem:[%s4207_s14 + $0xc8] sm:$0xff]  ;;  %v445_v59 = vpack.c.bf16 %v425_v56, %v424_v55  ;;  %v428_v61 = vld [vmem:[%s4207_s14 + $0xd0] sm:$0xff]  ;;  %v429_v62 = vld [vmem:[%s4207_s14 + $0xd8] sm:$0xff] }
  0x21   : > { %3670 = vmatprep.subr.bf16.mxu0 %v3806_v8  ;;  %v446_v60 = vpack.c.bf16 %v427_v58, %v426_v57  ;;  %v430_v63 = vld [vmem:[%s4207_s14 + $0xe0] sm:$0xff]  ;;  %v431_v0 = vld [vmem:[%s4207_s14 + $0xe8] sm:$0xff]  ;;  %v447_v1 = vpack.c.bf16 %v429_v62, %v428_v61  ;;  %v432_v3 = vld [vmem:[%s4207_s14 + $0xf0] sm:$0xff] }
  0x22   : > { %v448_v2 = vpack.c.bf16 %v431_v0, %v430_v63  ;;  %v433_v4 = vld [vmem:[%s4207_s14 + $0xf8] sm:$0xff] }
  0x23   : > { %v449_v5 = vpack.c.bf16 %v433_v4, %v432_v3  ;;  %v3823_v6 = vld [vmem:[%s4226_s28 + $0x78] sm:$0xff]  }
  0x24   : > { %3671 = vmatpush3.bf16.msra.mxu0 %v3806_v8  ;;  %v3824_v7 = vld [vmem:[%s4226_s28 + $0x38] sm:$0xff]  }
  0x25   : > { %3672 = vmatprep.subr.bf16.mxu0 %v3807_v9 }
  0x26   : > { %3481 = vmatpush3.bf16.xpose.msra.mxu1 %v3814_v22 }
  0x27   : > { %3482 = vmatprep.subr.bf16.mxu1 %v3815_v25 }
  0x28   : > { %3673 = vmatpush3.bf16.msra.mxu0 %v3807_v9  ;;  %v4290_v9 = vld [vmem:[%s5679_s4] ss:$0 sm:$0xff] }
  0x29   : > { %3674 = vmatprep.subr.bf16.mxu0 %v3808_v13 }
  0x2c   : > { %3675 = vmatpush3.bf16.msra.mxu0 %v3808_v13 }
  0x2e   : > { %3483 = vmatpush3.bf16.xpose.msra.mxu1 %v3816_v30 }
  0x2f   : > { %3677 = vmatmul.mubr.bf16.vlgmr.msra.gmra.mrb[0].mxu0 %v435_v20  ;;  %3484 = vmatprep.subr.bf16.mxu1 %v3817_v33 }
  0x30   : > { %3680 = vmatprep.mubr.bf16.mxu0 %v436_v21 }
  0x36   : > { %3485 = vmatpush3.bf16.xpose.msra.mxu1 %v3818_v38 }
  0x37   : > { %3681 = vmatmul.mubr.bf16.gmra.mrb[4].mxu0 %v437_v28  ;;  %3486 = vmatprep.subr.bf16.mxu1 %v3819_v41 }
  0x38   : > { %3684 = vmatprep.mubr.bf16.mxu0 %v438_v29 }
  0x3e   : > { %3487 = vmatpush3.bf16.xpose.msra.mxu1 %v3820_v46 }
  0x3f   : > { %3685 = vmatmul.mubr.bf16.gmra.mrb[8].mxu0 %v439_v36  ;;  %3488 = vmatprep.subr.bf16.mxu1 %v3821_v49 }
  0x40   : > { %3688 = vmatprep.mubr.bf16.mxu0 %v440_v37 }
  0x46   : > { %3489 = vmatpush3.bf16.xpose.msra.mxu1 %v3822_v54 }
  0x47   : > { %3689 = vmatmul.mubr.bf16.gmra.mrb[12].mxu0 %v441_v44  ;;  %3490 = vmatprep.subr.bf16.mxu1 %v3823_v6 }
  0x48   : > { %3692 = vmatprep.mubr.bf16.mxu0 %v442_v45 }
  0x4e   : > { %3491 = vmatpush3.bf16.xpose.msra.mxu1 %v3824_v7 }
  0x4f   : > { %3693 = vmatmul.mubr.bf16.gmra.mrb[16].mxu0 %v443_v52 }
  0x50   : > { %3696 = vmatprep.mubr.bf16.mxu0 %v444_v53 }
  0x57   : > { %3697 = vmatmul.mubr.bf16.gmra.mrb[20].mxu0 %v445_v59 }
  0x58   : > { %3700 = vmatprep.mubr.bf16.mxu0 %v446_v60 }
  0x5f   : > { %3701 = vmatmul.mubr.bf16.gmra.mrb[24].mxu0 %v447_v1 }
  0x60   : > { %3704 = vmatprep.mubr.bf16.mxu0 %v448_v2 }
  0x67   : > { %3705 = vmatmul.mubr.bf16.gmra.mrb[28].mxu0 %v449_v5 }
 0x102   : > { %v3678_v8 = vpop.f32.mrb[0].mxu0 }
 0x103   : > { %v555_v10 = vpop.f32.mrb[1].mxu0  ;;  %v564_v12 = vadd.f32 %v3678_v8, %v4290_v9 }
 0x104   : > { %v3679_v11 = vpop.f32.mrb[2].mxu0  ;;  %v556_v15 = vadd.f32 %v4290_v9, %v555_v10 }
 0x105   : > { %v567_v13 = vadd.f32 %v3679_v11, %v4290_v9  ;;  %v558_v14 = vpop.f32.mrb[3].mxu0 }
 0x106   : > { %v559_v16 = vadd.f32 %v4290_v9, %v558_v14 }
 0x107   : > { %v683_v17 = vpack.c.bf16 %v567_v13, %v564_v12 }
 0x108   : > { %v682_v18 = vpack.c.bf16 %v559_v16, %v556_v15 }
 0x10a   : > { %3492 = vmatprep.mubr.bf16.mxu1 %v682_v18  ;;  %v3682_v19 = vpop.f32.mrb[4].mxu0 }
 0x10b   : > { %3493 = vmatmul.mubr.bf16.vlgmr.msra.gmra.mrb[0].mxu1 %v682_v18  ;;  %v580_v20 = vadd.f32 %v3682_v19, %v4290_v9  ;;  %v571_v21 = vpop.f32.mrb[5].mxu0 }
 0x10c   : > { %3494 = vmatprep.mubr.bf16.mxu1 %v683_v17  ;;  %v572_v22 = vadd.f32 %v4290_v9, %v571_v21  ;;  %v3683_v23 = vpop.f32.mrb[6].mxu0 }
 0x10d   : > { %v583_v24 = vadd.f32 %v3683_v23, %v4290_v9  ;;  %v574_v25 = vpop.f32.mrb[7].mxu0 }
 0x10e   : > { %v575_v26 = vadd.f32 %v4290_v9, %v574_v25 }
 0x10f   : > { %v685_v27 = vpack.c.bf16 %v583_v24, %v580_v20 }
 0x110   : > { %v684_v28 = vpack.c.bf16 %v575_v26, %v572_v22 }
 0x112   : > { %v3686_v29 = vpop.f32.mrb[8].mxu0 }
 0x113   : > { %3495 = vmatmul.mubr.bf16.gmra.mrb[4].mxu1 %v683_v17  ;;  %v596_v30 = vadd.f32 %v3686_v29, %v4290_v9  ;;  %v587_v31 = vpop.f32.mrb[9].mxu0 }
 0x114   : > { %3496 = vmatprep.mubr.bf16.mxu1 %v684_v28  ;;  %v588_v32 = vadd.f32 %v4290_v9, %v587_v31  ;;  %v3687_v33 = vpop.f32.mrb[10].mxu0 }
 0x115   : > { %v599_v34 = vadd.f32 %v3687_v33, %v4290_v9  ;;  %v590_v35 = vpop.f32.mrb[11].mxu0 }
 0x116   : > { %v591_v36 = vadd.f32 %v4290_v9, %v590_v35 }
 0x117   : > { %v687_v37 = vpack.c.bf16 %v599_v34, %v596_v30 }
 0x118   : > { %v686_v38 = vpack.c.bf16 %v591_v36, %v588_v32 }
 0x11a   : > { %v3690_v39 = vpop.f32.mrb[12].mxu0 }
 0x11b   : > { %3497 = vmatmul.mubr.bf16.gmra.mrb[8].mxu1 %v684_v28  ;;  %v612_v40 = vadd.f32 %v3690_v39, %v4290_v9  ;;  %v603_v41 = vpop.f32.mrb[13].mxu0 }
 0x11c   : > { %3498 = vmatprep.mubr.bf16.mxu1 %v685_v27  ;;  %v604_v42 = vadd.f32 %v4290_v9, %v603_v41  ;;  %v3691_v43 = vpop.f32.mrb[14].mxu0 }
 0x11d   : > { %v615_v44 = vadd.f32 %v3691_v43, %v4290_v9  ;;  %v606_v45 = vpop.f32.mrb[15].mxu0  ;;  %v4130_v43 = vmov 0  }
 0x11e   : > { %v607_v46 = vadd.f32 %v4290_v9, %v606_v45  ;;  %3799 = vset.pattern.permute.xlu0 %v4130_v43  ;;  %3800 = vset.pattern.permute.xlu1 %v4130_v43 }
 0x11f   : > { %v689_v47 = vpack.c.bf16 %v615_v44, %v612_v40 }
 0x120   : > { %v688_v48 = vpack.c.bf16 %v607_v46, %v604_v42 }
 0x122   : > { %v3694_v49 = vpop.f32.mrb[16].mxu0 }
 0x123   : > { %3499 = vmatmul.mubr.bf16.gmra.mrb[12].mxu1 %v685_v27  ;;  %v628_v50 = vadd.f32 %v3694_v49, %v4290_v9  ;;  %v619_v51 = vpop.f32.mrb[17].mxu0 }
 0x124   : > { %3500 = vmatprep.mubr.bf16.mxu1 %v686_v38  ;;  %v620_v52 = vadd.f32 %v4290_v9, %v619_v51  ;;  %v3695_v53 = vpop.f32.mrb[18].mxu0  ;;  %v4131_v51 = vmov 0.0  }
 0x125   : > { %v631_v54 = vadd.f32 %v3695_v53, %v4290_v9  ;;  %v622_v55 = vpop.f32.mrb[19].mxu0  ;;  %747 = vst.msk [vmem:[#allocation4] sm:$0xff] %vm714_vm0, %v4131_v51  ;;  %748 = vst.msk [vmem:[#allocation4 + $0x8] sm:$0xff] %vm714_vm0, %v4131_v51 }
 0x126   : > { %v623_v56 = vadd.f32 %v4290_v9, %v622_v55  ;;  %749 = vst.msk [vmem:[#allocation4 + $0x10] sm:$0xff] %vm714_vm0, %v4131_v51  ;;  %750 = vst.msk [vmem:[#allocation4 + $0x18] sm:$0xff] %vm714_vm0, %v4131_v51 }
 0x127   : > { %v691_v57 = vpack.c.bf16 %v631_v54, %v628_v50  ;;  %751 = vst.msk [vmem:[#allocation4 + $0x20] sm:$0xff] %vm714_vm0, %v4131_v51  ;;  %752 = vst.msk [vmem:[#allocation4 + $0x28] sm:$0xff] %vm714_vm0, %v4131_v51 }
 0x128   : > { %v690_v58 = vpack.c.bf16 %v623_v56, %v620_v52  ;;  %753 = vst.msk [vmem:[#allocation4 + $0x30] sm:$0xff] %vm714_vm0, %v4131_v51  ;;  %754 = vst.msk [vmem:[#allocation4 + $0x38] sm:$0xff] %vm714_vm0, %v4131_v51 }
 0x129   : > { %755 = vst.msk [vmem:[#allocation4 + $0x40] sm:$0xff] %vm714_vm0, %v4131_v51  ;;  %756 = vst.msk [vmem:[#allocation4 + $0x48] sm:$0xff] %vm714_vm0, %v4131_v51 }
 0x12a   : > { %v3698_v59 = vpop.f32.mrb[20].mxu0  ;;  %757 = vst.msk [vmem:[#allocation4 + $0x50] sm:$0xff] %vm714_vm0, %v4131_v51  ;;  %758 = vst.msk [vmem:[#allocation4 + $0x58] sm:$0xff] %vm714_vm0, %v4131_v51 }
 0x12b   : > { %3501 = vmatmul.mubr.bf16.gmra.mrb[16].mxu1 %v686_v38  ;;  %v644_v60 = vadd.f32 %v3698_v59, %v4290_v9  ;;  %v635_v61 = vpop.f32.mrb[21].mxu0  ;;  %759 = vst.msk [vmem:[#allocation4 + $0x60] sm:$0xff] %vm714_vm0, %v4131_v51  ;;  %760 = vst.msk [vmem:[#allocation4 + $0x68] sm:$0xff] %vm714_vm0, %v4131_v51 }
 0x12c   : > { %3502 = vmatprep.mubr.bf16.mxu1 %v687_v37  ;;  %v636_v62 = vadd.f32 %v4290_v9, %v635_v61  ;;  %v3699_v63 = vpop.f32.mrb[22].mxu0  ;;  %761 = vst.msk [vmem:[#allocation4 + $0x70] sm:$0xff] %vm714_vm0, %v4131_v51  ;;  %762 = vst.msk [vmem:[#allocation4 + $0x78] sm:$0xff] %vm714_vm0, %v4131_v51 }
 0x12d   : > { %v647_v0 = vadd.f32 %v3699_v63, %v4290_v9  ;;  %v638_v1 = vpop.f32.mrb[23].mxu0  ;;  %763 = vst.msk [vmem:[#allocation4 + $0x80] sm:$0xff] %vm714_vm0, %v4131_v51  ;;  %764 = vst.msk [vmem:[#allocation4 + $0x88] sm:$0xff] %vm714_vm0, %v4131_v51 }
 0x12e   : > { %v639_v2 = vadd.f32 %v4290_v9, %v638_v1  ;;  %765 = vst.msk [vmem:[#allocation4 + $0x90] sm:$0xff] %vm714_vm0, %v4131_v51  ;;  %766 = vst.msk [vmem:[#allocation4 + $0x98] sm:$0xff] %vm714_vm0, %v4131_v51 }
 0x12f   : > { %v693_v3 = vpack.c.bf16 %v647_v0, %v644_v60  ;;  %767 = vst.msk [vmem:[#allocation4 + $0xa0] sm:$0xff] %vm714_vm0, %v4131_v51  ;;  %768 = vst.msk [vmem:[#allocation4 + $0xa8] sm:$0xff] %vm714_vm0, %v4131_v51 }
 0x130   : > { %v692_v4 = vpack.c.bf16 %v639_v2, %v636_v62  ;;  %769 = vst.msk [vmem:[#allocation4 + $0xb0] sm:$0xff] %vm714_vm0, %v4131_v51  ;;  %770 = vst.msk [vmem:[#allocation4 + $0xb8] sm:$0xff] %vm714_vm0, %v4131_v51 }
 0x131   : > { %771 = vst.msk [vmem:[#allocation4 + $0xc0] sm:$0xff] %vm714_vm0, %v4131_v51  ;;  %772 = vst.msk [vmem:[#allocation4 + $0xc8] sm:$0xff] %vm714_vm0, %v4131_v51 }
 0x132   : > { %v3702_v5 = vpop.f32.mrb[24].mxu0  ;;  %773 = vst.msk [vmem:[#allocation4 + $0xd0] sm:$0xff] %vm714_vm0, %v4131_v51  ;;  %774 = vst.msk [vmem:[#allocation4 + $0xd8] sm:$0xff] %vm714_vm0, %v4131_v51 }
 0x133   : > { %3503 = vmatmul.mubr.bf16.gmra.mrb[20].mxu1 %v687_v37  ;;  %v660_v6 = vadd.f32 %v3702_v5, %v4290_v9  ;;  %v651_v7 = vpop.f32.mrb[25].mxu0  ;;  %775 = vst.msk [vmem:[#allocation4 + $0xe0] sm:$0xff] %vm714_vm0, %v4131_v51  ;;  %776 = vst.msk [vmem:[#allocation4 + $0xe8] sm:$0xff] %vm714_vm0, %v4131_v51 }
 0x134   : > { %3504 = vmatprep.mubr.bf16.mxu1 %v688_v48  ;;  %v652_v8 = vadd.f32 %v4290_v9, %v651_v7  ;;  %v3703_v10 = vpop.f32.mrb[26].mxu0  ;;  %777 = vst.msk [vmem:[#allocation4 + $0xf0] sm:$0xff] %vm714_vm0, %v4131_v51  ;;  %778 = vst.msk [vmem:[#allocation4 + $0xf8] sm:$0xff] %vm714_vm0, %v4131_v51 }
 0x135   : > { %v663_v11 = vadd.f32 %v3703_v10, %v4290_v9  ;;  %v654_v12 = vpop.f32.mrb[27].mxu0 }
 0x136   : > { %v655_v13 = vadd.f32 %v4290_v9, %v654_v12 }
 0x137   : > { %v695_v14 = vpack.c.bf16 %v663_v11, %v660_v6 }
 0x138   : > { %v694_v15 = vpack.c.bf16 %v655_v13, %v652_v8 }
 0x13a   : > { %v3706_v16 = vpop.f32.mrb[28].mxu0 }
 0x13b   : > { %3505 = vmatmul.mubr.bf16.gmra.mrb[24].mxu1 %v688_v48  ;;  %v676_v17 = vadd.f32 %v3706_v16, %v4290_v9  ;;  %v667_v18 = vpop.f32.mrb[29].mxu0 }
 0x13c   : > { %3506 = vmatprep.mubr.bf16.mxu1 %v689_v47  ;;  %v668_v19 = vadd.f32 %v4290_v9, %v667_v18  ;;  %v3707_v20 = vpop.f32.mrb[30].mxu0 }
 0x13d   : > { %v679_v21 = vadd.f32 %v3707_v20, %v4290_v9  ;;  %v670_v22 = vpop.f32.mrb[31].mxu0 }
 0x13e   : > { %v671_v23 = vadd.f32 %v4290_v9, %v670_v22  ;;  %v4129_v9 = vmov -inf  }
 0x13f   : > { %v697_v24 = vpack.c.bf16 %v679_v21, %v676_v17  ;;  %715 = vst.msk [vmem:[#allocation3] sm:$0xff] %vm714_vm0, %v4129_v9  ;;  %716 = vst.msk [vmem:[#allocation3 + $0x8] sm:$0xff] %vm714_vm0, %v4129_v9 }
 0x140   : > { %v696_v25 = vpack.c.bf16 %v671_v23, %v668_v19  ;;  %717 = vst.msk [vmem:[#allocation3 + $0x10] sm:$0xff] %vm714_vm0, %v4129_v9  ;;  %718 = vst.msk [vmem:[#allocation3 + $0x18] sm:$0xff] %vm714_vm0, %v4129_v9 }
 0x141   : > { %719 = vst.msk [vmem:[#allocation3 + $0x20] sm:$0xff] %vm714_vm0, %v4129_v9  ;;  %720 = vst.msk [vmem:[#allocation3 + $0x28] sm:$0xff] %vm714_vm0, %v4129_v9 }
 0x142   : > { %721 = vst.msk [vmem:[#allocation3 + $0x30] sm:$0xff] %vm714_vm0, %v4129_v9  ;;  %722 = vst.msk [vmem:[#allocation3 + $0x38] sm:$0xff] %vm714_vm0, %v4129_v9 }
 0x143   : > { %3507 = vmatmul.mubr.bf16.gmra.mrb[28].mxu1 %v689_v47  ;;  %723 = vst.msk [vmem:[#allocation3 + $0x40] sm:$0xff] %vm714_vm0, %v4129_v9  ;;  %724 = vst.msk [vmem:[#allocation3 + $0x48] sm:$0xff] %vm714_vm0, %v4129_v9 }
 0x144   : > { %3508 = vmatprep.mubr.bf16.mxu1 %v690_v58  ;;  %725 = vst.msk [vmem:[#allocation3 + $0x50] sm:$0xff] %vm714_vm0, %v4129_v9  ;;  %726 = vst.msk [vmem:[#allocation3 + $0x58] sm:$0xff] %vm714_vm0, %v4129_v9 }
 0x145   : > { %727 = vst.msk [vmem:[#allocation3 + $0x60] sm:$0xff] %vm714_vm0, %v4129_v9  ;;  %728 = vst.msk [vmem:[#allocation3 + $0x68] sm:$0xff] %vm714_vm0, %v4129_v9 }
 0x146   : > { %729 = vst.msk [vmem:[#allocation3 + $0x70] sm:$0xff] %vm714_vm0, %v4129_v9  ;;  %730 = vst.msk [vmem:[#allocation3 + $0x78] sm:$0xff] %vm714_vm0, %v4129_v9 }
 0x147   : > { %731 = vst.msk [vmem:[#allocation3 + $0x80] sm:$0xff] %vm714_vm0, %v4129_v9  ;;  %732 = vst.msk [vmem:[#allocation3 + $0x88] sm:$0xff] %vm714_vm0, %v4129_v9 }
 0x148   : > { %733 = vst.msk [vmem:[#allocation3 + $0x90] sm:$0xff] %vm714_vm0, %v4129_v9  ;;  %734 = vst.msk [vmem:[#allocation3 + $0x98] sm:$0xff] %vm714_vm0, %v4129_v9 }
 0x149   : > { %735 = vst.msk [vmem:[#allocation3 + $0xa0] sm:$0xff] %vm714_vm0, %v4129_v9  ;;  %736 = vst.msk [vmem:[#allocation3 + $0xa8] sm:$0xff] %vm714_vm0, %v4129_v9 }
 0x14a   : > { %737 = vst.msk [vmem:[#allocation3 + $0xb0] sm:$0xff] %vm714_vm0, %v4129_v9  ;;  %738 = vst.msk [vmem:[#allocation3 + $0xb8] sm:$0xff] %vm714_vm0, %v4129_v9 }
 0x14b   : > { %3509 = vmatmul.mubr.bf16.gmra.mrb[32].mxu1 %v690_v58  ;;  %739 = vst.msk [vmem:[#allocation3 + $0xc0] sm:$0xff] %vm714_vm0, %v4129_v9  ;;  %740 = vst.msk [vmem:[#allocation3 + $0xc8] sm:$0xff] %vm714_vm0, %v4129_v9 }
 0x14c   : > { %3510 = vmatprep.mubr.bf16.mxu1 %v691_v57  ;;  %741 = vst.msk [vmem:[#allocation3 + $0xd0] sm:$0xff] %vm714_vm0, %v4129_v9  ;;  %742 = vst.msk [vmem:[#allocation3 + $0xd8] sm:$0xff] %vm714_vm0, %v4129_v9 }
 0x14d   : > { %743 = vst.msk [vmem:[#allocation3 + $0xe0] sm:$0xff] %vm714_vm0, %v4129_v9  ;;  %744 = vst.msk [vmem:[#allocation3 + $0xe8] sm:$0xff] %vm714_vm0, %v4129_v9 }
 0x14e   : > { %745 = vst.msk [vmem:[#allocation3 + $0xf0] sm:$0xff] %vm714_vm0, %v4129_v9  ;;  %746 = vst.msk [vmem:[#allocation3 + $0xf8] sm:$0xff] %vm714_vm0, %v4129_v9 }
 0x153   : > { %3511 = vmatmul.mubr.bf16.gmra.mrb[36].mxu1 %v691_v57 }
 0x154   : > { %3512 = vmatprep.mubr.bf16.mxu1 %v692_v4 }
 0x15b   : > { %3513 = vmatmul.mubr.bf16.gmra.mrb[40].mxu1 %v692_v4 }
 0x15c   : > { %3514 = vmatprep.mubr.bf16.mxu1 %v693_v3 }
 0x163   : > { %3515 = vmatmul.mubr.bf16.gmra.mrb[44].mxu1 %v693_v3 }
 0x164   : > { %3516 = vmatprep.mubr.bf16.mxu1 %v694_v15 }
 0x16b   : > { %3517 = vmatmul.mubr.bf16.gmra.mrb[48].mxu1 %v694_v15 }
 0x16c   : > { %3518 = vmatprep.mubr.bf16.mxu1 %v695_v14 }
 0x173   : > { %3519 = vmatmul.mubr.bf16.gmra.mrb[52].mxu1 %v695_v14 }
 0x174   : > { %3520 = vmatprep.mubr.bf16.mxu1 %v696_v25 }
 0x17b   : > { %3521 = vmatmul.mubr.bf16.gmra.mrb[56].mxu1 %v696_v25 }
 0x17c   : > { %3522 = vmatprep.mubr.bf16.mxu1 %v697_v24 }
 0x183   : > { %3523 = vmatmul.mubr.bf16.gmra.mrb[60].mxu1 %v697_v24 }
 0x1de   : > { %v4356_v26 = vpop.f32.mrb[0].mxu1 }
 0x1df   : > { %v4358_v27 = vpop.f32.mrb[1].mxu1 }
 0x1e0   : > { %v4360_v28 = vpop.f32.mrb[2].mxu1  ;;  %v1212_v29 = vmax.f32 %v4356_v26, %v4358_v27 }
 0x1e1   : > { %v4364_v30 = vpop.f32.mrb[3].mxu1 }
 0x1e2   : > { %1213 = vmax.xlane.f32.xlu0 %v1212_v29  ;;  %v1215_v31 = vmax.f32 %v4360_v28, %v4364_v30 }
 0x1e6   : > { %1216 = vmax.xlane.f32.xlu0 %v1215_v31  ;;  %v4368_v32 = vpop.f32.mrb[4].mxu1 }
 0x1e7   : > { %v4370_v33 = vpop.f32.mrb[5].mxu1 }
 0x1e8   : > { %v4372_v34 = vpop.f32.mrb[6].mxu1  ;;  %v1218_v35 = vmax.f32 %v4368_v32, %v4370_v33 }
 0x1e9   : > { %v4376_v36 = vpop.f32.mrb[7].mxu1 }
 0x1ea   : > { %1219 = vmax.xlane.f32.xlu1 %v1218_v35  ;;  %v1221_v37 = vmax.f32 %v4372_v34, %v4376_v36 }
 0x1ee   : > { %1222 = vmax.xlane.f32.xlu1 %v1221_v37  ;;  %v4380_v38 = vpop.f32.mrb[8].mxu1 }
 0x1ef   : > { %v4382_v39 = vpop.f32.mrb[9].mxu1 }
 0x1f0   : > { %v4384_v40 = vpop.f32.mrb[10].mxu1  ;;  %v1224_v41 = vmax.f32 %v4380_v38, %v4382_v39 }
 0x1f1   : > { %v4388_v42 = vpop.f32.mrb[11].mxu1 }
 0x1f2   : > { %1225 = vmax.xlane.f32.xlu0 %v1224_v41  ;;  %v1227_v44 = vmax.f32 %v4384_v40, %v4388_v42 }
 0x1f4   : > { %1228 = vmax.xlane.f32.xlu1 %v1227_v44 }
 0x1f6   : > { %v4392_v45 = vpop.f32.mrb[12].mxu1 }
 0x1f7   : > { %v4394_v46 = vpop.f32.mrb[13].mxu1 }
 0x1f8   : > { %v4396_v47 = vpop.f32.mrb[14].mxu1  ;;  %v1230_v48 = vmax.f32 %v4392_v45, %v4394_v46 }
 0x1f9   : > { %v4400_v49 = vpop.f32.mrb[15].mxu1 }
 0x1fa   : > { %1231 = vmax.xlane.f32.xlu0 %v1230_v48  ;;  %v1233_v50 = vmax.f32 %v4396_v47, %v4400_v49 }
 0x1fc   : > { %1234 = vmax.xlane.f32.xlu1 %v1233_v50 }
 0x1fe   : > { %v4436_v52 = vpop.f32.mrb[16].mxu1 }
 0x1ff   : > { %v4438_v53 = vpop.f32.mrb[17].mxu1 }
 0x200   : > { %v4440_v54 = vpop.f32.mrb[18].mxu1  ;;  %v1236_v55 = vmax.f32 %v4436_v52, %v4438_v53 }
 0x201   : > { %v4444_v56 = vpop.f32.mrb[19].mxu1 }
 0x202   : > { %1237 = vmax.xlane.f32.xlu0 %v1236_v55  ;;  %v1239_v57 = vmax.f32 %v4440_v54, %v4444_v56 }
 0x204   : > { %1240 = vmax.xlane.f32.xlu1 %v1239_v57 }
 0x206   : > { %v4448_v58 = vpop.f32.mrb[20].mxu1 }
 0x207   : > { %v4450_v59 = vpop.f32.mrb[21].mxu1 }
 0x208   : > { %v4452_v60 = vpop.f32.mrb[22].mxu1  ;;  %v1242_v61 = vmax.f32 %v4448_v58, %v4450_v59 }
 0x209   : > { %v4456_v62 = vpop.f32.mrb[23].mxu1 }
 0x20a   : > { %1243 = vmax.xlane.f32.xlu0 %v1242_v61  ;;  %v1245_v63 = vmax.f32 %v4452_v60, %v4456_v62 }
 0x20c   : > { %1246 = vmax.xlane.f32.xlu1 %v1245_v63 }
 0x20e   : > { %v4460_v0 = vpop.f32.mrb[24].mxu1 }
 0x20f   : > { %5772 = vst [vmem:[#allocation6_spill] sm:$0xff] %v4460_v0  ;;  %v4462_v1 = vpop.f32.mrb[25].mxu1 }
 0x210   : > { %5773 = vst [vmem:[#allocation7_spill] sm:$0xff] %v4462_v1  ;;  %v4464_v2 = vpop.f32.mrb[26].mxu1  ;;  %v1248_v3 = vmax.f32 %v4460_v0, %v4462_v1  ;;  %v4773_v1 = vld [vmem:[#allocation3 + $0x90] sm:$0xff] }
 0x211   : > { %5774 = vst [vmem:[#allocation8_spill] sm:$0xff] %v4464_v2  ;;  %v4468_v4 = vpop.f32.mrb[27].mxu1  ;;  %5825 = vst [vmem:[#allocation58_spill] sm:$0xff] %v4773_v1 }
 0x212   : > { %5775 = vst [vmem:[#allocation9_spill] sm:$0xff] %v4468_v4  ;;  %1249 = vmax.xlane.f32.xlu0 %v1248_v3  ;;  %v1251_v5 = vmax.f32 %v4464_v2, %v4468_v4  ;;  %v4775_v2 = vld [vmem:[#allocation3 + $0x98] sm:$0xff] }
 0x213   : > { %5826 = vst [vmem:[#allocation59_spill] sm:$0xff] %v4775_v2 }
 0x214   : > { %1252 = vmax.xlane.f32.xlu1 %v1251_v5 }
 0x216   : > { %v4472_v6 = vpop.f32.mrb[28].mxu1 }
 0x217   : > { %5776 = vst [vmem:[#allocation10_spill] sm:$0xff] %v4472_v6  ;;  %v4474_v7 = vpop.f32.mrb[29].mxu1 }
 0x218   : > { %5777 = vst [vmem:[#allocation11_spill] sm:$0xff] %v4474_v7  ;;  %v4476_v8 = vpop.f32.mrb[30].mxu1  ;;  %v1254_v10 = vmax.f32 %v4472_v6, %v4474_v7  ;;  %v4752_v7 = vld [vmem:[#allocation3 + $0x80] sm:$0xff]  ;;  %v4754_v6 = vld [vmem:[#allocation3 + $0x88] sm:$0xff] }
 0x219   : > { %5778 = vst [vmem:[#allocation12_spill] sm:$0xff] %v4476_v8  ;;  %v4480_v11 = vpop.f32.mrb[31].mxu1  ;;  %5821 = vst [vmem:[#allocation55_spill] sm:$0xff] %v4752_v7 }
 0x21a   : > { %5779 = vst [vmem:[#allocation13_spill] sm:$0xff] %v4480_v11  ;;  %1255 = vmax.xlane.f32.xlu0 %v1254_v10  ;;  %v1257_v12 = vmax.f32 %v4476_v8, %v4480_v11  ;;  %v4734_v11 = vld [vmem:[#allocation3 + $0x70] sm:$0xff]  ;;  %v4736_v8 = vld [vmem:[#allocation3 + $0x78] sm:$0xff]  ;;  %5822 = vst [vmem:[#allocation56_spill] sm:$0xff] %v4754_v6 }
 0x21b   : > { %5818 = vst [vmem:[#allocation52_spill] sm:$0xff] %v4734_v11  ;;  %5819 = vst [vmem:[#allocation53_spill] sm:$0xff] %v4736_v8 }
 0x21c   : > { %1258 = vmax.xlane.f32.xlu1 %v1257_v12 }
 0x21e   : > { %v4484_v13 = vpop.f32.mrb[32].mxu1 }
 0x21f   : > { %5780 = vst [vmem:[#allocation14_spill] sm:$0xff] %v4484_v13  ;;  %v4486_v14 = vpop.f32.mrb[33].mxu1 }
 0x220   : > { %5781 = vst [vmem:[#allocation15_spill] sm:$0xff] %v4486_v14  ;;  %v4488_v15 = vpop.f32.mrb[34].mxu1  ;;  %v1260_v16 = vmax.f32 %v4484_v13, %v4486_v14 }
 0x221   : > { %5782 = vst [vmem:[#allocation16_spill] sm:$0xff] %v4488_v15  ;;  %v4492_v17 = vpop.f32.mrb[35].mxu1 }
 0x222   : > { %5783 = vst [vmem:[#allocation17_spill] sm:$0xff] %v4492_v17  ;;  %1261 = vmax.xlane.f32.xlu0 %v1260_v16  ;;  %v1263_v18 = vmax.f32 %v4488_v15, %v4492_v17 }
 0x224   : > { %1264 = vmax.xlane.f32.xlu1 %v1263_v18 }
 0x226   : > { %v4496_v19 = vpop.f32.mrb[36].mxu1 }
 0x227   : > { %5784 = vst [vmem:[#allocation18_spill] sm:$0xff] %v4496_v19  ;;  %v4498_v20 = vpop.f32.mrb[37].mxu1 }
 0x228   : > { %5785 = vst [vmem:[#allocation19_spill] sm:$0xff] %v4498_v20  ;;  %v4500_v21 = vpop.f32.mrb[38].mxu1  ;;  %v1266_v22 = vmax.f32 %v4496_v19, %v4498_v20  ;;  %v4655_v20 = vld [vmem:[#allocation3 + $0x30] sm:$0xff] }
 0x229   : > { %5786 = vst [vmem:[#allocation20_spill] sm:$0xff] %v4500_v21  ;;  %v4504_v23 = vpop.f32.mrb[39].mxu1  ;;  %5814 = vst [vmem:[#allocation48_spill] sm:$0xff] %v4655_v20 }
 0x22a   : > { %5787 = vst [vmem:[#allocation21_spill] sm:$0xff] %v4504_v23  ;;  %1267 = vmax.xlane.f32.xlu0 %v1266_v22  ;;  %v1269_v24 = vmax.f32 %v4500_v21, %v4504_v23  ;;  %v4627_v23 = vld [vmem:[#allocation3 + $0x20] sm:$0xff] }
 0x22c   : > { %1270 = vmax.xlane.f32.xlu1 %v1269_v24 }
 0x22e   : > { %v4508_v25 = vpop.f32.mrb[40].mxu1 }
 0x22f   : > { %5788 = vst [vmem:[#allocation22_spill] sm:$0xff] %v4508_v25  ;;  %v4510_v9 = vpop.f32.mrb[41].mxu1 }
 0x230   : > { %5789 = vst [vmem:[#allocation23_spill] sm:$0xff] %v4510_v9  ;;  %v4512_v29 = vpop.f32.mrb[42].mxu1  ;;  %v1272_v31 = vmax.f32 %v4508_v25, %v4510_v9  ;;  %v3833_v9 = vld [vmem:[%s4251_s13 + $0x60] sm:$0xff]  }
 0x231   : > { %5790 = vst [vmem:[#allocation24_spill] sm:$0xff] %v4512_v29  ;;  %v4516_v35 = vpop.f32.mrb[43].mxu1  ;;  %v3834_v25 = vld [vmem:[%s4251_s13 + $0x20] sm:$0xff]  }
 0x232   : > { %5791 = vst [vmem:[#allocation25_spill] sm:$0xff] %v4516_v35  ;;  %1273 = vmax.xlane.f32.xlu1 %v1272_v31  ;;  %v1275_v37 = vmax.f32 %v4512_v29, %v4516_v35 }
 0x234   : > { %1276 = vmax.xlane.f32.xlu0 %v1275_v37 }
 0x236   : > { %v4520_v41 = vpop.f32.mrb[44].mxu1 }
 0x237   : > { %5792 = vst [vmem:[#allocation26_spill] sm:$0xff] %v4520_v41  ;;  %v4522_v43 = vpop.f32.mrb[45].mxu1 }
 0x238   : > { %5793 = vst [vmem:[#allocation27_spill] sm:$0xff] %v4522_v43  ;;  %v4524_v44 = vpop.f32.mrb[46].mxu1  ;;  %v1278_v48 = vmax.f32 %v4520_v41, %v4522_v43  ;;  %v4584_v43 = vld [vmem:[#allocation3] sm:$0xff]  ;;  %v3829_v41 = vld [vmem:[%s4251_s13 + $0x50] sm:$0xff]  }
 0x239   : > { %5794 = vst [vmem:[#allocation28_spill] sm:$0xff] %v4524_v44  ;;  %v4528_v50 = vpop.f32.mrb[47].mxu1 }
 0x23a   : > { %5795 = vst [vmem:[#allocation29_spill] sm:$0xff] %v4528_v50  ;;  %1279 = vmax.xlane.f32.xlu1 %v1278_v48  ;;  %v1281_v51 = vmax.f32 %v4524_v44, %v4528_v50  ;;  %v4718_v50 = vld [vmem:[#allocation3 + $0x68] sm:$0xff] }
 0x23c   : > { %1282 = vmax.xlane.f32.xlu0 %v1281_v51 }
 0x23e   : > { %v4532_v55 = vpop.f32.mrb[48].mxu1 }
 0x23f   : > { %5796 = vst [vmem:[#allocation30_spill] sm:$0xff] %v4532_v55  ;;  %v4534_v57 = vpop.f32.mrb[49].mxu1 }
 0x240   : > { %5797 = vst [vmem:[#allocation31_spill] sm:$0xff] %v4534_v57  ;;  %v4536_v61 = vpop.f32.mrb[50].mxu1  ;;  %v1284_v63 = vmax.f32 %v4532_v55, %v4534_v57  ;;  %v3825_v57 = vld [vmem:[%s4251_s13 + $0x40] sm:$0xff]  }
 0x241   : > { %5798 = vst [vmem:[#allocation32_spill] sm:$0xff] %v4536_v61  ;;  %v4540_v3 = vpop.f32.mrb[51].mxu1  ;;  %v3826_v55 = vld [vmem:[%s4251_s13] sm:$0xff]   ;;  %3524 = vmatprep.subr.bf16.mxu0 %v3825_v57 }
 0x242   : > { %5799 = vst [vmem:[#allocation33_spill] sm:$0xff] %v4540_v3  ;;  %1285 = vmax.xlane.f32.xlu0 %v1284_v63  ;;  %v1287_v5 = vmax.f32 %v4536_v61, %v4540_v3  ;;  %3525 = vmatpush3.bf16.msra.mxu0 %v3826_v55  ;;  %v3838_v3 = vld [vmem:[%s4251_s13 + $0x30] sm:$0xff]  }
 0x244   : > { %1288 = vmax.xlane.f32.xlu1 %v1287_v5 }
 0x246   : > { %v4544_v10 = vpop.f32.mrb[52].mxu1 }
 0x247   : > { %5800 = vst [vmem:[#allocation34_spill] sm:$0xff] %v4544_v10  ;;  %v4546_v12 = vpop.f32.mrb[53].mxu1 }
 0x248   : > { %5801 = vst [vmem:[#allocation35_spill] sm:$0xff] %v4546_v12  ;;  %v4548_v16 = vpop.f32.mrb[54].mxu1  ;;  %v1290_v18 = vmax.f32 %v4544_v10, %v4546_v12  ;;  %v3830_v10 = vld [vmem:[%s4251_s13 + $0x10] sm:$0xff]  }
 0x249   : > { %5802 = vst [vmem:[#allocation36_spill] sm:$0xff] %v4548_v16  ;;  %v4552_v22 = vpop.f32.mrb[55].mxu1 }
 0x24a   : > { %5803 = vst [vmem:[#allocation37_spill] sm:$0xff] %v4552_v22  ;;  %1291 = vmax.xlane.f32.xlu1 %v1290_v18  ;;  %v1293_v24 = vmax.f32 %v4548_v16, %v4552_v22  ;;  %v4615_v22 = vld [vmem:[#allocation3 + $0x18] sm:$0xff]  ;;  %v3836_v16 = vld [vmem:[%s4251_s13 + $0x28] sm:$0xff]  }
 0x24c   : > { %1294 = vmax.xlane.f32.xlu0 %v1293_v24 }
 0x24e   : > { %v4556_v31 = vpop.f32.mrb[56].mxu1 }
 0x24f   : > { %5804 = vst [vmem:[#allocation38_spill] sm:$0xff] %v4556_v31  ;;  %v4558_v37 = vpop.f32.mrb[57].mxu1 }
 0x250   : > { %5805 = vst [vmem:[#allocation39_spill] sm:$0xff] %v4558_v37  ;;  %v4560_v48 = vpop.f32.mrb[58].mxu1  ;;  %v1296_v51 = vmax.f32 %v4556_v31, %v4558_v37  ;;  %v4591_v31 = vld [vmem:[#allocation3 + $0x8] sm:$0xff] }
 0x251   : > { %5806 = vst [vmem:[#allocation40_spill] sm:$0xff] %v4560_v48  ;;  %v4564_v63 = vpop.f32.mrb[59].mxu1 }
 0x252   : > { %5807 = vst [vmem:[#allocation41_spill] sm:$0xff] %v4564_v63  ;;  %v1299_v5 = vmax.f32 %v4560_v48, %v4564_v63  ;;  %1297 = vmax.xlane.f32.xlu0 %v1296_v51  ;;  %v3827_v51 = vld [vmem:[%s4251_s13 + $0x48] sm:$0xff]  }
 0x253   : > { %3526 = vmatprep.subr.bf16.mxu0 %v3827_v51  ;;  %v3831_v51 = vld [vmem:[%s4251_s13 + $0x58] sm:$0xff]  }
 0x254   : > { %1300 = vmax.xlane.f32.xlu1 %v1299_v5  ;;  %v3828_v5 = vld [vmem:[%s4251_s13 + $0x8] sm:$0xff]  }
 0x255   : > { %3527 = vmatpush3.bf16.msra.mxu0 %v3828_v5 }
 0x256   : > { %v4568_v18 = vpop.f32.mrb[60].mxu1  ;;  %3528 = vmatprep.subr.bf16.mxu0 %v3829_v41  ;;  %v4603_v41 = vld [vmem:[#allocation3 + $0x10] sm:$0xff] }
 0x257   : > { %5808 = vst [vmem:[#allocation42_spill] sm:$0xff] %v4568_v18  ;;  %v4570_v24 = vpop.f32.mrb[61].mxu1 }
 0x258   : > { %5809 = vst [vmem:[#allocation43_spill] sm:$0xff] %v4570_v24  ;;  %v4572_v12 = vpop.f32.mrb[62].mxu1 }
 0x259   : > { %5810 = vst [vmem:[#allocation44_spill] sm:$0xff] %v4572_v12  ;;  %v4576_v37 = vpop.f32.mrb[63].mxu1  ;;  %3529 = vmatpush3.bf16.msra.mxu0 %v3830_v10  ;;  %v3835_v10 = vld [vmem:[%s4251_s13 + $0x68] sm:$0xff]  }
 0x25a   : > { %5811 = vst [vmem:[#allocation45_spill] sm:$0xff] %v4576_v37  ;;  %3530 = vmatprep.subr.bf16.mxu0 %v3831_v51  ;;  %v4634_v51 = vld [vmem:[#allocation3 + $0x28] sm:$0xff] }
 0x25b   : > { %5812 = vst [vmem:[#allocation46_spill] sm:$0xff] %v4634_v51 }
 0x26f   : > { %v1214_v63 = vpop.xlane.xlu0 %1213 }
 0x270   : > { %v4589_v48 = vmax.f32 %v4584_v43, %v1214_v63  ;;  %v3832_v63 = vld [vmem:[%s4251_s13 + $0x18] sm:$0xff]  }
 0x271   : > { %3531 = vmatpush3.bf16.msra.mxu0 %v3832_v63 }
 0x272   : > { %2590 = vst.msk [vmem:[#allocation3] sm:$0xff] %vm714_vm0, %v4589_v48  ;;  %1438 = vperm.xlu0 %3799, %v4589_v48   ;;  %3532 = vmatprep.subr.bf16.mxu0 %v3833_v9 }
 0x273   : > { %v1217_v57 = vpop.xlane.xlu0 %1216 }
 0x274   : > { %v4600_v5 = vmax.f32 %v4591_v31, %v1217_v57 }
 0x275   : > { %3533 = vmatpush3.bf16.msra.mxu0 %v3834_v25 }
 0x276   : > { %2591 = vst.msk [vmem:[#allocation3 + $0x8] sm:$0xff] %vm714_vm0, %v4600_v5  ;;  %1443 = vperm.xlu1 %3800, %v4600_v5   ;;  %3534 = vmatprep.subr.bf16.mxu0 %v3835_v10 }
 0x277   : > { %v1220_v55 = vpop.xlane.xlu1 %1219 }
 0x278   : > { %v4612_v57 = vmax.f32 %v4603_v41, %v1220_v55 }
 0x279   : > { %3535 = vmatpush3.bf16.msra.mxu0 %v3836_v16  ;;  %v3839_v16 = vld [vmem:[%s4251_s13 + $0x78] sm:$0xff]  }
 0x27a   : > { %2592 = vst.msk [vmem:[#allocation3 + $0x10] sm:$0xff] %vm714_vm0, %v4612_v57  ;;  %1448 = vperm.xlu1 %3800, %v4612_v57  }
 0x27b   : > { %v1223_v63 = vpop.xlane.xlu1 %1222 }
 0x27c   : > { %v4624_v55 = vmax.f32 %v4615_v22, %v1223_v63  ;;  %v3837_v63 = vld [vmem:[%s4251_s13 + $0x70] sm:$0xff]  }
 0x27d   : > { %3536 = vmatprep.subr.bf16.mxu0 %v3837_v63  ;;  %v3840_v63 = vld [vmem:[%s4251_s13 + $0x38] sm:$0xff]  }
 0x27e   : > { %2593 = vst.msk [vmem:[#allocation3 + $0x18] sm:$0xff] %vm714_vm0, %v4624_v55  ;;  %1453 = vperm.xlu1 %3800, %v4624_v55   ;;  %3537 = vmatpush3.bf16.msra.mxu0 %v3838_v3 }
 0x27f   : > { %v1226_v25 = vpop.xlane.xlu0 %1225  ;;  %3538 = vmatprep.subr.bf16.mxu0 %v3839_v16 }
 0x280   : > { %v4638_v21 = vmax.f32 %v4627_v23, %v1226_v25  ;;  %v4678_v25 = vld [vmem:[#allocation3 + $0x48] sm:$0xff] }
 0x281   : > { %v1229_v10 = vpop.xlane.xlu1 %1228 }
 0x282   : > { %2594 = vst.msk [vmem:[#allocation3 + $0x20] sm:$0xff] %vm714_vm0, %v4638_v21  ;;  %v4646_v61 = vmax.f32 %v4634_v51, %v1229_v10  ;;  %1458 = vperm.xlu0 %3799, %v4638_v21   ;;  %3539 = vmatpush3.bf16.msra.mxu0 %v3840_v63  ;;  %v4658_v10 = vld [vmem:[#allocation3 + $0x38] sm:$0xff] }
 0x283   : > { %5815 = vst [vmem:[#allocation49_spill] sm:$0xff] %v4658_v10 }
 0x284   : > { %5813 = vst [vmem:[#allocation47_spill] sm:$0xff] %v4646_v61  ;;  %2595 = vst.msk [vmem:[#allocation3 + $0x28] sm:$0xff] %vm714_vm0, %v4646_v61 }
 0x286   : > { %1463 = vperm.xlu0 %3799, %v4646_v61  }
 0x287   : > { %v1232_v9 = vpop.xlane.xlu0 %1231 }
 0x288   : > { %v4661_v19 = vmax.f32 %v4655_v20, %v1232_v9  ;;  %v4675_v9 = vld [vmem:[#allocation3 + $0x40] sm:$0xff] }
 0x289   : > { %v1235_v3 = vpop.xlane.xlu1 %1234 }
 0x28a   : > { %5816 = vst [vmem:[#allocation50_spill] sm:$0xff] %v4661_v19  ;;  %2596 = vst.msk [vmem:[#allocation3 + $0x30] sm:$0xff] %vm714_vm0, %v4661_v19  ;;  %v4668_v51 = vmax.f32 %v4658_v10, %v1235_v3  ;;  %1468 = vperm.xlu1 %3800, %v4661_v19   ;;  %v4698_v19 = vld [vmem:[#allocation3 + $0x58] sm:$0xff] }
 0x28c   : > { %5817 = vst [vmem:[#allocation51_spill] sm:$0xff] %v4668_v51  ;;  %2597 = vst.msk [vmem:[#allocation3 + $0x38] sm:$0xff] %vm714_vm0, %v4668_v51 }
 0x28e   : > { %1473 = vperm.xlu1 %3800, %v4668_v51  }
 0x28f   : > { %v1238_v63 = vpop.xlane.xlu0 %1237 }
 0x290   : > { %v4681_v20 = vmax.f32 %v4675_v9, %v1238_v63  ;;  %v4695_v63 = vld [vmem:[#allocation3 + $0x50] sm:$0xff] }
 0x291   : > { %v1241_v3 = vpop.xlane.xlu1 %1240 }
 0x292   : > { %2598 = vst.msk [vmem:[#allocation3 + $0x40] sm:$0xff] %vm714_vm0, %v4681_v20  ;;  %v4688_v16 = vmax.f32 %v4678_v25, %v1241_v3  ;;  %1478 = vperm.xlu0 %3799, %v4681_v20  }
 0x294   : > { %2599 = vst.msk [vmem:[#allocation3 + $0x48] sm:$0xff] %vm714_vm0, %v4688_v16 }
 0x296   : > { %1483 = vperm.xlu0 %3799, %v4688_v16  }
 0x297   : > { %v1244_v10 = vpop.xlane.xlu0 %1243 }
 0x298   : > { %v4701_v61 = vmax.f32 %v4695_v63, %v1244_v10  ;;  %v4715_v10 = vld [vmem:[#allocation3 + $0x60] sm:$0xff] }
 0x299   : > { %v1247_v3 = vpop.xlane.xlu1 %1246 }
 0x29a   : > { %2600 = vst.msk [vmem:[#allocation3 + $0x50] sm:$0xff] %vm714_vm0, %v4701_v61  ;;  %v4708_v51 = vmax.f32 %v4698_v19, %v1247_v3  ;;  %1488 = vperm.xlu1 %3800, %v4701_v61  }
 0x29c   : > { %2601 = vst.msk [vmem:[#allocation3 + $0x58] sm:$0xff] %vm714_vm0, %v4708_v51 }
 0x29e   : > { %1493 = vperm.xlu1 %3800, %v4708_v51  }
 0x29f   : > { %v1250_v17 = vpop.xlane.xlu0 %1249 }
 0x2a0   : > { %v4721_v15 = vmax.f32 %v4715_v10, %v1250_v17 }
 0x2a1   : > { %v1253_v3 = vpop.xlane.xlu1 %1252 }
 0x2a2   : > { %2602 = vst.msk [vmem:[#allocation3 + $0x60] sm:$0xff] %vm714_vm0, %v4721_v15  ;;  %v4728_v44 = vmax.f32 %v4718_v50, %v1253_v3 }
 0x2a4   : > { %2603 = vst.msk [vmem:[#allocation3 + $0x68] sm:$0xff] %vm714_vm0, %v4728_v44 }
 0x2a7   : > { %v1256_v17 = vpop.xlane.xlu0 %1255 }
 0x2a8   : > { %v4739_v14 = vmax.f32 %v4734_v11, %v1256_v17 }
 0x2a9   : > { %v1259_v35 = vpop.xlane.xlu1 %1258 }
 0x2aa   : > { %5820 = vst [vmem:[#allocation54_spill] sm:$0xff] %v4739_v14  ;;  %2604 = vst.msk [vmem:[#allocation3 + $0x70] sm:$0xff] %vm714_vm0, %v4739_v14  ;;  %v4746_v3 = vmax.f32 %v4736_v8, %v1259_v35 }
 0x2ac   : > { %2605 = vst.msk [vmem:[#allocation3 + $0x78] sm:$0xff] %vm714_vm0, %v4746_v3 }
 0x2af   : > { %v1262_v17 = vpop.xlane.xlu0 %1261 }
 0x2b0   : > { %v4757_v4 = vmax.f32 %v4752_v7, %v1262_v17  ;;  %v5824_v17 = vmax.f32 %v4572_v12, %v4576_v37  ;;  %v4791_v37 = vld [vmem:[#allocation3 + $0xa0] sm:$0xff]  ;;  %v4793_v12 = vld [vmem:[#allocation3 + $0xa8] sm:$0xff] }
 0x2b1   : > { %v1265_v13 = vpop.xlane.xlu1 %1264  ;;  %5827 = vst [vmem:[#allocation60_spill] sm:$0xff] %v4791_v37  ;;  %5828 = vst [vmem:[#allocation61_spill] sm:$0xff] %v4793_v12 }
 0x2b2   : > { %5823 = vst [vmem:[#allocation57_spill] sm:$0xff] %v4757_v4  ;;  %2606 = vst.msk [vmem:[#allocation3 + $0x80] sm:$0xff] %vm714_vm0, %v4757_v4  ;;  %v4764_v35 = vmax.f32 %v4754_v6, %v1265_v13 }
 0x2b4   : > { %2607 = vst.msk [vmem:[#allocation3 + $0x88] sm:$0xff] %vm714_vm0, %v4764_v35 }
 0x2b5   : > { %1306 = vmax.xlane.f32.xlu0 %v5824_v17 }
 0x2b7   : > { %v1268_v0 = vpop.xlane.xlu0 %1267 }
 0x2b8   : > { %v4778_v7 = vmax.f32 %v4773_v1, %v1268_v0  ;;  %v5829_v1 = vmax.f32 %v4568_v18, %v4570_v24  ;;  %v4814_v24 = vld [vmem:[#allocation3 + $0xb8] sm:$0xff]  ;;  %v4834_v18 = vld [vmem:[#allocation3 + $0xc8] sm:$0xff] }
 0x2b9   : > { %v1271_v13 = vpop.xlane.xlu1 %1270  ;;  %5832 = vst [vmem:[#allocation64_spill] sm:$0xff] %v4814_v24  ;;  %5836 = vst [vmem:[#allocation68_spill] sm:$0xff] %v4834_v18 }
 0x2ba   : > { %2608 = vst.msk [vmem:[#allocation3 + $0x90] sm:$0xff] %vm714_vm0, %v4778_v7  ;;  %v4785_v29 = vmax.f32 %v4775_v2, %v1271_v13 }
 0x2bc   : > { %2609 = vst.msk [vmem:[#allocation3 + $0x98] sm:$0xff] %vm714_vm0, %v4785_v29 }
 0x2bf   : > { %v1274_v0 = vpop.xlane.xlu1 %1273 }
 0x2c0   : > { %v4796_v6 = vmax.f32 %v4791_v37, %v1274_v0  ;;  %v4812_v0 = vld [vmem:[#allocation3 + $0xb0] sm:$0xff] }
 0x2c1   : > { %v1277_v8 = vpop.xlane.xlu0 %1276  ;;  %5831 = vst [vmem:[#allocation63_spill] sm:$0xff] %v4812_v0 }
 0x2c2   : > { %1303 = vmax.xlane.f32.xlu1 %v5829_v1  ;;  %2610 = vst.msk [vmem:[#allocation3 + $0xa0] sm:$0xff] %vm714_vm0, %v4796_v6  ;;  %v4806_v17 = vmax.f32 %v4793_v12, %v1277_v8 }
 0x2c4   : > { %5830 = vst [vmem:[#allocation62_spill] sm:$0xff] %v4806_v17  ;;  %2611 = vst.msk [vmem:[#allocation3 + $0xa8] sm:$0xff] %vm714_vm0, %v4806_v17 }
 0x2c7   : > { %v1280_v11 = vpop.xlane.xlu1 %1279 }
 0x2c8   : > { %v4817_v1 = vmax.f32 %v4812_v0, %v1280_v11  ;;  %v4831_v11 = vld [vmem:[#allocation3 + $0xc0] sm:$0xff] }
 0x2c9   : > { %v1283_v13 = vpop.xlane.xlu0 %1282  ;;  %5835 = vst [vmem:[#allocation67_spill] sm:$0xff] %v4831_v11 }
 0x2ca   : > { %5833 = vst [vmem:[#allocation65_spill] sm:$0xff] %v4817_v1  ;;  %2612 = vst.msk [vmem:[#allocation3 + $0xb0] sm:$0xff] %vm714_vm0, %v4817_v1  ;;  %v4824_v8 = vmax.f32 %v4814_v24, %v1283_v13 }
 0x2cb   : > { %1498 = vperm.xlu0 %3799, %v4721_v15  }
 0x2cc   : > { %5834 = vst [vmem:[#allocation66_spill] sm:$0xff] %v4824_v8  ;;  %2613 = vst.msk [vmem:[#allocation3 + $0xb8] sm:$0xff] %vm714_vm0, %v4824_v8 }
 0x2cf   : > { %1503 = vperm.xlu0 %3799, %v4728_v44   ;;  %v1286_v12 = vpop.xlane.xlu0 %1285 }
 0x2d0   : > { %v4837_v0 = vmax.f32 %v4831_v11, %v1286_v12  ;;  %v4852_v12 = vld [vmem:[#allocation3 + $0xd0] sm:$0xff]  ;;  %v4856_v11 = vld [vmem:[#allocation3 + $0xd8] sm:$0xff] }
 0x2d1   : > { %v1289_v13 = vpop.xlane.xlu1 %1288  ;;  %5839 = vst [vmem:[#allocation71_spill] sm:$0xff] %v4852_v12  ;;  %5840 = vst [vmem:[#allocation72_spill] sm:$0xff] %v4856_v11 }
 0x2d2   : > { %5837 = vst [vmem:[#allocation69_spill] sm:$0xff] %v4837_v0  ;;  %2614 = vst.msk [vmem:[#allocation3 + $0xc0] sm:$0xff] %vm714_vm0, %v4837_v0  ;;  %v4844_v2 = vmax.f32 %v4834_v18, %v1289_v13 }
 0x2d3   : > { %1518 = vperm.xlu1 %3800, %v4757_v4   ;;  %1508 = vperm.xlu0 %3799, %v4739_v14   ;;  %v4878_v14 = vld [vmem:[#allocation3 + $0xe8] sm:$0xff] }
 0x2d4   : > { %5838 = vst [vmem:[#allocation70_spill] sm:$0xff] %v4844_v2  ;;  %2615 = vst.msk [vmem:[#allocation3 + $0xc8] sm:$0xff] %vm714_vm0, %v4844_v2 }
 0x2d5   : > { %5843 = vst [vmem:[#allocation75_spill] sm:$0xff] %v4878_v14 }
 0x2d7   : > { %1543 = vperm.xlu1 %3800, %v4806_v17   ;;  %1513 = vperm.xlu0 %3799, %v4746_v3   ;;  %v1292_v37 = vpop.xlane.xlu1 %1291 }
 0x2d8   : > { %v4859_v13 = vmax.f32 %v4852_v12, %v1292_v37  ;;  %v4874_v37 = vld [vmem:[#allocation3 + $0xe0] sm:$0xff] }
 0x2d9   : > { %v1295_v4 = vpop.xlane.xlu0 %1294  ;;  %5842 = vst [vmem:[#allocation74_spill] sm:$0xff] %v4874_v37 }
 0x2da   : > { %2616 = vst.msk [vmem:[#allocation3 + $0xd0] sm:$0xff] %vm714_vm0, %v4859_v13  ;;  %v4866_v24 = vmax.f32 %v4856_v11, %v1295_v4 }
 0x2db   : > { %1553 = vperm.xlu1 %3800, %v4824_v8   ;;  %1523 = vperm.xlu0 %3799, %v4764_v35  }
 0x2dc   : > { %5841 = vst [vmem:[#allocation73_spill] sm:$0xff] %v4866_v24  ;;  %2617 = vst.msk [vmem:[#allocation3 + $0xd8] sm:$0xff] %vm714_vm0, %v4866_v24 }
 0x2df   : > { %1563 = vperm.xlu1 %3800, %v4844_v2   ;;  %1528 = vperm.xlu0 %3799, %v4778_v7   ;;  %v1298_v4 = vpop.xlane.xlu0 %1297 }
 0x2e0   : > { %v4881_v12 = vmax.f32 %v4874_v37, %v1298_v4 }
 0x2e1   : > { %v1301_v8 = vpop.xlane.xlu1 %1300 }
 0x2e2   : > { %v4884_v17 = vmax.f32 %v4878_v14, %v1301_v8  ;;  %2618 = vst.msk [vmem:[#allocation3 + $0xe0] sm:$0xff] %vm714_vm0, %v4881_v12 }
 0x2e3   : > { %1573 = vperm.xlu1 %3800, %v4866_v24   ;;  %1533 = vperm.xlu0 %3799, %v4785_v29  }
 0x2e4   : > { %5844 = vst [vmem:[#allocation76_spill] sm:$0xff] %v4884_v17  ;;  %2619 = vst.msk [vmem:[#allocation3 + $0xe8] sm:$0xff] %vm714_vm0, %v4884_v17 }
 0x2e7   : > { %1583 = vperm.xlu1 %3800, %v4884_v17   ;;  %1538 = vperm.xlu0 %3799, %v4796_v6  }
 0x2eb   : > { %1548 = vperm.xlu0 %3799, %v4817_v1  }
 0x2ef   : > { %1558 = vperm.xlu0 %3799, %v4837_v0  }
 0x2f1   : > { %v1439_v8 = vpop.permute.xlu0 %1438 }
 0x2f2   : > { %v1596_v4 = vsub.f32 %v4356_v26, %v1439_v8  ;;  %v1597_v18 = vsub.f32 %v4358_v27, %v1439_v8 }
 0x2f3   : > { %1568 = vperm.xlu0 %3799, %v4859_v13  }
 0x2f4   : > { %v1660_v37 = vmul.f32 1.442695, %v1596_v4  ;;  %v1662_v11 = vmul.f32 1.442695, %v1597_v18 }
 0x2f5   : > { %v1444_v14 = vpop.permute.xlu1 %1443 }
 0x2f6   : > { %3849 = vpow2.f32 %v1660_v37  ;;  %v1598_v24 = vsub.f32 %v4360_v28, %v1444_v14  ;;  %v1599_v17 = vsub.f32 %v4364_v30, %v1444_v14 }
 0x2f7   : > { %3851 = vpow2.f32 %v1662_v11  ;;  %1578 = vperm.xlu0 %3799, %v4881_v12  }
 0x2f8   : > { %v1664_v2 = vmul.f32 1.442695, %v1598_v24  ;;  %v1666_v0 = vmul.f32 1.442695, %v1599_v17 }
 0x2f9   : > { %v1449_v1 = vpop.permute.xlu1 %1448 }
 0x2fa   : > { %3853 = vpow2.f32 %v1664_v2  ;;  %v1600_v26 = vsub.f32 %v4368_v32, %v1449_v1  ;;  %v1601_v27 = vsub.f32 %v4370_v33, %v1449_v1 }
 0x2fb   : > { %3855 = vpow2.f32 %v1666_v0 }
 0x2fc   : > { %v1668_v8 = vmul.f32 1.442695, %v1600_v26  ;;  %v1670_v18 = vmul.f32 1.442695, %v1601_v27 }
 0x2fd   : > { %v1454_v4 = vpop.permute.xlu1 %1453 }
 0x2fe   : > { %3857 = vpow2.f32 %v1668_v8  ;;  %v1602_v28 = vsub.f32 %v4372_v34, %v1454_v4  ;;  %v1603_v30 = vsub.f32 %v4376_v36, %v1454_v4 }
 0x2ff   : > { %3859 = vpow2.f32 %v1670_v18 }
 0x300   : > { %v3850_v14 = vpop.eup %3849  ;;  %v1672_v11 = vmul.f32 1.442695, %v1602_v28  ;;  %v1674_v24 = vmul.f32 1.442695, %v1603_v30 }
 0x301   : > { %v3852_v17 = vpop.eup %3851  ;;  %v1459_v37 = vpop.permute.xlu0 %1458 }
 0x302   : > { %3861 = vpow2.f32 %v1672_v11  ;;  %v1604_v32 = vsub.f32 %v4380_v38, %v1459_v37  ;;  %v1605_v33 = vsub.f32 %v4382_v39, %v1459_v37  ;;  %v4912_v2 = vadd.f32 %v3852_v17, %v3850_v14 }
 0x303   : > { %3863 = vpow2.f32 %v1674_v24 }
 0x304   : > { %v3854_v0 = vpop.eup %3853  ;;  %v1676_v1 = vmul.f32 1.442695, %v1604_v32  ;;  %v1678_v26 = vmul.f32 1.442695, %v1605_v33 }
 0x305   : > { %v3856_v34 = vpop.eup %3855  ;;  %v1464_v27 = vpop.permute.xlu0 %1463  ;;  %v2237_v36 = vpack.c.bf16 %v3854_v0, %v3850_v14 }
 0x306   : > { %3865 = vpow2.f32 %v1676_v1  ;;  %v1606_v8 = vsub.f32 %v4384_v40, %v1464_v27  ;;  %v1607_v18 = vsub.f32 %v4388_v42, %v1464_v27  ;;  %v2238_v4 = vpack.c.bf16 %v3856_v34, %v3852_v17 }
 0x307   : > { %3867 = vpow2.f32 %v1678_v26  ;;  %v4916_v28 = vadd.f32 %v3856_v34, %v3854_v0 }
 0x308   : > { %v3858_v38 = vpop.eup %3857  ;;  %v1680_v39 = vmul.f32 1.442695, %v1606_v8  ;;  %v1682_v30 = vmul.f32 1.442695, %v1607_v18  ;;  %2397 = vmatprep.mubr.bf16.mxu0 %v2238_v4 }
 0x309   : > { %v3860_v11 = vpop.eup %3859  ;;  %2398 = vmatmul.mubr.bf16.vlgmr.msra.gmra.mrb[32].mxu0 %v2237_v36  ;;  %v1469_v24 = vpop.permute.xlu1 %1468 }
 0x30a   : > { %3869 = vpow2.f32 %v1680_v39  ;;  %v1608_v37 = vsub.f32 %v4392_v45, %v1469_v24  ;;  %v1609_v14 = vsub.f32 %v4394_v46, %v1469_v24  ;;  %v4920_v32 = vadd.f32 %v3860_v11, %v3858_v38 }
 0x30b   : > { %3871 = vpow2.f32 %v1682_v30 }
 0x30c   : > { %v3862_v40 = vpop.eup %3861  ;;  %v1684_v42 = vmul.f32 1.442695, %v1608_v37  ;;  %v1686_v17 = vmul.f32 1.442695, %v1609_v14 }
 0x30d   : > { %v3864_v33 = vpop.eup %3863  ;;  %v1474_v0 = vpop.permute.xlu1 %1473  ;;  %v2239_v1 = vpack.c.bf16 %v3862_v40, %v3858_v38 }
 0x30e   : > { %3873 = vpow2.f32 %v1684_v42  ;;  %v1610_v26 = vsub.f32 %v4396_v47, %v1474_v0  ;;  %v1611_v34 = vsub.f32 %v4400_v49, %v1474_v0  ;;  %v2240_v27 = vpack.c.bf16 %v3864_v33, %v3860_v11 }
 0x30f   : > { %3875 = vpow2.f32 %v1686_v17  ;;  %v4924_v36 = vadd.f32 %v3864_v33, %v3862_v40 }
 0x310   : > { %v3866_v45 = vpop.eup %3865  ;;  %v1688_v46 = vmul.f32 1.442695, %v1610_v26  ;;  %v1690_v8 = vmul.f32 1.442695, %v1611_v34  ;;  %2405 = vmatprep.mubr.bf16.mxu0 %v2240_v27 }
 0x311   : > { %v3868_v18 = vpop.eup %3867  ;;  %2406 = vmatmul.mubr.bf16.gmra.mrb[36].mxu0 %v2239_v1  ;;  %v1479_v4 = vpop.permute.xlu0 %1478 }
 0x312   : > { %3877 = vpow2.f32 %v1688_v46  ;;  %v1612_v39 = vsub.f32 %v4436_v52, %v1479_v4  ;;  %v1613_v38 = vsub.f32 %v4438_v53, %v1479_v4  ;;  %v4928_v30 = vadd.f32 %v3868_v18, %v3866_v45 }
 0x313   : > { %3879 = vpow2.f32 %v1690_v8 }
 0x314   : > { %v3870_v47 = vpop.eup %3869  ;;  %v1692_v49 = vmul.f32 1.442695, %v1612_v39  ;;  %v1694_v11 = vmul.f32 1.442695, %v1613_v38 }
 0x315   : > { %v3872_v24 = vpop.eup %3871  ;;  %v1484_v37 = vpop.permute.xlu0 %1483  ;;  %v2241_v14 = vpack.c.bf16 %v3870_v47, %v3866_v45 }
 0x316   : > { %3881 = vpow2.f32 %v1692_v49  ;;  %v1614_v40 = vsub.f32 %v4440_v54, %v1484_v37  ;;  %v1615_v42 = vsub.f32 %v4444_v56, %v1484_v37  ;;  %v2242_v17 = vpack.c.bf16 %v3872_v24, %v3868_v18 }
 0x317   : > { %3883 = vpow2.f32 %v1694_v11  ;;  %v4932_v33 = vadd.f32 %v3872_v24, %v3870_v47 }
 0x318   : > { %v3874_v52 = vpop.eup %3873  ;;  %v1696_v53 = vmul.f32 1.442695, %v1614_v40  ;;  %v1698_v0 = vmul.f32 1.442695, %v1615_v42  ;;  %2413 = vmatprep.mubr.bf16.mxu0 %v2242_v17 }
 0x319   : > { %v3876_v1 = vpop.eup %3875  ;;  %2414 = vmatmul.mubr.bf16.gmra.mrb[40].mxu0 %v2241_v14  ;;  %v1489_v26 = vpop.permute.xlu1 %1488 }
 0x31a   : > { %3885 = vpow2.f32 %v1696_v53  ;;  %v1616_v34 = vsub.f32 %v4448_v58, %v1489_v26  ;;  %v1617_v27 = vsub.f32 %v4450_v59, %v1489_v26  ;;  %v4936_v45 = vadd.f32 %v3876_v1, %v3874_v52 }
 0x31b   : > { %3887 = vpow2.f32 %v1698_v0 }
 0x31c   : > { %v3878_v54 = vpop.eup %3877  ;;  %v1700_v56 = vmul.f32 1.442695, %v1616_v34  ;;  %v1702_v46 = vmul.f32 1.442695, %v1617_v27 }
 0x31d   : > { %v3880_v8 = vpop.eup %3879  ;;  %v1494_v18 = vpop.permute.xlu1 %1493  ;;  %v2243_v4 = vpack.c.bf16 %v3878_v54, %v3874_v52 }
 0x31e   : > { %3889 = vpow2.f32 %v1700_v56  ;;  %v1618_v39 = vsub.f32 %v4452_v60, %v1494_v18  ;;  %v1619_v38 = vsub.f32 %v4456_v62, %v1494_v18  ;;  %v2244_v47 = vpack.c.bf16 %v3880_v8, %v3876_v1 }
 0x31f   : > { %3891 = vpow2.f32 %v1702_v46  ;;  %v4940_v49 = vadd.f32 %v3880_v8, %v3878_v54  ;;  %v5845_v54 = vsub.f32 %v4584_v43, %v4589_v48  ;;  %v5846_v46 = vsub.f32 %v4591_v31, %v4600_v5 }
 0x320   : > { %v3882_v58 = vpop.eup %3881  ;;  %v1704_v59 = vmul.f32 1.442695, %v1618_v39  ;;  %v1706_v11 = vmul.f32 1.442695, %v1619_v38  ;;  %2421 = vmatprep.mubr.bf16.mxu0 %v2244_v47  ;;  %v5847_v18 = vsub.f32 %v4603_v41, %v4612_v57  ;;  %v5848_v39 = vsub.f32 %v4675_v9, %v4681_v20  ;;  %v5857_v9 = vld [vmem:[#allocation54_spill] sm:$0xff] }
 0x321   : > { %v3884_v24 = vpop.eup %3883  ;;  %2422 = vmatmul.mubr.bf16.gmra.mrb[44].mxu0 %v2243_v4  ;;  %v1372_v56 = vmul.f32 1.442695, %v5845_v54  ;;  %v1374_v8 = vmul.f32 1.442695, %v5846_v46  ;;  %v5849_v47 = vsub.f32 %v4615_v22, %v4624_v55  ;;  %v5850_v43 = vsub.f32 %v4627_v23, %v4638_v21  ;;  %v4980_v55 = vld [vmem:[#allocation3 + $0xf8] sm:$0xff] }
 0x322   : > { %3893 = vpow2.f32 %v1704_v59  ;;  %v4942_v37 = vadd.f32 %v3884_v24, %v3882_v58  ;;  %v1376_v4 = vmul.f32 1.442695, %v5847_v18  ;;  %v1388_v38 = vmul.f32 1.442695, %v5848_v39 }
 0x323   : > { %3895 = vpow2.f32 %v1706_v11  ;;  %v1380_v48 = vmul.f32 1.442695, %v5850_v43  ;;  %v5851_v31 = vsub.f32 %v4678_v25, %v4688_v16  ;;  %v5852_v20 = vsub.f32 %v4695_v63, %v4701_v61  ;;  %v5856_v61 = vld [vmem:[#allocation52_spill] sm:$0xff] }
 0x324   : > { %v3886_v14 = vpop.eup %3885  ;;  %3897 = vpow2.f32 %v1372_v56  ;;  %v5853_v22 = vsub.f32 %v4698_v19, %v4708_v51  ;;  %v5854_v21 = vsub.f32 %v4715_v10, %v4721_v15  ;;  %v5855_v25 = vsub.f32 %v4718_v50, %v4728_v44  ;;  %v5859_v19 = vld [vmem:[#allocation53_spill] sm:$0xff]  ;;  %v5861_v10 = vld [vmem:[#allocation55_spill] sm:$0xff] }
 0x325   : > { %v3888_v40 = vpop.eup %3887  ;;  %v2245_v42 = vpack.c.bf16 %v3886_v14, %v3882_v58  ;;  %v1378_v58 = vmul.f32 1.442695, %v5849_v47  ;;  %3899 = vpow2.f32 %v1374_v8  ;;  %v1390_v5 = vmul.f32 1.442695, %v5851_v31  ;;  %v5871_v8 = vld [vmem:[#allocation60_spill] sm:$0xff] }
 0x326   : > { %v2246_v60 = vpack.c.bf16 %v3888_v40, %v3884_v24  ;;  %v4944_v17 = vadd.f32 %v3888_v40, %v3886_v14  ;;  %3901 = vpow2.f32 %v1376_v4  ;;  %v1392_v41 = vmul.f32 1.442695, %v5852_v20  ;;  %v5862_v14 = vld [vmem:[#allocation57_spill] sm:$0xff] }
 0x327   : > { %3903 = vpow2.f32 %v1388_v38  ;;  %v1394_v57 = vmul.f32 1.442695, %v5853_v22  ;;  %v1396_v23 = vmul.f32 1.442695, %v5854_v21  ;;  %v1398_v16 = vmul.f32 1.442695, %v5855_v25 }
 0x328   : > { %v3890_v62 = vpop.eup %3889  ;;  %2429 = vmatprep.mubr.bf16.mxu0 %v2246_v60  ;;  %3905 = vpow2.f32 %v1378_v58  ;;  %v5858_v63 = vsub.f32 %v5856_v61, %v5857_v9  ;;  %v5860_v51 = vsub.f32 %v5859_v19, %v4746_v3  ;;  %v5863_v40 = vsub.f32 %v5861_v10, %v5862_v14  ;;  %v5874_v38 = vld [vmem:[#allocation61_spill] sm:$0xff]  ;;  %v5884_v25 = vld [vmem:[#allocation64_spill] sm:$0xff] }
 0x329   : > { %v3892_v52 = vpop.eup %3891  ;;  %2430 = vmatmul.mubr.bf16.gmra.mrb[48].mxu0 %v2245_v42  ;;  %3907 = vpow2.f32 %v1380_v48  ;;  %v5864_v42 = vld [vmem:[#allocation56_spill] sm:$0xff]  ;;  %v5872_v18 = vsub.f32 %v5871_v8, %v4796_v6  ;;  %v5878_v48 = vld [vmem:[#allocation65_spill] sm:$0xff]  ;;  %v5881_v6 = vld [vmem:[#allocation6_spill] sm:$0xff] }
 0x32a   : > { %v4946_v53 = vadd.f32 %v3892_v52, %v3890_v62  ;;  %3909 = vpow2.f32 %v1390_v5  ;;  %v1400_v59 = vmul.f32 1.442695, %v5858_v63  ;;  %v1402_v24 = vmul.f32 1.442695, %v5860_v51  ;;  %v5045_v19 = vld [vmem:[#allocation3 + $0xf0] sm:$0xff]  ;;  %v5890_v10 = vld [vmem:[#allocation69_spill] sm:$0xff] }
 0x32b   : > { %3911 = vpow2.f32 %v1392_v41  ;;  %v1404_v44 = vmul.f32 1.442695, %v5863_v40  ;;  %v5865_v60 = vsub.f32 %v5864_v42, %v4764_v35  ;;  %v5868_v35 = vld [vmem:[#allocation59_spill] sm:$0xff]  ;;  %v1412_v4 = vmul.f32 1.442695, %v5872_v18  ;;  %v5897_v8 = vld [vmem:[#allocation68_spill] sm:$0xff] }
 0x32c   : > { %v3894_v0 = vpop.eup %3893  ;;  %3913 = vpow2.f32 %v1394_v57  ;;  %v5869_v54 = vsub.f32 %v5868_v35, %v4785_v29  ;;  %v5877_v29 = vld [vmem:[#allocation63_spill] sm:$0xff]  ;;  %v5898_v18 = vld [vmem:[#allocation70_spill] sm:$0xff] }
 0x32d   : > { %v3896_v1 = vpop.eup %3895  ;;  %v2247_v26 = vpack.c.bf16 %v3894_v0, %v3890_v62  ;;  %3915 = vpow2.f32 %v1396_v23  ;;  %v1406_v62 = vmul.f32 1.442695, %v5865_v60  ;;  %v5879_v31 = vsub.f32 %v5877_v29, %v5878_v48  ;;  %v5882_v57 = vld [vmem:[#allocation7_spill] sm:$0xff]  ;;  %v5893_v60 = vld [vmem:[#allocation8_spill] sm:$0xff]  ;;  %v5902_v48 = vld [vmem:[#allocation73_spill] sm:$0xff] }
 0x32e   : > { %v2248_v34 = vpack.c.bf16 %v3896_v1, %v3892_v52  ;;  %v4948_v27 = vadd.f32 %v3896_v1, %v3894_v0  ;;  %v4997_v50 = vpop.eup %3897  ;;  %3917 = vpow2.f32 %v1398_v16  ;;  %v5866_v0 = vld [vmem:[#allocation58_spill] sm:$0xff]  ;;  %v1410_v56 = vmul.f32 1.442695, %v5869_v54  ;;  %v5901_v29 = vld [vmem:[#allocation72_spill] sm:$0xff] }
 0x32f   : > { %v5007_v3 = vpop.eup %3899  ;;  %3919 = vpow2.f32 %v1400_v59  ;;  %v5867_v1 = vsub.f32 %v5866_v0, %v4778_v7  ;;  %v5875_v7 = vld [vmem:[#allocation62_spill] sm:$0xff]  ;;  %v1416_v5 = vmul.f32 1.442695, %v5879_v31  ;;  %v5894_v0 = vld [vmem:[#allocation9_spill] sm:$0xff]  ;;  %v5903_v31 = vsub.f32 %v5901_v29, %v5902_v48  ;;  %v5916_v29 = vld [vmem:[#allocation24_spill] sm:$0xff] }
 0x330   : > { %2437 = vmatprep.mubr.bf16.mxu0 %v2248_v34  ;;  %v5012_v34 = vpop.eup %3901  ;;  %3921 = vpow2.f32 %v1402_v24  ;;  %v5876_v47 = vsub.f32 %v5874_v38, %v5875_v7  ;;  %v5885_v16 = vld [vmem:[#allocation66_spill] sm:$0xff]  ;;  %v5889_v24 = vld [vmem:[#allocation67_spill] sm:$0xff] }
 0x331   : > { %2438 = vmatmul.mubr.bf16.gmra.mrb[52].mxu0 %v2247_v26  ;;  %v1408_v26 = vmul.f32 1.442695, %v5867_v1  ;;  %v5017_v46 = vpop.eup %3903  ;;  %3923 = vpow2.f32 %v1404_v44  ;;  %v5886_v61 = vsub.f32 %v5884_v25, %v5885_v16  ;;  %v5891_v14 = vsub.f32 %v5889_v24, %v5890_v10  ;;  %v5906_v25 = vld [vmem:[#allocation11_spill] sm:$0xff] }
 0x332   : > { %5870 = vst [vmem:[#allocation52_spill] sm:$0xff] %v5017_v46  ;;  %v5022_v39 = vpop.eup %3905  ;;  %3925 = vpow2.f32 %v1406_v62  ;;  %v1414_v58 = vmul.f32 1.442695, %v5876_v47  ;;  %v5909_v24 = vld [vmem:[#allocation15_spill] sm:$0xff] }
 0x333   : > { %5873 = vst [vmem:[#allocation54_spill] sm:$0xff] %v5022_v39  ;;  %v5028_v43 = vpop.eup %3907  ;;  %3927 = vpow2.f32 %v1408_v26  ;;  %v1418_v9 = vmul.f32 1.442695, %v5886_v61  ;;  %v1420_v40 = vmul.f32 1.442695, %v5891_v14 }
 0x334   : > { %v5033_v41 = vpop.eup %3909  ;;  %3929 = vpow2.f32 %v1410_v56 }
 0x335   : > { %5880 = vst [vmem:[#allocation53_spill] sm:$0xff] %v5033_v41  ;;  %v5037_v23 = vpop.eup %3911  ;;  %3931 = vpow2.f32 %v1412_v4  ;;  %v5899_v4 = vsub.f32 %v5897_v8, %v5898_v18  ;;  %v5913_v8 = vld [vmem:[#allocation12_spill] sm:$0xff] }
 0x336   : > { %5883 = vst [vmem:[#allocation55_spill] sm:$0xff] %v5037_v23  ;;  %v5042_v63 = vpop.eup %3913  ;;  %3933 = vpow2.f32 %v1414_v58 }
 0x337   : > { %5887 = vst [vmem:[#allocation57_spill] sm:$0xff] %v5042_v63  ;;  %v5047_v51 = vpop.eup %3915  ;;  %3935 = vpow2.f32 %v1416_v5  ;;  %v1422_v38 = vmul.f32 1.442695, %v5899_v4  ;;  %v1426_v5 = vmul.f32 1.442695, %v5903_v31  ;;  %v5914_v4 = vld [vmem:[#allocation13_spill] sm:$0xff] }
 0x338   : > { %5888 = vst [vmem:[#allocation56_spill] sm:$0xff] %v5047_v51  ;;  %v5052_v42 = vpop.eup %3917  ;;  %v5917_v31 = vld [vmem:[#allocation25_spill] sm:$0xff] }
 0x339   : > { %5892 = vst [vmem:[#allocation58_spill] sm:$0xff] %v5052_v42  ;;  %v5056_v35 = vpop.eup %3919 }
 0x33a   : > { %5895 = vst [vmem:[#allocation59_spill] sm:$0xff] %v5056_v35  ;;  %v5061_v56 = vpop.eup %3921 }
 0x33b   : > { %5896 = vst [vmem:[#allocation60_spill] sm:$0xff] %v5061_v56  ;;  %v5067_v58 = vpop.eup %3923 }
 0x33c   : > { %5900 = vst [vmem:[#allocation61_spill] sm:$0xff] %v5067_v58 }
 0x342   : > { %v1307_v11 = vpop.xlane.xlu0 %1306 }
 0x343   : > { %v4992_v15 = vmax.f32 %v4980_v55, %v1307_v11 }
 0x345   : > { %2621 = vst.msk [vmem:[#allocation3 + $0xf8] sm:$0xff] %vm714_vm0, %v4992_v15  ;;  %1593 = vperm.xlu1 %3800, %v4992_v15  }
 0x349   : > { %2087 = vperm.xlu1 %3800, %v5017_v46  }
 0x34a   : > { %v1499_v20 = vpop.permute.xlu0 %1498 }
 0x34b   : > { %v1620_v22 = vsub.f32 %v5881_v6, %v1499_v20  ;;  %v1621_v21 = vsub.f32 %v5882_v57, %v1499_v20  ;;  %v5905_v57 = vld [vmem:[#allocation10_spill] sm:$0xff]  ;;  %v5926_v20 = vld [vmem:[#allocation32_spill] sm:$0xff] }
 0x34d   : > { %v1708_v59 = vmul.f32 1.442695, %v1620_v22  ;;  %v1710_v11 = vmul.f32 1.442695, %v1621_v21  ;;  %2097 = vperm.xlu1 %3800, %v5037_v23   ;;  %v5077_v22 = vpop.eup %3925 }
 0x34e   : > { %v1504_v44 = vpop.permute.xlu0 %1503  ;;  %5904 = vst [vmem:[#allocation62_spill] sm:$0xff] %v5077_v22 }
 0x34f   : > { %3937 = vpow2.f32 %v1708_v59  ;;  %v1622_v62 = vsub.f32 %v5893_v60, %v1504_v44  ;;  %v1623_v1 = vsub.f32 %v5894_v0, %v1504_v44  ;;  %v1304_v26 = vpop.xlane.xlu1 %1303  ;;  %v5908_v59 = vld [vmem:[#allocation14_spill] sm:$0xff] }
 0x350   : > { %3939 = vpow2.f32 %v1710_v11  ;;  %v5059_v54 = vmax.f32 %v5045_v19, %v1304_v26 }
 0x351   : > { %3941 = vpow2.f32 %v1418_v9  ;;  %v1712_v7 = vmul.f32 1.442695, %v1622_v62  ;;  %v1714_v47 = vmul.f32 1.442695, %v1623_v1  ;;  %2102 = vperm.xlu1 %3800, %v5042_v63   ;;  %v5081_v9 = vpop.eup %3927 }
 0x352   : > { %3943 = vpow2.f32 %v1420_v40  ;;  %2620 = vst.msk [vmem:[#allocation3 + $0xf0] sm:$0xff] %vm714_vm0, %v5059_v54  ;;  %1588 = vperm.xlu0 %3799, %v5059_v54   ;;  %v1509_v6 = vpop.permute.xlu0 %1508  ;;  %5907 = vst [vmem:[#allocation63_spill] sm:$0xff] %v5081_v9  ;;  %v5085_v14 = vpop.eup %3929 }
 0x353   : > { %3945 = vpow2.f32 %v1712_v7  ;;  %v1624_v21 = vsub.f32 %v5905_v57, %v1509_v6  ;;  %v1625_v16 = vsub.f32 %v5906_v25, %v1509_v6  ;;  %v1519_v61 = vpop.permute.xlu1 %1518  ;;  %5910 = vst [vmem:[#allocation65_spill] sm:$0xff] %v5085_v14  ;;  %v5088_v60 = vpop.eup %3931 }
 0x354   : > { %3947 = vpow2.f32 %v1714_v47  ;;  %v1628_v11 = vsub.f32 %v5908_v59, %v1519_v61  ;;  %v1629_v10 = vsub.f32 %v5909_v24, %v1519_v61  ;;  %5911 = vst [vmem:[#allocation6_spill] sm:$0xff] %v5088_v60  ;;  %v5091_v26 = vpop.eup %3933  ;;  %v5919_v24 = vld [vmem:[#allocation16_spill] sm:$0xff] }
 0x355   : > { %3949 = vpow2.f32 %v1422_v38  ;;  %v1716_v40 = vmul.f32 1.442695, %v1624_v21  ;;  %v1718_v44 = vmul.f32 1.442695, %v1625_v16  ;;  %2112 = vperm.xlu1 %3800, %v5052_v42   ;;  %5912 = vst [vmem:[#allocation7_spill] sm:$0xff] %v5091_v26  ;;  %v5095_v47 = vpop.eup %3935 }
 0x356   : > { %3951 = vpow2.f32 %v1426_v5  ;;  %v1724_v62 = vmul.f32 1.442695, %v1628_v11  ;;  %v1726_v0 = vmul.f32 1.442695, %v1629_v10  ;;  %2092 = vperm.xlu0 %3799, %v5033_v41   ;;  %v1514_v1 = vpop.permute.xlu0 %1513  ;;  %5915 = vst [vmem:[#allocation64_spill] sm:$0xff] %v5095_v47 }
 0x357   : > { %3953 = vpow2.f32 %v1716_v40  ;;  %v1626_v18 = vsub.f32 %v5913_v8, %v1514_v1  ;;  %v1627_v7 = vsub.f32 %v5914_v4, %v1514_v1  ;;  %v1544_v38 = vpop.permute.xlu1 %1543  ;;  %v5920_v40 = vld [vmem:[#allocation17_spill] sm:$0xff] }
 0x358   : > { %3955 = vpow2.f32 %v1718_v44  ;;  %v1638_v48 = vsub.f32 %v5916_v29, %v1544_v38  ;;  %v1639_v5 = vsub.f32 %v5917_v31, %v1544_v38  ;;  %v5922_v4 = vld [vmem:[#allocation29_spill] sm:$0xff] }
 0x359   : > { %v3938_v6 = vpop.eup %3937  ;;  %3957 = vpow2.f32 %v1724_v62  ;;  %v1720_v57 = vmul.f32 1.442695, %v1626_v18  ;;  %v1722_v21 = vmul.f32 1.442695, %v1627_v7  ;;  %2122 = vperm.xlu1 %3800, %v5061_v56   ;;  %v5921_v18 = vld [vmem:[#allocation28_spill] sm:$0xff] }
 0x35a   : > { %v3940_v25 = vpop.eup %3939  ;;  %3959 = vpow2.f32 %v1726_v0  ;;  %v1744_v16 = vmul.f32 1.442695, %v1638_v48  ;;  %v1746_v61 = vmul.f32 1.442695, %v1639_v5  ;;  %2107 = vperm.xlu0 %3799, %v5047_v51   ;;  %v1524_v59 = vpop.permute.xlu0 %1523 }
 0x35b   : > { %v5101_v11 = vpop.eup %3941  ;;  %3961 = vpow2.f32 %v1720_v57  ;;  %v1630_v10 = vsub.f32 %v5919_v24, %v1524_v59  ;;  %v1631_v44 = vsub.f32 %v5920_v40, %v1524_v59  ;;  %v1554_v1 = vpop.permute.xlu1 %1553  ;;  %v5105_v62 = vadd.f32 %v3940_v25, %v3938_v6 }
 0x35c   : > { %5918 = vst [vmem:[#allocation66_spill] sm:$0xff] %v5101_v11  ;;  %v5107_v8 = vpop.eup %3943  ;;  %3963 = vpow2.f32 %v1722_v21  ;;  %v1642_v0 = vsub.f32 %v5921_v18, %v1554_v1  ;;  %v1643_v7 = vsub.f32 %v5922_v4, %v1554_v1  ;;  %v5924_v21 = vld [vmem:[#allocation18_spill] sm:$0xff]  ;;  %v5925_v1 = vld [vmem:[#allocation19_spill] sm:$0xff] }
 0x35d   : > { %v3946_v38 = vpop.eup %3945  ;;  %3965 = vpow2.f32 %v1744_v16  ;;  %v1728_v29 = vmul.f32 1.442695, %v1630_v10  ;;  %v1730_v48 = vmul.f32 1.442695, %v1631_v44  ;;  %2132 = vperm.xlu1 %3800, %v5077_v22  }
 0x35e   : > { %v3948_v31 = vpop.eup %3947  ;;  %3967 = vpow2.f32 %v1746_v61  ;;  %v1752_v5 = vmul.f32 1.442695, %v1642_v0  ;;  %v1754_v57 = vmul.f32 1.442695, %v1643_v7  ;;  %2117 = vperm.xlu0 %3799, %v5056_v35   ;;  %v1529_v59 = vpop.permute.xlu0 %1528  ;;  %v2249_v24 = vpack.c.bf16 %v3946_v38, %v3938_v6  ;;  %v5927_v0 = vld [vmem:[#allocation33_spill] sm:$0xff] }
 0x35f   : > { %v5113_v40 = vpop.eup %3949  ;;  %3969 = vpow2.f32 %v1728_v29  ;;  %v1632_v18 = vsub.f32 %v5924_v21, %v1529_v59  ;;  %v1633_v4 = vsub.f32 %v5925_v1, %v1529_v59  ;;  %v1564_v16 = vpop.permute.xlu1 %1563  ;;  %v2250_v10 = vpack.c.bf16 %v3948_v31, %v3940_v25  ;;  %v5929_v21 = vld [vmem:[#allocation21_spill] sm:$0xff] }
 0x360   : > { %5923 = vst [vmem:[#allocation67_spill] sm:$0xff] %v5113_v40  ;;  %v5117_v44 = vpop.eup %3951  ;;  %3971 = vpow2.f32 %v1730_v48  ;;  %v1646_v61 = vsub.f32 %v5926_v20, %v1564_v16  ;;  %v1647_v7 = vsub.f32 %v5927_v0, %v1564_v16  ;;  %v5121_v52 = vadd.f32 %v3948_v31, %v3946_v38  ;;  %v5928_v38 = vld [vmem:[#allocation20_spill] sm:$0xff] }
 0x361   : > { %v3954_v22 = vpop.eup %3953  ;;  %3973 = vpow2.f32 %v1752_v5  ;;  %v1732_v6 = vmul.f32 1.442695, %v1632_v18  ;;  %v1734_v56 = vmul.f32 1.442695, %v1633_v4  ;;  %2445 = vmatprep.mubr.bf16.mxu0 %v2250_v10  ;;  %2142 = vperm.xlu1 %3800, %v5085_v14   ;;  %v5930_v16 = vld [vmem:[#allocation36_spill] sm:$0xff]  ;;  %v5931_v10 = vld [vmem:[#allocation37_spill] sm:$0xff] }
 0x362   : > { %v3956_v29 = vpop.eup %3955  ;;  %3975 = vpow2.f32 %v1754_v57  ;;  %v1760_v59 = vmul.f32 1.442695, %v1646_v61  ;;  %v1762_v25 = vmul.f32 1.442695, %v1647_v7  ;;  %2446 = vmatmul.mubr.bf16.gmra.mrb[56].mxu0 %v2249_v24  ;;  %2127 = vperm.xlu0 %3799, %v5067_v58   ;;  %v1534_v48 = vpop.permute.xlu0 %1533  ;;  %v5934_v58 = vld [vmem:[#allocation40_spill] sm:$0xff] }
 0x363   : > { %v5125_v20 = vpop.eup %3957  ;;  %3977 = vpow2.f32 %v1732_v6  ;;  %v1634_v31 = vsub.f32 %v5928_v38, %v1534_v48  ;;  %v1635_v5 = vsub.f32 %v5929_v21, %v1534_v48  ;;  %v1574_v18 = vpop.permute.xlu1 %1573  ;;  %v5129_v1 = vadd.f32 %v3956_v29, %v3954_v22 }
 0x364   : > { %v3960_v4 = vpop.eup %3959  ;;  %3979 = vpow2.f32 %v1734_v56  ;;  %v1650_v57 = vsub.f32 %v5930_v16, %v1574_v18  ;;  %v1651_v61 = vsub.f32 %v5931_v10, %v1574_v18  ;;  %v5932_v18 = vld [vmem:[#allocation22_spill] sm:$0xff] }
 0x365   : > { %v3962_v24 = vpop.eup %3961  ;;  %3981 = vpow2.f32 %v1760_v59  ;;  %v1736_v0 = vmul.f32 1.442695, %v1634_v31  ;;  %v1738_v7 = vmul.f32 1.442695, %v1635_v5  ;;  %2152 = vperm.xlu1 %3800, %v5091_v26   ;;  %v5135_v6 = vadd.f32 %v3960_v4, %v5125_v20  ;;  %v5933_v31 = vld [vmem:[#allocation23_spill] sm:$0xff] }
 0x366   : > { %v3964_v38 = vpop.eup %3963  ;;  %3983 = vpow2.f32 %v1762_v25  ;;  %v1768_v48 = vmul.f32 1.442695, %v1650_v57  ;;  %v1770_v21 = vmul.f32 1.442695, %v1651_v61  ;;  %2137 = vperm.xlu0 %3799, %v5081_v9   ;;  %v1539_v56 = vpop.permute.xlu0 %1538  ;;  %v2251_v14 = vpack.c.bf16 %v3962_v24, %v3954_v22  ;;  %v5935_v57 = vld [vmem:[#allocation41_spill] sm:$0xff] }
 0x367   : > { %v5138_v16 = vpop.eup %3965  ;;  %3985 = vpow2.f32 %v1736_v0  ;;  %v1636_v59 = vsub.f32 %v5932_v18, %v1539_v56  ;;  %v1637_v5 = vsub.f32 %v5933_v31, %v1539_v56  ;;  %v1584_v10 = vpop.permute.xlu1 %1583  ;;  %v2252_v26 = vpack.c.bf16 %v3964_v38, %v3956_v29  ;;  %v5937_v18 = vld [vmem:[#allocation27_spill] sm:$0xff] }
 0x368   : > { %v5142_v42 = vpop.eup %3967  ;;  %3987 = vpow2.f32 %v1738_v7  ;;  %v1654_v25 = vsub.f32 %v5934_v58, %v1584_v10  ;;  %v1655_v61 = vsub.f32 %v5935_v57, %v1584_v10  ;;  %v5146_v63 = vadd.f32 %v3964_v38, %v3962_v24  ;;  %v5938_v10 = vld [vmem:[#allocation46_spill] sm:$0xff] }
 0x369   : > { %v3970_v9 = vpop.eup %3969  ;;  %3989 = vpow2.f32 %v1768_v48  ;;  %v1740_v22 = vmul.f32 1.442695, %v1636_v59  ;;  %v1742_v35 = vmul.f32 1.442695, %v1637_v5  ;;  %2453 = vmatprep.mubr.bf16.mxu0 %v2252_v26  ;;  %2162 = vperm.xlu1 %3800, %v5101_v11   ;;  %v5151_v0 = vadd.f32 %v5142_v42, %v5138_v16  ;;  %v5936_v26 = vld [vmem:[#allocation26_spill] sm:$0xff] }
 0x36a   : > { %v3972_v29 = vpop.eup %3971  ;;  %3991 = vpow2.f32 %v1770_v21  ;;  %v1776_v7 = vmul.f32 1.442695, %v1654_v25  ;;  %v1778_v56 = vmul.f32 1.442695, %v1655_v61  ;;  %2454 = vmatmul.mubr.bf16.gmra.mrb[60].mxu0 %v2251_v14  ;;  %2147 = vperm.xlu0 %3799, %v5088_v60   ;;  %v1549_v58 = vpop.permute.xlu0 %1548  ;;  %v2253_v24 = vpack.c.bf16 %v3970_v9, %v5125_v20  ;;  %v5939_v21 = vld [vmem:[#allocation47_spill] sm:$0xff] }
 0x36b   : > { %v5155_v38 = vpop.eup %3973  ;;  %3993 = vpow2.f32 %v1740_v22  ;;  %v1640_v48 = vsub.f32 %v5936_v26, %v1549_v58  ;;  %v1641_v59 = vsub.f32 %v5937_v18, %v1549_v58  ;;  %v2254_v31 = vpack.c.bf16 %v3972_v29, %v3960_v4  ;;  %v5941_v58 = vld [vmem:[#allocation71_spill] sm:$0xff] }
 0x36c   : > { %v5159_v5 = vpop.eup %3975  ;;  %v5940_v25 = vsub.f32 %v5938_v10, %v5939_v21  ;;  %3995 = vpow2.f32 %v1742_v35  ;;  %v5164_v14 = vadd.f32 %v3972_v29, %v3970_v9  ;;  %v5942_v26 = vsub.f32 %v5941_v58, %v4859_v13  ;;  %v5943_v29 = vld [vmem:[#allocation30_spill] sm:$0xff]  ;;  %v5945_v58 = vld [vmem:[#allocation49_spill] sm:$0xff] }
 0x36d   : > { %v5166_v61 = vpop.eup %3977  ;;  %3997 = vpow2.f32 %v1776_v7  ;;  %v1748_v20 = vmul.f32 1.442695, %v1640_v48  ;;  %v1750_v11 = vmul.f32 1.442695, %v1641_v59  ;;  %2461 = vmatprep.mubr.bf16.mxu0 %v2254_v31  ;;  %2052 = vperm.xlu1 %3800, %v5007_v3   ;;  %v5171_v4 = vadd.f32 %v5159_v5, %v5155_v38  ;;  %v5944_v48 = vld [vmem:[#allocation31_spill] sm:$0xff] }
 0x36e   : > { %v1382_v57 = vmul.f32 1.442695, %v5940_v25  ;;  %v3980_v22 = vpop.eup %3979  ;;  %v1424_v18 = vmul.f32 1.442695, %v5942_v26  ;;  %3999 = vpow2.f32 %v1778_v56  ;;  %2157 = vperm.xlu0 %3799, %v5095_v47   ;;  %v1559_v35 = vpop.permute.xlu0 %1558  ;;  %v5946_v26 = vld [vmem:[#allocation51_spill] sm:$0xff] }
 0x36f   : > { %v5177_v9 = vpop.eup %3981  ;;  %4001 = vpow2.f32 %v1748_v20  ;;  %v1644_v7 = vsub.f32 %v5943_v29, %v1559_v35  ;;  %v1645_v59 = vsub.f32 %v5944_v48, %v1559_v35  ;;  %v5182_v31 = vadd.f32 %v3980_v22, %v5166_v61  ;;  %v5948_v48 = vld [vmem:[#allocation34_spill] sm:$0xff] }
 0x370   : > { %v5184_v10 = vpop.eup %3983  ;;  %4003 = vpow2.f32 %v1750_v11  ;;  %v5947_v35 = vsub.f32 %v5945_v58, %v5946_v26  ;;  %v5951_v26 = vld [vmem:[#allocation50_spill] sm:$0xff] }
 0x371   : > { %v3986_v21 = vpop.eup %3985  ;;  %4005 = vpow2.f32 %v1382_v57  ;;  %v1756_v13 = vmul.f32 1.442695, %v1644_v7  ;;  %v1758_v56 = vmul.f32 1.442695, %v1645_v59  ;;  %2172 = vperm.xlu1 %3800, %v5113_v40   ;;  %v5189_v25 = vadd.f32 %v5184_v10, %v5177_v9  ;;  %v5949_v40 = vld [vmem:[#allocation35_spill] sm:$0xff] }
 0x372   : > { %v3988_v20 = vpop.eup %3987  ;;  %v1386_v29 = vmul.f32 1.442695, %v5947_v35  ;;  %4007 = vpow2.f32 %v1424_v18  ;;  %2462 = vmatmul.mubr.bf16.gmra.mrb[64].mxu0 %v2253_v24  ;;  %2047 = vperm.xlu0 %3799, %v4997_v50   ;;  %v1569_v11 = vpop.permute.xlu0 %1568  ;;  %v2255_v57 = vpack.c.bf16 %v3986_v21, %v5166_v61  ;;  %v5950_v24 = vld [vmem:[#allocation48_spill] sm:$0xff] }
 0x373   : > { %v5196_v7 = vpop.eup %3989  ;;  %4009 = vpow2.f32 %v1756_v13  ;;  %v1648_v59 = vsub.f32 %v5948_v48, %v1569_v11  ;;  %v1649_v47 = vsub.f32 %v5949_v40, %v1569_v11  ;;  %v2256_v60 = vpack.c.bf16 %v3988_v20, %v3980_v22  ;;  %v5953_v22 = vld [vmem:[#allocation75_spill] sm:$0xff] }
 0x374   : > { %v5200_v23 = vpop.eup %3991  ;;  %4011 = vpow2.f32 %v1758_v56  ;;  %v5202_v58 = vadd.f32 %v3988_v20, %v3986_v21  ;;  %v5952_v35 = vsub.f32 %v5950_v24, %v5951_v26  ;;  %v5954_v56 = vld [vmem:[#allocation76_spill] sm:$0xff]  ;;  %v5957_v24 = vld [vmem:[#allocation39_spill] sm:$0xff] }
 0x375   : > { %v3994_v18 = vpop.eup %3993  ;;  %v1764_v46 = vmul.f32 1.442695, %v1648_v59  ;;  %v1766_v61 = vmul.f32 1.442695, %v1649_v47  ;;  %2469 = vmatprep.mubr.bf16.mxu0 %v2256_v60  ;;  %2062 = vperm.xlu1 %3800, %v5022_v39   ;;  %v5210_v13 = vadd.f32 %v5200_v23, %v5196_v7  ;;  %4013 = vpow2.f32 %v1386_v29  ;;  %v5956_v60 = vld [vmem:[#allocation38_spill] sm:$0xff] }
 0x376   : > { %v1384_v51 = vmul.f32 1.442695, %v5952_v35  ;;  %v3996_v40 = vpop.eup %3995  ;;  %v5955_v21 = vsub.f32 %v5953_v22, %v5954_v56  ;;  %2167 = vperm.xlu0 %3799, %v5107_v8   ;;  %v1579_v11 = vpop.permute.xlu0 %1578  ;;  %v2257_v48 = vpack.c.bf16 %v5138_v16, %v3994_v18 }
 0x377   : > { %v3998_v59 = vpop.eup %3997  ;;  %4015 = vpow2.f32 %v1764_v46  ;;  %v1652_v47 = vsub.f32 %v5956_v60, %v1579_v11  ;;  %v1653_v26 = vsub.f32 %v5957_v24, %v1579_v11  ;;  %v2258_v35 = vpack.c.bf16 %v5142_v42, %v3996_v40 }
 0x378   : > { %v1430_v20 = vmul.f32 1.442695, %v5955_v21  ;;  %v4000_v41 = vpop.eup %3999  ;;  %4017 = vpow2.f32 %v1766_v61  ;;  %v5220_v29 = vadd.f32 %v3996_v40, %v3994_v18  ;;  %v5958_v61 = vld [vmem:[#allocation74_spill] sm:$0xff] }
 0x379   : > { %v4002_v39 = vpop.eup %4001  ;;  %4019 = vpow2.f32 %v1384_v51  ;;  %v1772_v22 = vmul.f32 1.442695, %v1652_v47  ;;  %v1774_v56 = vmul.f32 1.442695, %v1653_v26  ;;  %2182 = vperm.xlu1 %3800, %v5117_v44   ;;  %v5223_v21 = vadd.f32 %v4000_v41, %v3998_v59 }
 0x37a   : > { %v4004_v16 = vpop.eup %4003  ;;  %4021 = vpow2.f32 %v1430_v20  ;;  %2470 = vmatmul.mubr.bf16.gmra.mrb[68].mxu0 %v2255_v57  ;;  %2057 = vperm.xlu0 %3799, %v5012_v34   ;;  %v2259_v46 = vpack.c.bf16 %v5155_v38, %v4002_v39  ;;  %v5959_v18 = vsub.f32 %v5958_v61, %v4881_v12 }
 0x37b   : > { %v5227_v42 = vpop.eup %4005  ;;  %4023 = vpow2.f32 %v1772_v22  ;;  %2477 = vmatprep.mubr.bf16.mxu0 %v2258_v35  ;;  %v2260_v51 = vpack.c.bf16 %v5159_v5, %v4004_v16  ;;  %v5233_v11 = vadd.f32 %v4004_v16, %v4002_v39 }
 0x37c   : > { %v1428_v40 = vmul.f32 1.442695, %v5959_v18  ;;  %v5235_v60 = vpop.eup %4007  ;;  %4025 = vpow2.f32 %v1774_v56 }
 0x37d   : > { %v4010_v57 = vpop.eup %4009  ;;  %2072 = vperm.xlu1 %3800, %v5227_v42  }
 0x37e   : > { %v4012_v20 = vpop.eup %4011  ;;  %2177 = vperm.xlu0 %3799, %v5235_v60   ;;  %v2261_v38 = vpack.c.bf16 %v5177_v9, %v4010_v57  ;;  %4027 = vpow2.f32 %v1428_v40 }
 0x37f   : > { %v2262_v12 = vpack.c.bf16 %v5184_v10, %v4012_v20  ;;  %v5241_v47 = vadd.f32 %v4012_v20, %v4010_v57  ;;  %v5243_v24 = vpop.eup %4013 }
 0x381   : > { %v4016_v39 = vpop.eup %4015  ;;  %2082 = vperm.xlu1 %3800, %v5243_v24  }
 0x382   : > { %v4018_v5 = vpop.eup %4017  ;;  %2478 = vmatmul.mubr.bf16.gmra.mrb[72].mxu0 %v2257_v48  ;;  %2067 = vperm.xlu0 %3799, %v5028_v43   ;;  %v2263_v26 = vpack.c.bf16 %v5196_v7, %v4016_v39 }
 0x383   : > { %v5248_v35 = vpop.eup %4019  ;;  %2485 = vmatprep.mubr.bf16.mxu0 %v2260_v51  ;;  %v2264_v9 = vpack.c.bf16 %v5200_v23, %v4018_v5  ;;  %v5251_v22 = vadd.f32 %v4018_v5, %v4016_v39 }
 0x384   : > { %v5253_v10 = vpop.eup %4021 }
 0x385   : > { %v4024_v56 = vpop.eup %4023  ;;  %2192 = vperm.xlu1 %3800, %v5253_v10  }
 0x386   : > { %v4026_v16 = vpop.eup %4025  ;;  %2077 = vperm.xlu0 %3799, %v5248_v35   ;;  %v2265_v48 = vpack.c.bf16 %v3998_v59, %v4024_v56 }
 0x387   : > { %v2266_v61 = vpack.c.bf16 %v4000_v41, %v4026_v16  ;;  %v5257_v18 = vadd.f32 %v4026_v16, %v4024_v56  ;;  %v5963_v41 = vld [vmem:[#allocation43_spill] sm:$0xff] }
 0x388   : > { %v5259_v7 = vpop.eup %4027 }
 0x38a   : > { %2486 = vmatmul.mubr.bf16.gmra.mrb[76].mxu0 %v2259_v46  ;;  %2187 = vperm.xlu0 %3799, %v5259_v7  }
 0x38b   : > { %2493 = vmatprep.mubr.bf16.mxu0 %v2262_v12 }
 0x392   : > { %2494 = vmatmul.mubr.bf16.gmra.mrb[80].mxu0 %v2261_v38 }
 0x393   : > { %2501 = vmatprep.mubr.bf16.mxu0 %v2264_v9 }
 0x39a   : > { %2502 = vmatmul.mubr.bf16.gmra.mrb[84].mxu0 %v2263_v26 }
 0x39b   : > { %2509 = vmatprep.mubr.bf16.mxu0 %v2266_v61 }
 0x3a2   : > { %2510 = vmatmul.mubr.bf16.gmra.mrb[88].mxu0 %v2265_v48  ;;  %v5964_v48 = vsub.f32 %v4980_v55, %v4992_v15 }
 0x3a9   : > { %1856 = vadd.xlane.f32.xlu0 %v4916_v28  ;;  %1853 = vadd.xlane.f32.xlu1 %v4912_v2  ;;  %v5960_v28 = vld [vmem:[#allocation44_spill] sm:$0xff] }
 0x3ad   : > { %1862 = vadd.xlane.f32.xlu0 %v4924_v36  ;;  %1859 = vadd.xlane.f32.xlu1 %v4920_v32  ;;  %v5961_v36 = vld [vmem:[#allocation45_spill] sm:$0xff] }
 0x3b1   : > { %1868 = vadd.xlane.f32.xlu0 %v4932_v33  ;;  %1865 = vadd.xlane.f32.xlu1 %v4928_v30 }
 0x3b5   : > { %1874 = vadd.xlane.f32.xlu0 %v4940_v49  ;;  %1871 = vadd.xlane.f32.xlu1 %v4936_v45 }
 0x3b9   : > { %1877 = vadd.xlane.f32.xlu0 %v4942_v37  ;;  %1880 = vadd.xlane.f32.xlu1 %v4944_v17 }
 0x3bd   : > { %1883 = vadd.xlane.f32.xlu0 %v4946_v53  ;;  %1889 = vadd.xlane.f32.xlu1 %v5105_v62 }
 0x3c1   : > { %1886 = vadd.xlane.f32.xlu0 %v4948_v27  ;;  %1895 = vadd.xlane.f32.xlu1 %v5129_v1  ;;  %v5962_v27 = vld [vmem:[#allocation42_spill] sm:$0xff] }
 0x3c4   : > { %v1594_v2 = vpop.permute.xlu1 %1593 }
 0x3c5   : > { %v1658_v32 = vsub.f32 %v5960_v28, %v1594_v2  ;;  %v1659_v30 = vsub.f32 %v5961_v36, %v1594_v2  ;;  %1892 = vadd.xlane.f32.xlu0 %v5121_v52  ;;  %1901 = vadd.xlane.f32.xlu1 %v5135_v6 }
 0x3c7   : > { %v1784_v33 = vmul.f32 1.442695, %v1658_v32  ;;  %v1786_v45 = vmul.f32 1.442695, %v1659_v30 }
 0x3c8   : > { %v5280_v49 = vpop.permute.xlu1 %2087 }
 0x3c9   : > { %4029 = vpow2.f32 %v1784_v33  ;;  %1898 = vadd.xlane.f32.xlu0 %v5146_v63  ;;  %1907 = vadd.xlane.f32.xlu1 %v5182_v31 }
 0x3ca   : > { %4031 = vpow2.f32 %v1786_v45 }
 0x3cc   : > { %v5284_v37 = vpop.permute.xlu1 %2097 }
 0x3cd   : > { %1904 = vadd.xlane.f32.xlu0 %v5164_v14  ;;  %1913 = vadd.xlane.f32.xlu1 %v5220_v29 }
 0x3d0   : > { %v5288_v17 = vpop.permute.xlu1 %2102 }
 0x3d1   : > { %1910 = vadd.xlane.f32.xlu0 %v5202_v58  ;;  %1919 = vadd.xlane.f32.xlu1 %v5233_v11  ;;  %v1589_v53 = vpop.permute.xlu0 %1588 }
 0x3d2   : > { %v1656_v52 = vsub.f32 %v5962_v27, %v1589_v53  ;;  %v1657_v23 = vsub.f32 %v5963_v41, %v1589_v53  ;;  %v5965_v41 = vsub.f32 %v5045_v19, %v5059_v54 }
 0x3d3   : > { %v4030_v63 = vpop.eup %4029 }
 0x3d4   : > { %v4032_v62 = vpop.eup %4031  ;;  %v1780_v1 = vmul.f32 1.442695, %v1656_v52  ;;  %v1782_v6 = vmul.f32 1.442695, %v1657_v23  ;;  %v5294_v31 = vpop.permute.xlu1 %2112  ;;  %v1432_v23 = vmul.f32 1.442695, %v5965_v41 }
 0x3d5   : > { %1916 = vadd.xlane.f32.xlu0 %v5151_v0  ;;  %1925 = vadd.xlane.f32.xlu1 %v5241_v47  ;;  %v5298_v14 = vpop.permute.xlu0 %2092  ;;  %v1945_v58 = vadd.f32 %v4032_v62, %v4030_v63 }
 0x3d6   : > { %4033 = vpow2.f32 %v1780_v1 }
 0x3d7   : > { %4035 = vpow2.f32 %v1782_v6 }
 0x3d8   : > { %v5300_v59 = vpop.permute.xlu1 %2122 }
 0x3d9   : > { %1922 = vadd.xlane.f32.xlu0 %v5171_v4  ;;  %1931 = vadd.xlane.f32.xlu1 %v5251_v22  ;;  %v5304_v29 = vpop.permute.xlu0 %2107 }
 0x3dc   : > { %v3540_v46 = vpop.f32.mrb[32].mxu0  ;;  %v5306_v40 = vpop.permute.xlu1 %2132 }
 0x3dd   : > { %v3541_v51 = vpop.f32.mrb[33].mxu0  ;;  %1928 = vadd.xlane.f32.xlu0 %v5189_v25  ;;  %1937 = vadd.xlane.f32.xlu1 %v5257_v18  ;;  %v5310_v0 = vpop.permute.xlu0 %2117 }
 0x3de   : > { %v3542_v11 = vadd.f32 %v3541_v51, %v3540_v46  ;;  %v3543_v57 = vpop.f32.mrb[34].mxu0 }
 0x3df   : > { %v3544_v20 = vpop.f32.mrb[35].mxu0 }
 0x3e0   : > { %v4034_v38 = vpop.eup %4033  ;;  %v3545_v12 = vadd.f32 %v3544_v20, %v3543_v57  ;;  %v5312_v4 = vpop.permute.xlu1 %2142 }
 0x3e1   : > { %v4036_v47 = vpop.eup %4035  ;;  %1934 = vadd.xlane.f32.xlu0 %v5210_v13  ;;  %v5315_v39 = vpop.permute.xlu0 %2127  ;;  %v2267_v5 = vpack.c.bf16 %v4030_v63, %v4034_v38  ;;  %v1434_v13 = vmul.f32 1.442695, %v5964_v48 }
 0x3e2   : > { %v2268_v26 = vpack.c.bf16 %v4032_v62, %v4036_v47  ;;  %v1942_v9 = vadd.f32 %v4036_v47, %v4034_v38 }
 0x3e3   : > { %4037 = vpow2.f32 %v1434_v13 }
 0x3e4   : > { %v3546_v25 = vpop.f32.mrb[36].mxu0  ;;  %2517 = vmatprep.mubr.bf16.mxu0 %v2268_v26  ;;  %1943 = vadd.xlane.f32.xlu1 %v1942_v9  ;;  %v5317_v22 = vpop.permute.xlu1 %2152  ;;  %4039 = vpow2.f32 %v1432_v23  ;;  %v2214_v23 = vmul.f32 0.0, %v5298_v14 }
 0x3e5   : > { %v3547_v56 = vpop.f32.mrb[37].mxu0  ;;  %2518 = vmatmul.mubr.bf16.gmra.mrb[92].mxu0 %v2267_v5  ;;  %1940 = vadd.xlane.f32.xlu0 %v5223_v21  ;;  %v5320_v16 = vpop.permute.xlu0 %2137 }
 0x3e6   : > { %v3548_v61 = vadd.f32 %v3547_v56, %v3546_v25  ;;  %v3549_v18 = vpop.f32.mrb[38].mxu0 }
 0x3e7   : > { %v3550_v2 = vpop.f32.mrb[39].mxu0 }
 0x3e8   : > { %v3551_v28 = vadd.f32 %v3550_v2, %v3549_v18  ;;  %v5325_v32 = vpop.permute.xlu1 %2162 }
 0x3e9   : > { %1946 = vadd.xlane.f32.xlu0 %v1945_v58  ;;  %v5327_v36 = vpop.permute.xlu0 %2147  ;;  %v3841_v58 = vld [vmem:[%s5680_s5] sm:$0xff]  }
 0x3ea   : > { %3756 = vmatprep.subr.bf16.mxu1 %v3841_v58  ;;  %3708 = vmatprep.subr.bf16.mxu0 %v3841_v58 }
 0x3eb   : > { %3764 = vmatpush3.bf16.msra.mxu1 %v3841_v58  ;;  %3709 = vmatpush3.bf16.msra.mxu0 %v3841_v58 }
 0x3ec   : > { %v3552_v30 = vpop.f32.mrb[40].mxu0  ;;  %v2053_v33 = vpop.permute.xlu1 %2052 }
 0x3ed   : > { %v3553_v45 = vpop.f32.mrb[41].mxu0  ;;  %v2206_v21 = vmul.f32 0.0, %v2053_v33  ;;  %v5329_v53 = vpop.permute.xlu0 %2157 }
 0x3ee   : > { %v3554_v27 = vadd.f32 %v3553_v45, %v3552_v30  ;;  %v3555_v52 = vpop.f32.mrb[42].mxu0  ;;  %v5341_v46 = vpop.eup %4037 }
 0x3ef   : > { %v3556_v55 = vpop.f32.mrb[43].mxu0  ;;  %v5331_v15 = vadd.f32 %v3545_v12, %v2206_v21  ;;  %v5356_v45 = vpop.eup %4039  ;;  %v2213_v21 = vmul.f32 0.0, %v5280_v49  ;;  %v3842_v49 = vld [vmem:[%s5680_s5 + $0x8] sm:$0xff]  }
 0x3f0   : > { %v3557_v63 = vadd.f32 %v3556_v55, %v3555_v52  ;;  %v5336_v62 = vpop.permute.xlu1 %2172  ;;  %3757 = vmatprep.subr.bf16.mxu1 %v3842_v49  ;;  %3710 = vmatprep.subr.bf16.mxu0 %v3842_v49 }
 0x3f1   : > { %v2048_v1 = vpop.permute.xlu0 %2047  ;;  %3765 = vmatpush3.bf16.msra.mxu1 %v3842_v49  ;;  %3711 = vmatpush3.bf16.msra.mxu0 %v3842_v49 }
 0x3f2   : > { %v2205_v6 = vmul.f32 0.0, %v2048_v1 }
 0x3f4   : > { %v3558_v51 = vpop.f32.mrb[44].mxu0  ;;  %v2063_v57 = vpop.permute.xlu1 %2062  ;;  %v5343_v20 = vadd.f32 %v3542_v11, %v2205_v6 }
 0x3f5   : > { %v3559_v19 = vpop.f32.mrb[45].mxu0  ;;  %v2208_v54 = vmul.f32 0.0, %v2063_v57  ;;  %2202 = vperm.xlu1 %3800, %v5341_v46   ;;  %v5346_v38 = vpop.permute.xlu0 %2167 }
 0x3f6   : > { %v3560_v12 = vadd.f32 %v3559_v19, %v3558_v51  ;;  %v3561_v47 = vpop.f32.mrb[46].mxu0 }
 0x3f7   : > { %v3562_v5 = vpop.f32.mrb[47].mxu0  ;;  %v5348_v26 = vadd.f32 %v3551_v28, %v2208_v54 }
 0x3f8   : > { %v3563_v9 = vadd.f32 %v3562_v5, %v3561_v47  ;;  %v5350_v25 = vpop.permute.xlu1 %2182 }
 0x3f9   : > { %v2058_v56 = vpop.permute.xlu0 %2057 }
 0x3fa   : > { %v2207_v48 = vmul.f32 0.0, %v2058_v56  ;;  %v3843_v56 = vld [vmem:[%s5680_s5 + $0x10] sm:$0xff]  }
 0x3fb   : > { %3758 = vmatprep.subr.bf16.mxu1 %v3843_v56  ;;  %3712 = vmatprep.subr.bf16.mxu0 %v3843_v56 }
 0x3fc   : > { %v3564_v11 = vpop.f32.mrb[48].mxu0  ;;  %v2073_v13 = vpop.permute.xlu1 %2072  ;;  %v5352_v18 = vadd.f32 %v3548_v61, %v2207_v48  ;;  %v2215_v48 = vmul.f32 0.0, %v5284_v37  ;;  %3766 = vmatpush3.bf16.msra.mxu1 %v3843_v56  ;;  %3713 = vmatpush3.bf16.msra.mxu0 %v3843_v56  ;;  %v3844_v37 = vld [vmem:[%s5680_s5 + $0x18] sm:$0xff]  }
 0x3fd   : > { %v3565_v2 = vpop.f32.mrb[49].mxu0  ;;  %v2210_v30 = vmul.f32 0.0, %v2073_v13  ;;  %v5354_v33 = vpop.permute.xlu0 %2177  ;;  %3759 = vmatprep.subr.bf16.mxu1 %v3844_v37  ;;  %3714 = vmatprep.subr.bf16.mxu0 %v3844_v37 }
 0x3fe   : > { %v3566_v52 = vadd.f32 %v3565_v2, %v3564_v11  ;;  %v3567_v28 = vpop.f32.mrb[50].mxu0 }
 0x3ff   : > { %v3568_v55 = vpop.f32.mrb[51].mxu0  ;;  %2197 = vperm.xlu0 %3799, %v5356_v45   ;;  %v5360_v41 = vadd.f32 %v3557_v63, %v2210_v30  ;;  %v2216_v30 = vmul.f32 0.0, %v5288_v17 }
 0x400   : > { %v3569_v1 = vadd.f32 %v3568_v55, %v3567_v28  ;;  %v2083_v61 = vpop.permute.xlu1 %2082  ;;  %v5363_v6 = vadd.f32 %v3566_v52, %v2213_v21  ;;  %v3845_v55 = vld [vmem:[%s5680_s5 + $0x20] sm:$0xff]   ;;  %3767 = vmatpush3.bf16.msra.mxu1 %v3844_v37  ;;  %3715 = vmatpush3.bf16.msra.mxu0 %v3844_v37 }
 0x401   : > { %v2212_v58 = vmul.f32 0.0, %v2083_v61  ;;  %v2068_v51 = vpop.permute.xlu0 %2067  ;;  %3760 = vmatprep.subr.bf16.mxu1 %v3845_v55  ;;  %3716 = vmatprep.subr.bf16.mxu0 %v3845_v55 }
 0x402   : > { %v2209_v57 = vmul.f32 0.0, %v2068_v51  ;;  %v5368_v19 = vadd.f32 %v3569_v1, %v2214_v23  ;;  %v1789_v1 = vld [vmem:[#allocation4 + $0x8] sm:$0xff] }
 0x403   : > { %v5370_v54 = vadd.f32 %v3563_v9, %v2212_v58  ;;  %v1821_v49 = vmul.f32 %v5007_v3, %v1789_v1  ;;  %v1792_v1 = vld [vmem:[#allocation4 + $0x20] sm:$0xff] }
 0x404   : > { %v3570_v47 = vpop.f32.mrb[52].mxu0  ;;  %v5372_v63 = vadd.f32 %v3554_v27, %v2209_v57  ;;  %3768 = vmatpush3.bf16.msra.mxu1 %v3845_v55  ;;  %3717 = vmatpush3.bf16.msra.mxu0 %v3845_v55  ;;  %v5391_v17 = vpop.permute.xlu1 %2192  ;;  %v5966_v55 = vld [vmem:[#allocation54_spill] sm:$0xff] }
 0x405   : > { %v3571_v14 = vpop.f32.mrb[53].mxu0  ;;  %v2078_v5 = vpop.permute.xlu0 %2077 }
 0x406   : > { %v3572_v11 = vadd.f32 %v3571_v14, %v3570_v47  ;;  %v3573_v13 = vpop.f32.mrb[54].mxu0  ;;  %v2211_v2 = vmul.f32 0.0, %v2078_v5  ;;  %v1790_v47 = vld [vmem:[#allocation4 + $0x10] sm:$0xff]  ;;  %v2217_v14 = vmul.f32 0.0, %v5304_v29 }
 0x407   : > { %v3574_v9 = vpop.f32.mrb[55].mxu0  ;;  %v1822_v3 = vmul.f32 %v5012_v34, %v1790_v47  ;;  %v3847_v34 = vld [vmem:[%s5680_s5 + $0x30] sm:$0xff]   ;;  %v1824_v47 = vmul.f32 %v5028_v43, %v1792_v1 }
 0x408   : > { %v3575_v27 = vadd.f32 %v3574_v9, %v3573_v13  ;;  %v5379_v21 = vadd.f32 %v3560_v12, %v2211_v2  ;;  %v5381_v52 = vadd.f32 %v3572_v11, %v2215_v48  ;;  %v1788_v12 = vld [vmem:[#allocation4] sm:$0xff]  ;;  %v1791_v13 = vld [vmem:[#allocation4 + $0x18] sm:$0xff] }
 0x409   : > { %v5393_v23 = vpop.permute.xlu0 %2187  ;;  %v1820_v58 = vmul.f32 %v4997_v50, %v1788_v12  ;;  %v2218_v50 = vmul.f32 0.0, %v5294_v31  ;;  %v1823_v12 = vmul.f32 %v5966_v55, %v1791_v13  ;;  %v2220_v55 = vmul.f32 0.0, %v5300_v59 }
 0x40a   : > { %v5383_v28 = vadd.f32 %v3575_v27, %v2216_v30  ;;  %v3846_v30 = vld [vmem:[%s5680_s5 + $0x28] sm:$0xff]  }
 0x40b   : > { %3761 = vmatprep.subr.bf16.mxu1 %v3846_v30  ;;  %3718 = vmatprep.subr.bf16.mxu0 %v3846_v30 }
 0x40c   : > { %3769 = vmatpush3.bf16.msra.mxu1 %v3846_v30  ;;  %3719 = vmatpush3.bf16.msra.mxu0 %v3846_v30 }
 0x40d   : > { %3762 = vmatprep.subr.bf16.mxu1 %v3847_v34  ;;  %3720 = vmatprep.subr.bf16.mxu0 %v3847_v34 }
 0x410   : > { %3770 = vmatpush3.bf16.msra.mxu1 %v3847_v34  ;;  %3721 = vmatpush3.bf16.msra.mxu0 %v3847_v34  ;;  %v1796_v34 = vld [vmem:[#allocation4 + $0x40] sm:$0xff] }
 0x435   : > { %v3576_v61 = vpop.f32.mrb[56].mxu0 }
 0x436   : > { %v3577_v51 = vpop.f32.mrb[57].mxu0  ;;  %v1854_v57 = vpop.xlane.xlu1 %1853 }
 0x437   : > { %v3578_v5 = vadd.f32 %v3577_v51, %v3576_v61  ;;  %v1948_v56 = vadd.f32 %v1854_v57, %v1820_v58  ;;  %v3579_v48 = vpop.f32.mrb[58].mxu0  ;;  %v1857_v11 = vpop.xlane.xlu0 %1856  ;;  %v1793_v51 = vld [vmem:[#allocation4 + $0x28] sm:$0xff] }
 0x438   : > { %v1949_v2 = vadd.f32 %v1857_v11, %v1821_v49  ;;  %v3580_v9 = vpop.f32.mrb[59].mxu0  ;;  %v2219_v11 = vmul.f32 0.0, %v5310_v0 }
 0x439   : > { %1981 = vst.msk [vmem:[#allocation4] sm:$0xff] %vm714_vm0, %v1948_v56  ;;  %v3581_v27 = vadd.f32 %v3580_v9, %v3579_v48  ;;  %v5404_v37 = vadd.f32 %v3578_v5, %v2217_v14  ;;  %v1794_v14 = vld [vmem:[#allocation4 + $0x30] sm:$0xff]  ;;  %v1825_v48 = vmul.f32 %v5227_v42, %v1793_v51 }
 0x43a   : > { %1982 = vst.msk [vmem:[#allocation4 + $0x8] sm:$0xff] %vm714_vm0, %v1949_v2  ;;  %v1860_v29 = vpop.xlane.xlu1 %1859 }
 0x43b   : > { %v1950_v61 = vadd.f32 %v1860_v29, %v1822_v3  ;;  %v1863_v58 = vpop.xlane.xlu0 %1862  ;;  %v5408_v31 = vadd.f32 %v3581_v27, %v2218_v50  ;;  %v1795_v50 = vld [vmem:[#allocation4 + $0x38] sm:$0xff]  ;;  %v1826_v29 = vmul.f32 %v5248_v35, %v1794_v14 }
 0x43c   : > { %v1951_v57 = vadd.f32 %v1863_v58, %v1823_v12  ;;  %v1797_v58 = vld [vmem:[#allocation4 + $0x48] sm:$0xff] }
 0x43d   : > { %1983 = vst.msk [vmem:[#allocation4 + $0x10] sm:$0xff] %vm714_vm0, %v1950_v61  ;;  %v3582_v49 = vpop.f32.mrb[60].mxu0  ;;  %v1827_v61 = vmul.f32 %v5243_v24, %v1795_v50 }
 0x43e   : > { %1984 = vst.msk [vmem:[#allocation4 + $0x18] sm:$0xff] %vm714_vm0, %v1951_v57  ;;  %v3583_v5 = vpop.f32.mrb[61].mxu0  ;;  %v1866_v56 = vpop.xlane.xlu1 %1865 }
 0x43f   : > { %v3584_v13 = vadd.f32 %v3583_v5, %v3582_v49  ;;  %v1952_v2 = vadd.f32 %v1866_v56, %v1824_v47  ;;  %v3585_v9 = vpop.f32.mrb[62].mxu0  ;;  %v1869_v30 = vpop.xlane.xlu0 %1868  ;;  %v5967_v5 = vld [vmem:[#allocation53_spill] sm:$0xff] }
 0x440   : > { %v2657_v27 = vld [vmem:[#allocation4] sm:$0xff]  ;;  %v1953_v43 = vadd.f32 %v1869_v30, %v1825_v48  ;;  %v3586_v3 = vpop.f32.mrb[63].mxu0  ;;  %v1829_v56 = vmul.f32 %v5967_v5, %v1797_v58 }
 0x441   : > { %4041 = vrcp.f32 %v2657_v27  ;;  %v2658_v42 = vld [vmem:[#allocation4 + $0x8] sm:$0xff]  ;;  %1985 = vst.msk [vmem:[#allocation4 + $0x20] sm:$0xff] %vm714_vm0, %v1952_v2  ;;  %v3587_v12 = vadd.f32 %v3586_v3, %v3585_v9  ;;  %v5421_v0 = vadd.f32 %v3584_v13, %v2219_v11  ;;  %v1800_v48 = vld [vmem:[#allocation4 + $0x60] sm:$0xff]  ;;  %v5968_v13 = vld [vmem:[#allocation52_spill] sm:$0xff]  ;;  %v2221_v9 = vmul.f32 0.0, %v5315_v39 }
 0x442   : > { %4043 = vrcp.f32 %v2658_v42  ;;  %1986 = vst.msk [vmem:[#allocation4 + $0x28] sm:$0xff] %vm714_vm0, %v1953_v43  ;;  %v1872_v1 = vpop.xlane.xlu1 %1871  ;;  %v1828_v2 = vmul.f32 %v5968_v13, %v1796_v34  ;;  %v1798_v3 = vld [vmem:[#allocation4 + $0x50] sm:$0xff]  ;;  %v5970_v34 = vld [vmem:[#allocation55_spill] sm:$0xff] }
 0x443   : > { %v1954_v51 = vadd.f32 %v1872_v1, %v1826_v29  ;;  %v1875_v57 = vpop.xlane.xlu0 %1874  ;;  %v5425_v35 = vadd.f32 %v3587_v12, %v2220_v55  ;;  %v5969_v12 = vld [vmem:[#allocation56_spill] sm:$0xff] }
 0x444   : > { %v2659_v59 = vld [vmem:[#allocation4 + $0x10] sm:$0xff]  ;;  %v1955_v49 = vadd.f32 %v1875_v57, %v1827_v61  ;;  %v1832_v1 = vmul.f32 %v5969_v12, %v1800_v48  ;;  %v2222_v61 = vmul.f32 0.0, %v5306_v40 }
 0x445   : > { %4045 = vrcp.f32 %v2659_v59  ;;  %v2660_v47 = vld [vmem:[#allocation4 + $0x18] sm:$0xff]  ;;  %1987 = vst.msk [vmem:[#allocation4 + $0x30] sm:$0xff] %vm714_vm0, %v1954_v51  ;;  %v3588_v14 = vpop.f32.mrb[64].mxu0  ;;  %v1830_v59 = vmul.f32 %v5970_v34, %v1798_v3 }
 0x446   : > { %4047 = vrcp.f32 %v2660_v47  ;;  %1988 = vst.msk [vmem:[#allocation4 + $0x38] sm:$0xff] %vm714_vm0, %v1955_v49  ;;  %v3589_v24 = vpop.f32.mrb[65].mxu0  ;;  %v1881_v11 = vpop.xlane.xlu1 %1880  ;;  %v1802_v49 = vld [vmem:[#allocation4 + $0x70] sm:$0xff]  ;;  %v5972_v3 = vld [vmem:[#allocation57_spill] sm:$0xff] }
 0x447   : > { %v3590_v30 = vadd.f32 %v3589_v24, %v3588_v14  ;;  %v1957_v50 = vadd.f32 %v1881_v11, %v1829_v56  ;;  %v3591_v27 = vpop.f32.mrb[66].mxu0  ;;  %v1878_v43 = vpop.xlane.xlu0 %1877  ;;  %v1799_v56 = vld [vmem:[#allocation4 + $0x58] sm:$0xff] }
 0x448   : > { %v2661_v29 = vld [vmem:[#allocation4 + $0x20] sm:$0xff]  ;;  %v1956_v55 = vadd.f32 %v1878_v43, %v1828_v2  ;;  %v3592_v42 = vpop.f32.mrb[67].mxu0 }
 0x449   : > { %4049 = vrcp.f32 %v2661_v29  ;;  %v2662_v58 = vld [vmem:[#allocation4 + $0x28] sm:$0xff]  ;;  %1990 = vst.msk [vmem:[#allocation4 + $0x48] sm:$0xff] %vm714_vm0, %v1957_v50  ;;  %v3593_v51 = vadd.f32 %v3592_v42, %v3591_v27  ;;  %v5435_v57 = vadd.f32 %v3590_v30, %v2221_v9  ;;  %v1804_v50 = vld [vmem:[#allocation4 + $0x80] sm:$0xff]  ;;  %v1831_v29 = vmul.f32 %v5972_v3, %v1799_v56 }
 0x44a   : > { %4051 = vrcp.f32 %v2662_v58  ;;  %1989 = vst.msk [vmem:[#allocation4 + $0x40] sm:$0xff] %vm714_vm0, %v1956_v55  ;;  %v1890_v39 = vpop.xlane.xlu1 %1889  ;;  %v5971_v9 = vld [vmem:[#allocation59_spill] sm:$0xff]  ;;  %v2223_v42 = vmul.f32 0.0, %v5320_v16  ;;  %v2224_v56 = vmul.f32 0.0, %v5312_v4 }
 0x44b   : > { %v4042_v47 = vpop.eup %4041  ;;  %v1960_v14 = vadd.f32 %v1890_v39, %v1832_v1  ;;  %v1884_v5 = vpop.xlane.xlu0 %1883  ;;  %v5439_v48 = vadd.f32 %v3593_v51, %v2222_v61  ;;  %v1834_v30 = vmul.f32 %v5971_v9, %v1802_v49  ;;  %v1801_v51 = vld [vmem:[#allocation4 + $0x68] sm:$0xff]  ;;  %v1806_v9 = vld [vmem:[#allocation4 + $0x90] sm:$0xff] }
 0x44c   : > { %v4044_v40 = vpop.eup %4043  ;;  %v2663_v24 = vld [vmem:[#allocation4 + $0x30] sm:$0xff]  ;;  %v1958_v11 = vadd.f32 %v1884_v5, %v1830_v59  ;;  %2723 = vperm.xlu0 %3799, %v4042_v47   ;;  %v5973_v47 = vld [vmem:[#allocation61_spill] sm:$0xff] }
 0x44d   : > { %4053 = vrcp.f32 %v2663_v24  ;;  %v2664_v13 = vld [vmem:[#allocation4 + $0x38] sm:$0xff]  ;;  %1993 = vst.msk [vmem:[#allocation4 + $0x60] sm:$0xff] %vm714_vm0, %v1960_v14  ;;  %v3594_v2 = vpop.f32.mrb[68].mxu0  ;;  %2728 = vperm.xlu1 %3800, %v4044_v40   ;;  %v1836_v14 = vmul.f32 %v5973_v47, %v1804_v50  ;;  %v2225_v47 = vmul.f32 0.0, %v5327_v36 }
 0x44e   : > { %4055 = vrcp.f32 %v2664_v13  ;;  %1991 = vst.msk [vmem:[#allocation4 + $0x50] sm:$0xff] %vm714_vm0, %v1958_v11  ;;  %v3595_v27 = vpop.f32.mrb[69].mxu0  ;;  %v1896_v43 = vpop.xlane.xlu1 %1895  ;;  %v3848_v5 = vld [vmem:[%s5680_s5 + $0x38] sm:$0xff]   ;;  %v5974_v13 = vld [vmem:[#allocation58_spill] sm:$0xff] }
 0x44f   : > { %v4046_v55 = vpop.eup %4045  ;;  %v3596_v12 = vadd.f32 %v3595_v27, %v3594_v2  ;;  %v1962_v1 = vadd.f32 %v1896_v43, %v1834_v30  ;;  %v3597_v61 = vpop.f32.mrb[70].mxu0  ;;  %v1833_v2 = vmul.f32 %v5974_v13, %v1801_v51  ;;  %3722 = vmatprep.subr.bf16.mxu0 %v3848_v5  ;;  %3763 = vmatprep.subr.bf16.mxu1 %v3848_v5  ;;  %v1803_v27 = vld [vmem:[#allocation4 + $0x78] sm:$0xff] }
 0x450   : > { %v1887_v58 = vpop.xlane.xlu0 %1886  ;;  %v4048_v39 = vpop.eup %4047  ;;  %v2666_v34 = vld [vmem:[#allocation4 + $0x48] sm:$0xff]  ;;  %2733 = vperm.xlu0 %3799, %v4046_v55   ;;  %3723 = vmatpush3.bf16.msra.mxu0 %v3848_v5 }
 0x451   : > { %v1959_v59 = vadd.f32 %v1887_v58, %v1831_v29  ;;  %v3598_v49 = vpop.f32.mrb[71].mxu0  ;;  %4057 = vrcp.f32 %v2666_v34  ;;  %v2665_v16 = vld [vmem:[#allocation4 + $0x40] sm:$0xff]  ;;  %1995 = vst.msk [vmem:[#allocation4 + $0x70] sm:$0xff] %vm714_vm0, %v1962_v1  ;;  %2738 = vperm.xlu1 %3800, %v4048_v39   ;;  %v5452_v24 = vadd.f32 %v3596_v12, %v2223_v42  ;;  %3771 = vmatpush3.bf16.msra.mxu1 %v3848_v5  ;;  %v5975_v12 = vld [vmem:[#allocation63_spill] sm:$0xff]  ;;  %v5976_v34 = vld [vmem:[#allocation60_spill] sm:$0xff] }
 0x452   : > { %v3599_v40 = vadd.f32 %v3598_v49, %v3597_v61  ;;  %4059 = vrcp.f32 %v2665_v16  ;;  %v1902_v11 = vpop.xlane.xlu1 %1901  ;;  %v1838_v1 = vmul.f32 %v5975_v12, %v1806_v9  ;;  %v1808_v61 = vld [vmem:[#allocation4 + $0xa0] sm:$0xff]  ;;  %v1810_v12 = vld [vmem:[#allocation4 + $0xb0] sm:$0xff] }
 0x453   : > { %1992 = vst.msk [vmem:[#allocation4 + $0x58] sm:$0xff] %vm714_vm0, %v1959_v59  ;;  %v4050_v30 = vpop.eup %4049  ;;  %v1964_v50 = vadd.f32 %v1902_v11, %v1836_v14  ;;  %v1835_v59 = vmul.f32 %v5976_v34, %v1803_v27  ;;  %v5977_v9 = vld [vmem:[#allocation6_spill] sm:$0xff] }
 0x454   : > { %v1893_v4 = vpop.xlane.xlu0 %1892  ;;  %v5456_v43 = vadd.f32 %v3599_v40, %v2224_v56  ;;  %v4052_v3 = vpop.eup %4051  ;;  %2743 = vperm.xlu0 %3799, %v4050_v30   ;;  %v2669_v58 = vld [vmem:[#allocation4 + $0x60] sm:$0xff]  ;;  %v1805_v40 = vld [vmem:[#allocation4 + $0x88] sm:$0xff]  ;;  %v1840_v30 = vmul.f32 %v5977_v9, %v1808_v61 }
 0x455   : > { %v1961_v29 = vadd.f32 %v1893_v4, %v1833_v2  ;;  %v2667_v55 = vld [vmem:[#allocation4 + $0x50] sm:$0xff]  ;;  %1997 = vst.msk [vmem:[#allocation4 + $0x80] sm:$0xff] %vm714_vm0, %v1964_v50  ;;  %v3600_v42 = vpop.f32.mrb[72].mxu0  ;;  %2748 = vperm.xlu1 %3800, %v4052_v3   ;;  %v2226_v50 = vmul.f32 0.0, %v5317_v22  ;;  %v1807_v22 = vld [vmem:[#allocation4 + $0x98] sm:$0xff] }
 0x456   : > { %4061 = vrcp.f32 %v2667_v55  ;;  %v3601_v51 = vpop.f32.mrb[73].mxu0  ;;  %v1908_v39 = vpop.xlane.xlu1 %1907  ;;  %v5978_v55 = vld [vmem:[#allocation62_spill] sm:$0xff] }
 0x457   : > { %1994 = vst.msk [vmem:[#allocation4 + $0x68] sm:$0xff] %vm714_vm0, %v1961_v29  ;;  %v4054_v49 = vpop.eup %4053  ;;  %v3602_v14 = vadd.f32 %v3601_v51, %v3600_v42  ;;  %v1966_v5 = vadd.f32 %v1908_v39, %v1838_v1  ;;  %v3603_v56 = vpop.f32.mrb[74].mxu0  ;;  %4063 = vrcp.f32 %v2669_v58  ;;  %v1837_v42 = vmul.f32 %v5978_v55, %v1805_v40 }
 0x458   : > { %v1899_v16 = vpop.xlane.xlu0 %1898  ;;  %v4056_v11 = vpop.eup %4055  ;;  %2753 = vperm.xlu0 %3799, %v4054_v49   ;;  %v2671_v3 = vld [vmem:[#allocation4 + $0x70] sm:$0xff] }
 0x459   : > { %v1963_v13 = vadd.f32 %v1899_v16, %v1835_v59  ;;  %v3604_v2 = vpop.f32.mrb[75].mxu0  ;;  %1999 = vst.msk [vmem:[#allocation4 + $0x90] sm:$0xff] %vm714_vm0, %v1966_v5  ;;  %2758 = vperm.xlu1 %3800, %v4056_v11   ;;  %v5466_v36 = vadd.f32 %v3602_v14, %v2225_v47  ;;  %v5979_v47 = vld [vmem:[#allocation64_spill] sm:$0xff]  ;;  %v1812_v5 = vld [vmem:[#allocation4 + $0xc0] sm:$0xff]  ;;  %v5980_v11 = vld [vmem:[#allocation65_spill] sm:$0xff] }
 0x45a   : > { %v2668_v4 = vld [vmem:[#allocation4 + $0x58] sm:$0xff]  ;;  %v3605_v27 = vadd.f32 %v3604_v2, %v3603_v56  ;;  %v1914_v29 = vpop.xlane.xlu1 %1913  ;;  %v1842_v14 = vmul.f32 %v5979_v47, %v1810_v12  ;;  %v2227_v2 = vmul.f32 0.0, %v5329_v53  ;;  %v2228_v12 = vmul.f32 0.0, %v5325_v32 }
 0x45b   : > { %4065 = vrcp.f32 %v2668_v4  ;;  %1996 = vst.msk [vmem:[#allocation4 + $0x78] sm:$0xff] %vm714_vm0, %v1963_v13  ;;  %v4058_v1 = vpop.eup %4057  ;;  %v1968_v61 = vadd.f32 %v1914_v29, %v1840_v30  ;;  %v1839_v13 = vmul.f32 %v5980_v11, %v1807_v22  ;;  %v1811_v32 = vld [vmem:[#allocation4 + $0xb8] sm:$0xff] }
 0x45c   : > { %v1905_v51 = vpop.xlane.xlu0 %1904  ;;  %v5470_v58 = vadd.f32 %v3605_v27, %v2226_v50  ;;  %v4060_v39 = vpop.eup %4059  ;;  %4067 = vrcp.f32 %v2671_v3  ;;  %v2673_v56 = vld [vmem:[#allocation4 + $0x80] sm:$0xff]  ;;  %v1809_v27 = vld [vmem:[#allocation4 + $0xa8] sm:$0xff] }
 0x45d   : > { %v1965_v34 = vadd.f32 %v1905_v51, %v1837_v42  ;;  %2001 = vst.msk [vmem:[#allocation4 + $0xa0] sm:$0xff] %vm714_vm0, %v1968_v61  ;;  %v3606_v49 = vpop.f32.mrb[76].mxu0  ;;  %2768 = vperm.xlu1 %3800, %v4058_v1   ;;  %2763 = vperm.xlu0 %3799, %v4060_v39   ;;  %v1844_v42 = vmul.f32 %v5107_v8, %v1812_v5  ;;  %v5981_v39 = vld [vmem:[#allocation7_spill] sm:$0xff] }
 0x45e   : > { %v2670_v59 = vld [vmem:[#allocation4 + $0x68] sm:$0xff]  ;;  %v3607_v16 = vpop.f32.mrb[77].mxu0  ;;  %v1920_v40 = vpop.xlane.xlu1 %1919 }
 0x45f   : > { %4069 = vrcp.f32 %v2670_v59  ;;  %1998 = vst.msk [vmem:[#allocation4 + $0x88] sm:$0xff] %vm714_vm0, %v1965_v34  ;;  %v3608_v9 = vadd.f32 %v3607_v16, %v3606_v49  ;;  %v3609_v30 = vpop.f32.mrb[78].mxu0  ;;  %v1970_v50 = vadd.f32 %v1920_v40, %v1842_v14  ;;  %v1841_v34 = vmul.f32 %v5981_v39, %v1809_v27  ;;  %v1814_v59 = vld [vmem:[#allocation4 + $0xd0] sm:$0xff] }
 0x460   : > { %v1911_v4 = vpop.xlane.xlu0 %1910  ;;  %v4062_v3 = vpop.eup %4061  ;;  %4071 = vrcp.f32 %v2673_v56  ;;  %v2675_v53 = vld [vmem:[#allocation4 + $0x90] sm:$0xff]  ;;  %v1846_v11 = vmul.f32 %v5235_v60, %v1814_v59  ;;  %v2230_v39 = vmul.f32 0.0, %v5336_v62  ;;  %v1815_v62 = vld [vmem:[#allocation4 + $0xd8] sm:$0xff] }
 0x461   : > { %v1967_v29 = vadd.f32 %v1911_v4, %v1839_v13  ;;  %v3610_v55 = vpop.f32.mrb[79].mxu0  ;;  %2003 = vst.msk [vmem:[#allocation4 + $0xb0] sm:$0xff] %vm714_vm0, %v1970_v50  ;;  %2773 = vperm.xlu0 %3799, %v4062_v3   ;;  %v5480_v51 = vadd.f32 %v3608_v9, %v2227_v2  ;;  %v4064_v49 = vpop.eup %4063  ;;  %v1816_v13 = vld [vmem:[#allocation4 + $0xe0] sm:$0xff]  ;;  %v2229_v3 = vmul.f32 0.0, %v5346_v38 }
 0x462   : > { %v2672_v1 = vld [vmem:[#allocation4 + $0x78] sm:$0xff]  ;;  %v3611_v61 = vadd.f32 %v3610_v55, %v3609_v30  ;;  %v1926_v22 = vpop.xlane.xlu1 %1925  ;;  %v5982_v50 = vld [vmem:[#allocation66_spill] sm:$0xff] }
 0x463   : > { %4073 = vrcp.f32 %v2672_v1  ;;  %2000 = vst.msk [vmem:[#allocation4 + $0x98] sm:$0xff] %vm714_vm0, %v1967_v29  ;;  %v1972_v8 = vadd.f32 %v1926_v22, %v1844_v42  ;;  %v1843_v4 = vmul.f32 %v5982_v50, %v1811_v32  ;;  %v1813_v1 = vld [vmem:[#allocation4 + $0xc8] sm:$0xff]  ;;  %v1848_v22 = vmul.f32 %v5259_v7, %v1816_v13 }
 0x464   : > { %v1917_v47 = vpop.xlane.xlu0 %1916  ;;  %v5484_v14 = vadd.f32 %v3611_v61, %v2228_v12  ;;  %4075 = vrcp.f32 %v2675_v53  ;;  %v2677_v2 = vld [vmem:[#allocation4 + $0xa0] sm:$0xff] }
 0x465   : > { %v4066_v5 = vpop.eup %4065  ;;  %v1969_v56 = vadd.f32 %v1917_v47, %v1841_v34  ;;  %2005 = vst.msk [vmem:[#allocation4 + $0xc0] sm:$0xff] %vm714_vm0, %v1972_v8  ;;  %v3612_v40 = vpop.f32.mrb[80].mxu0  ;;  %2783 = vperm.xlu0 %3799, %v4064_v49   ;;  %v5983_v47 = vld [vmem:[#allocation67_spill] sm:$0xff] }
 0x466   : > { %v2674_v16 = vld [vmem:[#allocation4 + $0x88] sm:$0xff]  ;;  %2778 = vperm.xlu1 %3800, %v4066_v5   ;;  %v3613_v9 = vpop.f32.mrb[81].mxu0  ;;  %v1932_v30 = vpop.xlane.xlu1 %1931  ;;  %v1845_v32 = vmul.f32 %v5983_v47, %v1813_v1 }
 0x467   : > { %4077 = vrcp.f32 %v2674_v16  ;;  %2002 = vst.msk [vmem:[#allocation4 + $0xa8] sm:$0xff] %vm714_vm0, %v1969_v56  ;;  %v4068_v27 = vpop.eup %4067  ;;  %v3614_v29 = vadd.f32 %v3613_v9, %v3612_v40  ;;  %v3615_v55 = vpop.f32.mrb[82].mxu0  ;;  %v1974_v42 = vadd.f32 %v1932_v30, %v1846_v11  ;;  %v1818_v9 = vld [vmem:[#allocation4 + $0xf0] sm:$0xff] }
 0x468   : > { %v1923_v12 = vpop.xlane.xlu0 %1922  ;;  %v3616_v60 = vpop.f32.mrb[83].mxu0  ;;  %4079 = vrcp.f32 %v2677_v2  ;;  %v2679_v49 = vld [vmem:[#allocation4 + $0xb0] sm:$0xff] }
 0x469   : > { %v4070_v61 = vpop.eup %4069  ;;  %v1971_v53 = vadd.f32 %v1923_v12, %v1843_v4  ;;  %2007 = vst.msk [vmem:[#allocation4 + $0xd0] sm:$0xff] %vm714_vm0, %v1974_v42  ;;  %v3617_v59 = vadd.f32 %v3616_v60, %v3615_v55  ;;  %2793 = vperm.xlu0 %3799, %v4068_v27   ;;  %v5494_v38 = vadd.f32 %v3614_v29, %v2229_v3  ;;  %v2231_v3 = vmul.f32 0.0, %v5354_v33  ;;  %v1817_v12 = vld [vmem:[#allocation4 + $0xe8] sm:$0xff] }
 0x46a   : > { %v2676_v34 = vld [vmem:[#allocation4 + $0x98] sm:$0xff]  ;;  %2788 = vperm.xlu1 %3800, %v4070_v61   ;;  %v1938_v8 = vpop.xlane.xlu1 %1937  ;;  %v4072_v5 = vpop.eup %4071  ;;  %v1847_v4 = vmul.f32 %v5117_v44, %v1815_v62  ;;  %v1850_v60 = vmul.f32 %v5356_v45, %v1818_v9 }
 0x46b   : > { %4081 = vrcp.f32 %v2676_v34  ;;  %2004 = vst.msk [vmem:[#allocation4 + $0xb8] sm:$0xff] %vm714_vm0, %v1971_v53  ;;  %v1976_v7 = vadd.f32 %v1938_v8, %v1848_v22  ;;  %v5498_v16 = vadd.f32 %v3617_v59, %v2230_v39  ;;  %v2232_v22 = vmul.f32 0.0, %v5350_v25  ;;  %v1819_v45 = vld [vmem:[#allocation4 + $0xf8] sm:$0xff] }
 0x46c   : > { %v1929_v56 = vpop.xlane.xlu0 %1928  ;;  %4083 = vrcp.f32 %v2679_v49  ;;  %v2681_v30 = vld [vmem:[#allocation4 + $0xc0] sm:$0xff]  ;;  %v1849_v8 = vmul.f32 %v5253_v10, %v1817_v12  ;;  %v1851_v10 = vmul.f32 %v5341_v46, %v1819_v45 }
 0x46d   : > { %v4074_v40 = vpop.eup %4073  ;;  %v1973_v11 = vadd.f32 %v1929_v56, %v1845_v32  ;;  %2009 = vst.msk [vmem:[#allocation4 + $0xe0] sm:$0xff] %vm714_vm0, %v1976_v7  ;;  %v3618_v2 = vpop.f32.mrb[84].mxu0  ;;  %2803 = vperm.xlu0 %3799, %v4072_v5  }
 0x46e   : > { %v2678_v13 = vld [vmem:[#allocation4 + $0xa8] sm:$0xff]  ;;  %2798 = vperm.xlu1 %3800, %v4074_v40   ;;  %v3619_v50 = vpop.f32.mrb[85].mxu0  ;;  %v4076_v27 = vpop.eup %4075 }
 0x46f   : > { %4085 = vrcp.f32 %v2678_v13  ;;  %2006 = vst.msk [vmem:[#allocation4 + $0xc8] sm:$0xff] %vm714_vm0, %v1973_v11  ;;  %v3620_v29 = vadd.f32 %v3619_v50, %v3618_v2  ;;  %v3621_v55 = vpop.f32.mrb[86].mxu0  ;;  %v2233_v2 = vmul.f32 0.0, %v5393_v23 }
 0x470   : > { %v1935_v42 = vpop.xlane.xlu0 %1934  ;;  %v3622_v53 = vpop.f32.mrb[87].mxu0  ;;  %4087 = vrcp.f32 %v2681_v30  ;;  %v2683_v33 = vld [vmem:[#allocation4 + $0xd0] sm:$0xff] }
 0x471   : > { %v4078_v1 = vpop.eup %4077  ;;  %v1975_v61 = vadd.f32 %v1935_v42, %v1847_v4  ;;  %v3623_v34 = vadd.f32 %v3622_v53, %v3621_v55  ;;  %v1944_v59 = vpop.xlane.xlu1 %1943  ;;  %2813 = vperm.xlu0 %3799, %v4076_v27   ;;  %v5506_v44 = vadd.f32 %v3620_v29, %v2231_v3  ;;  %v2234_v29 = vmul.f32 0.0, %v5391_v17 }
 0x472   : > { %v2680_v39 = vld [vmem:[#allocation4 + $0xb8] sm:$0xff]  ;;  %2808 = vperm.xlu1 %3800, %v4078_v1   ;;  %v1978_v49 = vadd.f32 %v1944_v59, %v1850_v60  ;;  %v4080_v47 = vpop.eup %4079 }
 0x473   : > { %4089 = vrcp.f32 %v2680_v39  ;;  %2008 = vst.msk [vmem:[#allocation4 + $0xd8] sm:$0xff] %vm714_vm0, %v1975_v61  ;;  %v5510_v5 = vadd.f32 %v3623_v34, %v2232_v22 }
 0x474   : > { %v1941_v32 = vpop.xlane.xlu0 %1940  ;;  %2011 = vst.msk [vmem:[#allocation4 + $0xf0] sm:$0xff] %vm714_vm0, %v1978_v49  ;;  %4091 = vrcp.f32 %v2683_v33  ;;  %v2685_v40 = vld [vmem:[#allocation4 + $0xe0] sm:$0xff] }
 0x475   : > { %v4082_v25 = vpop.eup %4081  ;;  %v1977_v7 = vadd.f32 %v1941_v32, %v1849_v8  ;;  %v3624_v62 = vpop.f32.mrb[88].mxu0  ;;  %2823 = vperm.xlu0 %3799, %v4080_v47  }
 0x476   : > { %v2682_v56 = vld [vmem:[#allocation4 + $0xc8] sm:$0xff]  ;;  %2818 = vperm.xlu1 %3800, %v4082_v25   ;;  %v3625_v11 = vpop.f32.mrb[89].mxu0  ;;  %v4084_v13 = vpop.eup %4083 }
 0x477   : > { %4093 = vrcp.f32 %v2682_v56  ;;  %2010 = vst.msk [vmem:[#allocation4 + $0xe8] sm:$0xff] %vm714_vm0, %v1977_v7  ;;  %v3626_v9 = vadd.f32 %v3625_v11, %v3624_v62  ;;  %v3627_v30 = vpop.f32.mrb[90].mxu0  ;;  %v2203_v32 = vpop.permute.xlu1 %2202 }
 0x478   : > { %v1947_v50 = vpop.xlane.xlu0 %1946  ;;  %v3628_v3 = vpop.f32.mrb[91].mxu0  ;;  %4095 = vrcp.f32 %v2685_v40  ;;  %v2236_v40 = vmul.f32 0.0, %v2203_v32 }
 0x479   : > { %v4086_v4 = vpop.eup %4085  ;;  %v1979_v27 = vadd.f32 %v1947_v50, %v1851_v10  ;;  %v3629_v42 = vadd.f32 %v3628_v3, %v3627_v30  ;;  %2833 = vperm.xlu0 %3799, %v4084_v13   ;;  %v5517_v12 = vadd.f32 %v3626_v9, %v2233_v2 }
 0x47a   : > { %v2684_v55 = vld [vmem:[#allocation4 + $0xd8] sm:$0xff]  ;;  %2828 = vperm.xlu1 %3800, %v4086_v4   ;;  %v4088_v46 = vpop.eup %4087 }
 0x47b   : > { %4097 = vrcp.f32 %v2684_v55  ;;  %2012 = vst.msk [vmem:[#allocation4 + $0xf8] sm:$0xff] %vm714_vm0, %v1979_v27  ;;  %v2687_v23 = vld [vmem:[#allocation4 + $0xf0] sm:$0xff]  ;;  %v5520_v1 = vadd.f32 %v3629_v42, %v2234_v29 }
 0x47c   : > { %4099 = vrcp.f32 %v2687_v23 }
 0x47d   : > { %v4090_v61 = vpop.eup %4089  ;;  %2843 = vperm.xlu0 %3799, %v4088_v46  }
 0x47e   : > { %v2686_v53 = vld [vmem:[#allocation4 + $0xe8] sm:$0xff]  ;;  %2838 = vperm.xlu1 %3800, %v4090_v61   ;;  %v4092_v17 = vpop.eup %4091  ;;  %v2198_v8 = vpop.permute.xlu0 %2197 }
 0x47f   : > { %4101 = vrcp.f32 %v2686_v53  ;;  %v2235_v25 = vmul.f32 0.0, %v2198_v8 }
 0x481   : > { %v4094_v60 = vpop.eup %4093  ;;  %2853 = vperm.xlu0 %3799, %v4092_v17  }
 0x482   : > { %v2688_v22 = vld [vmem:[#allocation4 + $0xf8] sm:$0xff]  ;;  %2848 = vperm.xlu1 %3800, %v4094_v60   ;;  %v4096_v39 = vpop.eup %4095 }
 0x483   : > { %4103 = vrcp.f32 %v2688_v22 }
 0x485   : > { %v4098_v34 = vpop.eup %4097  ;;  %2863 = vperm.xlu0 %3799, %v4096_v39  }
 0x486   : > { %2858 = vperm.xlu1 %3800, %v4098_v34   ;;  %v4100_v59 = vpop.eup %4099 }
 0x489   : > { %v4102_v33 = vpop.eup %4101  ;;  %2873 = vperm.xlu0 %3799, %v4100_v59  }
 0x48a   : > { %2868 = vperm.xlu1 %3800, %v4102_v33  }
 0x48d   : > { %v4104_v49 = vpop.eup %4103 }
 0x48e   : > { %2878 = vperm.xlu1 %3800, %v4104_v49  }
 0x4b8   : > { %v3630_v47 = vpop.f32.mrb[92].mxu0 }
 0x4b9   : > { %v3631_v45 = vpop.f32.mrb[93].mxu0 }
 0x4ba   : > { %v3632_v7 = vadd.f32 %v3631_v45, %v3630_v47  ;;  %v3633_v56 = vpop.f32.mrb[94].mxu0 }
 0x4bb   : > { %v3634_v62 = vpop.f32.mrb[95].mxu0 }
 0x4bc   : > { %v3635_v11 = vadd.f32 %v3634_v62, %v3633_v56  ;;  %v5522_v10 = vadd.f32 %v3632_v7, %v2235_v25 }
 0x4be   : > { %v5524_v13 = vadd.f32 %v3635_v11, %v2236_v40 }
 0x4cb   : > { %v2724_v2 = vpop.permute.xlu0 %2723 }
 0x4cc   : > { %v2729_v9 = vpop.permute.xlu1 %2728  ;;  %v2881_v30 = vmul.f32 %v2724_v2, %v5343_v20 }
 0x4cd   : > { %v2882_v50 = vmul.f32 %v2729_v9, %v5331_v15 }
 0x4cf   : > { %v2913_v4 = vpack.c.bf16 %v2882_v50, %v2881_v30  ;;  %v2734_v27 = vpop.permute.xlu0 %2733 }
 0x4d0   : > { %v2739_v3 = vpop.permute.xlu1 %2738  ;;  %v2883_v29 = vmul.f32 %v2734_v27, %v5352_v18 }
 0x4d1   : > { %v2884_v55 = vmul.f32 %v2739_v3, %v5348_v26  ;;  %3724 = vmatprep.mubr.bf16.mxu0 %v2913_v4 }
 0x4d3   : > { %v2914_v42 = vpack.c.bf16 %v2884_v55, %v2883_v29  ;;  %v2744_v46 = vpop.permute.xlu0 %2743 }
 0x4d4   : > { %v2749_v23 = vpop.permute.xlu1 %2748  ;;  %v2885_v61 = vmul.f32 %v2744_v46, %v5372_v63 }
 0x4d5   : > { %v2886_v53 = vmul.f32 %v2749_v23, %v5360_v41  ;;  %3725 = vmatmul.mubr.bf16.vlgmr.msra.gmra.mrb[96].mxu0 %v2914_v42 }
 0x4d7   : > { %v2915_v17 = vpack.c.bf16 %v2886_v53, %v2885_v61  ;;  %v2754_v20 = vpop.permute.xlu0 %2753 }
 0x4d8   : > { %v2759_v60 = vpop.permute.xlu1 %2758  ;;  %v2887_v15 = vmul.f32 %v2754_v20, %v5379_v21 }
 0x4d9   : > { %v2888_v22 = vmul.f32 %v2759_v60, %v5370_v54  ;;  %3728 = vmatprep.mubr.bf16.mxu0 %v2915_v17 }
 0x4db   : > { %v2916_v18 = vpack.c.bf16 %v2888_v22, %v2887_v15 }
 0x4dc   : > { %v2769_v39 = vpop.permute.xlu1 %2768  ;;  %v2764_v26 = vpop.permute.xlu0 %2763 }
 0x4dd   : > { %v2890_v34 = vmul.f32 %v2769_v39, %v5368_v19  ;;  %v2889_v59 = vmul.f32 %v2764_v26, %v5363_v6  ;;  %3729 = vmatmul.mubr.bf16.gmra.mrb[100].mxu0 %v2916_v18  ;;  %v3163_v39 = vld [vmem:[%s4207_s14 + $0x10] sm:$0xff] }
 0x4df   : > { %v2917_v63 = vpack.c.bf16 %v2890_v34, %v2889_v59  ;;  %v3161_v59 = vld [vmem:[%s4207_s14] sm:$0xff] }
 0x4e0   : > { %v2774_v33 = vpop.permute.xlu0 %2773 }
 0x4e1   : > { %3732 = vmatprep.mubr.bf16.mxu1 %v2917_v63  ;;  %v2891_v8 = vmul.f32 %v2774_v33, %v5381_v52  ;;  %v3164_v63 = vld [vmem:[%s4207_s14 + $0x18] sm:$0xff] }
 0x4e4   : > { %v2784_v49 = vpop.permute.xlu0 %2783 }
 0x4e5   : > { %v2779_v41 = vpop.permute.xlu1 %2778  ;;  %v2893_v45 = vmul.f32 %v2784_v49, %v5404_v37 }
 0x4e6   : > { %v2892_v21 = vmul.f32 %v2779_v41, %v5383_v28 }
 0x4e8   : > { %v2918_v47 = vpack.c.bf16 %v2892_v21, %v2891_v8  ;;  %v2794_v32 = vpop.permute.xlu0 %2793  ;;  %v3162_v8 = vld [vmem:[%s4207_s14 + $0x8] sm:$0xff] }
 0x4e9   : > { %v2789_v54 = vpop.permute.xlu1 %2788  ;;  %v2895_v56 = vmul.f32 %v2794_v32, %v5421_v0 }
 0x4ea   : > { %v2894_v25 = vmul.f32 %v2789_v54, %v5408_v31  ;;  %3733 = vmatmul.mubr.bf16.vlgmr.msra.gmra.mrb[64].mxu1 %v2918_v47 }
 0x4ec   : > { %v2919_v19 = vpack.c.bf16 %v2894_v25, %v2893_v45  ;;  %v2804_v7 = vpop.permute.xlu0 %2803  ;;  %v3167_v25 = vld [vmem:[%s4207_s14 + $0x30] sm:$0xff] }
 0x4ed   : > { %v2799_v6 = vpop.permute.xlu1 %2798  ;;  %v2897_v28 = vmul.f32 %v2804_v7, %v5435_v57  ;;  %v3165_v7 = vld [vmem:[%s4207_s14 + $0x20] sm:$0xff] }
 0x4ee   : > { %v2896_v62 = vmul.f32 %v2799_v6, %v5425_v35  ;;  %3736 = vmatprep.mubr.bf16.mxu1 %v2919_v19 }
 0x4f0   : > { %v2920_v40 = vpack.c.bf16 %v2896_v62, %v2895_v56  ;;  %v2814_v11 = vpop.permute.xlu0 %2813 }
 0x4f1   : > { %v2809_v52 = vpop.permute.xlu1 %2808  ;;  %v2899_v30 = vmul.f32 %v2814_v11, %v5452_v24 }
 0x4f2   : > { %v2898_v2 = vmul.f32 %v2809_v52, %v5439_v48  ;;  %3737 = vmatmul.mubr.bf16.gmra.mrb[68].mxu1 %v2920_v40  ;;  %v3168_v40 = vld [vmem:[%s4207_s14 + $0x38] sm:$0xff] }
 0x4f4   : > { %v2921_v37 = vpack.c.bf16 %v2898_v2, %v2897_v28  ;;  %v2824_v31 = vpop.permute.xlu0 %2823  ;;  %v3166_v2 = vld [vmem:[%s4207_s14 + $0x28] sm:$0xff] }
 0x4f5   : > { %v2819_v9 = vpop.permute.xlu1 %2818  ;;  %v2901_v27 = vmul.f32 %v2824_v31, %v5466_v36 }
 0x4f6   : > { %v2900_v50 = vmul.f32 %v2819_v9, %v5456_v43  ;;  %3740 = vmatprep.mubr.bf16.mxu1 %v2921_v37 }
 0x4f8   : > { %v2922_v0 = vpack.c.bf16 %v2900_v50, %v2899_v30  ;;  %v2834_v35 = vpop.permute.xlu0 %2833 }
 0x4f9   : > { %v2829_v4 = vpop.permute.xlu1 %2828  ;;  %v2903_v55 = vmul.f32 %v2834_v35, %v5480_v51 }
 0x4fa   : > { %v2902_v3 = vmul.f32 %v2829_v4, %v5470_v58  ;;  %3741 = vmatmul.mubr.bf16.gmra.mrb[72].mxu1 %v2922_v0  ;;  %v3171_v0 = vld [vmem:[%s4207_s14 + $0x50] sm:$0xff] }
 0x4fc   : > { %v2923_v57 = vpack.c.bf16 %v2902_v3, %v2901_v27  ;;  %v2844_v48 = vpop.permute.xlu0 %2843  ;;  %v3169_v27 = vld [vmem:[%s4207_s14 + $0x40] sm:$0xff] }
 0x4fd   : > { %v2839_v29 = vpop.permute.xlu1 %2838  ;;  %v2905_v23 = vmul.f32 %v2844_v48, %v5494_v38 }
 0x4fe   : > { %v2904_v42 = vmul.f32 %v2839_v29, %v5484_v14  ;;  %3744 = vmatprep.mubr.bf16.mxu1 %v2923_v57  ;;  %v3172_v29 = vld [vmem:[%s4207_s14 + $0x58] sm:$0xff] }
 0x500   : > { %v2924_v24 = vpack.c.bf16 %v2904_v42, %v2903_v55  ;;  %v2854_v43 = vpop.permute.xlu0 %2853 }
 0x501   : > { %v2849_v46 = vpop.permute.xlu1 %2848  ;;  %v2907_v17 = vmul.f32 %v2854_v43, %v5506_v44 }
 0x502   : > { %v2906_v61 = vmul.f32 %v2849_v46, %v5498_v16  ;;  %3745 = vmatmul.mubr.bf16.gmra.mrb[76].mxu1 %v2924_v24  ;;  %v3170_v24 = vld [vmem:[%s4207_s14 + $0x48] sm:$0xff] }
 0x504   : > { %v2925_v36 = vpack.c.bf16 %v2906_v61, %v2905_v23  ;;  %v2864_v58 = vpop.permute.xlu0 %2863 }
 0x505   : > { %v2859_v53 = vpop.permute.xlu1 %2858  ;;  %v2909_v60 = vmul.f32 %v2864_v58, %v5517_v12  ;;  %v5561_v12 = vld [vmem:[%s5681_s6] ss:$0 sm:$0xff] }
 0x506   : > { %v2908_v20 = vmul.f32 %v2859_v53, %v5510_v5  ;;  %3748 = vmatprep.mubr.bf16.mxu1 %v2925_v36  ;;  %v3175_v53 = vld [vmem:[%s4207_s14 + $0x70] sm:$0xff] }
 0x508   : > { %v2926_v51 = vpack.c.bf16 %v2908_v20, %v2907_v17  ;;  %v2874_v38 = vpop.permute.xlu0 %2873  ;;  %v3173_v20 = vld [vmem:[%s4207_s14 + $0x60] sm:$0xff] }
 0x509   : > { %v2869_v14 = vpop.permute.xlu1 %2868  ;;  %v2911_v18 = vmul.f32 %v2874_v38, %v5522_v10 }
 0x50a   : > { %v2910_v15 = vmul.f32 %v2869_v14, %v5520_v1  ;;  %3749 = vmatmul.mubr.bf16.gmra.mrb[80].mxu1 %v2926_v51 }
 0x50c   : > { %v2927_v16 = vpack.c.bf16 %v2910_v15, %v2909_v60  ;;  %v3176_v60 = vld [vmem:[%s4207_s14 + $0x78] sm:$0xff] }
 0x50d   : > { %v2879_v22 = vpop.permute.xlu1 %2878 }
 0x50e   : > { %v2912_v44 = vmul.f32 %v2879_v22, %v5524_v13  ;;  %3752 = vmatprep.mubr.bf16.mxu1 %v2927_v16  ;;  %v3174_v22 = vld [vmem:[%s4207_s14 + $0x68] sm:$0xff] }
 0x510   : > { %v2928_v5 = vpack.c.bf16 %v2912_v44, %v2911_v18 }
 0x512   : > { %3753 = vmatmul.mubr.bf16.gmra.mrb[84].mxu1 %v2928_v5 }
 0x5a8   : > { %v3726_v1 = vpop.f32.mrb[96].mxu0 }
 0x5a9   : > { %v3043_v26 = vadd.f32 %v3726_v1, %v5561_v12  ;;  %v3034_v34 = vpop.f32.mrb[97].mxu0 }
 0x5aa   : > { %v3035_v10 = vadd.f32 %v5561_v12, %v3034_v34  ;;  %v3727_v13 = vpop.f32.mrb[98].mxu0 }
 0x5ab   : > { %v3195_v33 = vadd.f32 %v3163_v39, %v3043_v26  ;;  %v3046_v41 = vadd.f32 %v3727_v13, %v5561_v12  ;;  %v3037_v49 = vpop.f32.mrb[99].mxu0  ;;  %v3179_v26 = vld [vmem:[%s4207_s14 + $0x90] sm:$0xff] }
 0x5ac   : > { %v3193_v21 = vadd.f32 %v3161_v59, %v3035_v10  ;;  %v3038_v47 = vadd.f32 %v5561_v12, %v3037_v49  ;;  %v3177_v10 = vld [vmem:[%s4207_s14 + $0x80] sm:$0xff] }
 0x5ad   : > { %3227 = vst [vmem:[%s5571_s20 + $0x10] sm:$0xff] %v3195_v33  ;;  %v3196_v54 = vadd.f32 %v3164_v63, %v3046_v41  ;;  %v3180_v33 = vld [vmem:[%s4207_s14 + $0x98] sm:$0xff] }
 0x5ae   : > { %3225 = vst [vmem:[%s5571_s20] sm:$0xff] %v3193_v21  ;;  %v3194_v32 = vadd.f32 %v3162_v8, %v3038_v47  ;;  %v3178_v21 = vld [vmem:[%s4207_s14 + $0x88] sm:$0xff] }
 0x5af   : > { %3228 = vst [vmem:[%s5571_s20 + $0x18] sm:$0xff] %v3196_v54 }
 0x5b0   : > { %3226 = vst [vmem:[%s5571_s20 + $0x8] sm:$0xff] %v3194_v32  ;;  %v3730_v45 = vpop.f32.mrb[100].mxu0 }
 0x5b1   : > { %v3059_v19 = vadd.f32 %v3730_v45, %v5561_v12  ;;  %v3050_v6 = vpop.f32.mrb[101].mxu0 }
 0x5b2   : > { %v3051_v56 = vadd.f32 %v5561_v12, %v3050_v6  ;;  %v3731_v62 = vpop.f32.mrb[102].mxu0 }
 0x5b3   : > { %v3199_v52 = vadd.f32 %v3167_v25, %v3059_v19  ;;  %v3062_v11 = vadd.f32 %v3731_v62, %v5561_v12  ;;  %v3053_v28 = vpop.f32.mrb[103].mxu0  ;;  %v3183_v19 = vld [vmem:[%s4207_s14 + $0xb0] sm:$0xff] }
 0x5b4   : > { %v3197_v37 = vadd.f32 %v3165_v7, %v3051_v56  ;;  %v3054_v9 = vadd.f32 %v5561_v12, %v3053_v28  ;;  %v3181_v56 = vld [vmem:[%s4207_s14 + $0xa0] sm:$0xff] }
 0x5b5   : > { %3231 = vst [vmem:[%s5571_s20 + $0x30] sm:$0xff] %v3199_v52  ;;  %v3200_v31 = vadd.f32 %v3168_v40, %v3062_v11  ;;  %v3184_v52 = vld [vmem:[%s4207_s14 + $0xb8] sm:$0xff] }
 0x5b6   : > { %3229 = vst [vmem:[%s5571_s20 + $0x20] sm:$0xff] %v3197_v37  ;;  %v3198_v30 = vadd.f32 %v3166_v2, %v3054_v9  ;;  %v3182_v37 = vld [vmem:[%s4207_s14 + $0xa8] sm:$0xff] }
 0x5b7   : > { %3232 = vst [vmem:[%s5571_s20 + $0x38] sm:$0xff] %v3200_v31 }
 0x5b8   : > { %3230 = vst [vmem:[%s5571_s20 + $0x28] sm:$0xff] %v3198_v30 }
 0x5bd   : > { %v3734_v50 = vpop.f32.mrb[64].mxu1 }
 0x5be   : > { %v3075_v4 = vadd.f32 %v3734_v50, %v5561_v12  ;;  %v3066_v35 = vpop.f32.mrb[65].mxu1 }
 0x5bf   : > { %v3067_v3 = vadd.f32 %v5561_v12, %v3066_v35  ;;  %v3735_v57 = vpop.f32.mrb[66].mxu1 }
 0x5c0   : > { %v3203_v48 = vadd.f32 %v3171_v0, %v3075_v4  ;;  %v3078_v55 = vadd.f32 %v3735_v57, %v5561_v12  ;;  %v3069_v42 = vpop.f32.mrb[67].mxu1  ;;  %v3187_v4 = vld [vmem:[%s4207_s14 + $0xd0] sm:$0xff] }
 0x5c1   : > { %v3201_v46 = vadd.f32 %v3169_v27, %v3067_v3  ;;  %v3070_v43 = vadd.f32 %v5561_v12, %v3069_v42  ;;  %v3185_v3 = vld [vmem:[%s4207_s14 + $0xc0] sm:$0xff] }
 0x5c2   : > { %3235 = vst [vmem:[%s5571_s20 + $0x50] sm:$0xff] %v3203_v48  ;;  %v3204_v23 = vadd.f32 %v3172_v29, %v3078_v55  ;;  %v3188_v48 = vld [vmem:[%s4207_s14 + $0xd8] sm:$0xff] }
 0x5c3   : > { %3233 = vst [vmem:[%s5571_s20 + $0x40] sm:$0xff] %v3201_v46  ;;  %v3202_v61 = vadd.f32 %v3170_v24, %v3070_v43  ;;  %v3186_v46 = vld [vmem:[%s4207_s14 + $0xc8] sm:$0xff] }
 0x5c4   : > { %3236 = vst [vmem:[%s5571_s20 + $0x58] sm:$0xff] %v3204_v23 }
 0x5c5   : > { %3234 = vst [vmem:[%s5571_s20 + $0x48] sm:$0xff] %v3202_v61  ;;  %v3738_v36 = vpop.f32.mrb[68].mxu1 }
 0x5c6   : > { %v3091_v58 = vadd.f32 %v3738_v36, %v5561_v12  ;;  %v3082_v17 = vpop.f32.mrb[69].mxu1 }
 0x5c7   : > { %v3083_v51 = vadd.f32 %v5561_v12, %v3082_v17  ;;  %v3739_v14 = vpop.f32.mrb[70].mxu1 }
 0x5c8   : > { %v3207_v15 = vadd.f32 %v3175_v53, %v3091_v58  ;;  %v3094_v38 = vadd.f32 %v3739_v14, %v5561_v12  ;;  %v3085_v16 = vpop.f32.mrb[71].mxu1  ;;  %v3191_v58 = vld [vmem:[%s4207_s14 + $0xf0] sm:$0xff] }
 0x5c9   : > { %v3205_v18 = vadd.f32 %v3173_v20, %v3083_v51  ;;  %v3086_v44 = vadd.f32 %v5561_v12, %v3085_v16  ;;  %v3189_v51 = vld [vmem:[%s4207_s14 + $0xe0] sm:$0xff] }
 0x5ca   : > { %3239 = vst [vmem:[%s5571_s20 + $0x70] sm:$0xff] %v3207_v15  ;;  %v3208_v5 = vadd.f32 %v3176_v60, %v3094_v38  ;;  %v3192_v15 = vld [vmem:[%s4207_s14 + $0xf8] sm:$0xff] }
 0x5cb   : > { %3237 = vst [vmem:[%s5571_s20 + $0x60] sm:$0xff] %v3205_v18  ;;  %v3206_v1 = vadd.f32 %v3174_v22, %v3086_v44  ;;  %v3190_v18 = vld [vmem:[%s4207_s14 + $0xe8] sm:$0xff] }
 0x5cc   : > { %3240 = vst [vmem:[%s5571_s20 + $0x78] sm:$0xff] %v3208_v5 }
 0x5cd   : > { %3238 = vst [vmem:[%s5571_s20 + $0x68] sm:$0xff] %v3206_v1  ;;  %v3742_v39 = vpop.f32.mrb[72].mxu1 }
 0x5ce   : > { %v3107_v34 = vadd.f32 %v3742_v39, %v5561_v12  ;;  %v3098_v59 = vpop.f32.mrb[73].mxu1 }
 0x5cf   : > { %v3099_v13 = vadd.f32 %v5561_v12, %v3098_v59  ;;  %v3743_v63 = vpop.f32.mrb[74].mxu1 }
 0x5d0   : > { %v3211_v41 = vadd.f32 %v3179_v26, %v3107_v34  ;;  %v3110_v49 = vadd.f32 %v3743_v63, %v5561_v12  ;;  %v3101_v8 = vpop.f32.mrb[75].mxu1 }
 0x5d1   : > { %v3209_v47 = vadd.f32 %v3177_v10, %v3099_v13  ;;  %v3102_v54 = vadd.f32 %v5561_v12, %v3101_v8 }
 0x5d2   : > { %3243 = vst [vmem:[%s5571_s20 + $0x90] sm:$0xff] %v3211_v41  ;;  %v3212_v32 = vadd.f32 %v3180_v33, %v3110_v49 }
 0x5d3   : > { %3241 = vst [vmem:[%s5571_s20 + $0x80] sm:$0xff] %v3209_v47  ;;  %v3210_v45 = vadd.f32 %v3178_v21, %v3102_v54 }
 0x5d4   : > { %3244 = vst [vmem:[%s5571_s20 + $0x98] sm:$0xff] %v3212_v32 }
 0x5d5   : > { %3242 = vst [vmem:[%s5571_s20 + $0x88] sm:$0xff] %v3210_v45  ;;  %v3746_v25 = vpop.f32.mrb[76].mxu1 }
 0x5d6   : > { %v3123_v6 = vadd.f32 %v3746_v25, %v5561_v12  ;;  %v3114_v7 = vpop.f32.mrb[77].mxu1 }
 0x5d7   : > { %v3115_v62 = vadd.f32 %v5561_v12, %v3114_v7  ;;  %v3747_v40 = vpop.f32.mrb[78].mxu1 }
 0x5d8   : > { %v3215_v11 = vadd.f32 %v3183_v19, %v3123_v6  ;;  %v3126_v28 = vadd.f32 %v3747_v40, %v5561_v12  ;;  %v3117_v2 = vpop.f32.mrb[79].mxu1 }
 0x5d9   : > { %v3213_v9 = vadd.f32 %v3181_v56, %v3115_v62  ;;  %v3118_v31 = vadd.f32 %v5561_v12, %v3117_v2 }
 0x5da   : > { %3247 = vst [vmem:[%s5571_s20 + $0xb0] sm:$0xff] %v3215_v11  ;;  %v3216_v30 = vadd.f32 %v3184_v52, %v3126_v28 }
 0x5db   : > { %3245 = vst [vmem:[%s5571_s20 + $0xa0] sm:$0xff] %v3213_v9  ;;  %v3214_v50 = vadd.f32 %v3182_v37, %v3118_v31 }
 0x5dc   : > { %3248 = vst [vmem:[%s5571_s20 + $0xb8] sm:$0xff] %v3216_v30 }
 0x5dd   : > { %3246 = vst [vmem:[%s5571_s20 + $0xa8] sm:$0xff] %v3214_v50  ;;  %v3750_v0 = vpop.f32.mrb[80].mxu1 }
 0x5de   : > { %v3139_v35 = vadd.f32 %v3750_v0, %v5561_v12  ;;  %v3130_v27 = vpop.f32.mrb[81].mxu1 }
 0x5df   : > { %v3131_v57 = vadd.f32 %v5561_v12, %v3130_v27  ;;  %v3751_v29 = vpop.f32.mrb[82].mxu1 }
 0x5e0   : > { %v3219_v55 = vadd.f32 %v3187_v4, %v3139_v35  ;;  %v3142_v42 = vadd.f32 %v3751_v29, %v5561_v12  ;;  %v3133_v24 = vpop.f32.mrb[83].mxu1 }
 0x5e1   : > { %v3217_v43 = vadd.f32 %v3185_v3, %v3131_v57  ;;  %v3134_v23 = vadd.f32 %v5561_v12, %v3133_v24 }
 0x5e2   : > { %3251 = vst [vmem:[%s5571_s20 + $0xd0] sm:$0xff] %v3219_v55  ;;  %v3220_v61 = vadd.f32 %v3188_v48, %v3142_v42 }
 0x5e3   : > { %3249 = vst [vmem:[%s5571_s20 + $0xc0] sm:$0xff] %v3217_v43  ;;  %v3218_v36 = vadd.f32 %v3186_v46, %v3134_v23 }
 0x5e4   : > { %3252 = vst [vmem:[%s5571_s20 + $0xd8] sm:$0xff] %v3220_v61 }
 0x5e5   : > { %3250 = vst [vmem:[%s5571_s20 + $0xc8] sm:$0xff] %v3218_v36  ;;  %v3754_v53 = vpop.f32.mrb[84].mxu1 }
 0x5e6   : > { %v3155_v17 = vadd.f32 %v3754_v53, %v5561_v12  ;;  %v3146_v20 = vpop.f32.mrb[85].mxu1 }
 0x5e7   : > { %v3147_v14 = vadd.f32 %v5561_v12, %v3146_v20  ;;  %v3755_v60 = vpop.f32.mrb[86].mxu1 }
 0x5e8   : > { %v3223_v38 = vadd.f32 %v3191_v58, %v3155_v17  ;;  %v3158_v16 = vadd.f32 %v3755_v60, %v5561_v12  ;;  %v3149_v22 = vpop.f32.mrb[87].mxu1 }
 0x5e9   : > { %v3221_v44 = vadd.f32 %v3189_v51, %v3147_v14  ;;  %v3150_v5 = vadd.f32 %v5561_v12, %v3149_v22 }
 0x5ea   : > { %3255 = vst [vmem:[%s5571_s20 + $0xf0] sm:$0xff] %v3223_v38  ;;  %v3224_v1 = vadd.f32 %v3192_v15, %v3158_v16 }
 0x5eb   : > { %3253 = vst [vmem:[%s5571_s20 + $0xe0] sm:$0xff] %v3221_v44  ;;  %v3222_v39 = vadd.f32 %v3190_v18, %v3150_v5 }
 0x5ec   : > { %3256 = vst [vmem:[%s5571_s20 + $0xf8] sm:$0xff] %v3224_v1 }
 0x5ed   : > { %3254 = vst [vmem:[%s5571_s20 + $0xe8] sm:$0xff] %v3222_v39 }
 0x5ee PF: > { %s17_s26 = sadd.s32 1, %s4127_s26   ;;  %s5984_s24 = smov %s4123_s25 }
 0x5ef   : > { %p14_p5 = scmp.ge.s32.totalorder %s17_s26, 4   ;;  %s5985_s25 = smov %s5987_s27 }
 0x5f1   :  { %16 = sbr.rel (!%p14_p5) target bundleno = 2 (0x2), region = 92 }

</bundles_post_ra>
